<compile_context>
chip_gen: v7x
topology: tpu7x:2x2x1
jax: 0.10.0
libtpu: 0.0.40
codegen_flags: <defaults>
</compile_context>

<pallas_src>
import jax
import jax.numpy as jnp
from jax.experimental import pallas as pl
from jax.experimental.pallas import tpu as pltpu


def _make_kernel(mxu_dtype):
    prec = jax.lax.Precision.HIGHEST if mxu_dtype == jnp.float32 else None

    def mxu(a, b):
        return jnp.dot(a.astype(mxu_dtype), b.astype(mxu_dtype),
                       preferred_element_type=jnp.float32, precision=prec)

    def kernel(x_ref, pool_ref, w1bd_ref, shift_ref, whbd_ref, wwbd_ref,
               eh_ref, ew_ref, o_ref):
        # x_ref: (nb*C, H*W) lane-dense block, rows ordered (sample, channel).
        x2 = x_ref[...].astype(jnp.float32)                     # (nbC, HW)

        # 1) coordinate pooling (mean over W | mean over H) + concat: 1 matmul
        cat = mxu(x2, pool_ref[...])                            # (nbC, L)

        # 2) 1x1 conv (BN scale folded, block-diagonal over the fused batch)
        #    + BN shift + ReLU.  Output layout: (nb*midp, L).
        y = mxu(w1bd_ref[...], cat) + shift_ref[...]            # (nbM, L)
        y = jnp.maximum(y, 0.0)

        # 3) F_h / F_w 1x1 convs (block-diagonal) + sigmoid over full L;
        #    the h/w split happens inside the expansion matrices below.
        s_h = jax.nn.sigmoid(mxu(whbd_ref[...], y))             # (nbC, L)
        s_w = jax.nn.sigmoid(mxu(wwbd_ref[...], y))             # (nbC, L)

        # 4) broadcast gates back onto the flattened H*W lanes (0/1 matmuls)
        gate = mxu(s_h, eh_ref[...]) * mxu(s_w, ew_ref[...])    # (nbC, HW)

        # 5) out[n,c,h,w] = x * s_h[n,c,h] * s_w[n,c,w]  (lane-dense store)
        o_ref[...] = (x2 * gate).astype(o_ref.dtype)

    return kernel


def ca_block(x, w1, gamma, beta, rmean, rvar, wh, ww, *, eps=1e-5, nb=None,
             mxu_dtype=jnp.float32):
    """Coordinate-Attention block forward.

    x: (N, C, H, W); w1: (mid, C); gamma/beta/rmean/rvar: (mid,);
    wh, ww: (C, mid). Returns (N, C, H, W).
    """
    N, C, H, W = x.shape
    mid = w1.shape[0]
    HW, L = H * W, H + W
    f32 = jnp.float32
    itemsize = x.dtype.itemsize

    # ---- host-side parameter prep: BN fold, padding of mid to 8 sublanes ----
    scale = gamma / jnp.sqrt(rvar + eps)
    shift = beta - rmean * scale
    midp = max(8, ((mid + 7) // 8) * 8)
    w1f = jnp.zeros((midp, C), f32).at[:mid, :].set(scale[:, None] * w1)
    shiftp = jnp.zeros((midp,), f32).at[:mid].set(shift)
    whp = jnp.zeros((C, midp), f32).at[:, :mid].set(wh)
    wwp = jnp.zeros((C, midp), f32).at[:, :mid].set(ww)

    # Pooling matrix (HW, H+W): columns = [mean over W | mean over H].
    k = jnp.arange(HW)
    ph = (k[:, None] // W == jnp.arange(H)[None, :]).astype(f32) / W
    pw = (k[:, None] % W == jnp.arange(W)[None, :]).astype(f32) / H
    pool = jnp.concatenate([ph, pw], axis=1)                        # (HW, L)

    # Expansion matrices (L, HW): select the h-part / w-part of the gate and
    # broadcast it onto the flattened H*W axis (zero rows drop the other part).
    eh = jnp.zeros((L, HW), f32).at[:H, :].set(
        (jnp.arange(H)[:, None] == k[None, :] // W).astype(f32))
    ew = jnp.zeros((L, HW), f32).at[H:, :].set(
        (jnp.arange(W)[:, None] == k[None, :] % W).astype(f32))

    # ---- samples per grid step: keep >=2 steps (megacore), modest blocks ----
    if nb is None:
        if C % 8 != 0:
            nb = N                       # full-array block sidesteps (8,128) rule
        else:
            x_budget = 4 * 1024 * 1024   # bytes per x block buffer
            bd_budget = 2 * 1024 * 1024  # bytes per block-diagonal weight
            nb = 1
            max_nb = N if N == 1 else N // 2
            for cand in range(1, max_nb + 1):
                if N % cand != 0:
                    continue
                if cand * C * HW * itemsize > x_budget:
                    continue
                if cand * cand * C * midp * 4 > bd_budget:
                    continue
                nb = cand
    if N % nb != 0:
        raise ValueError("nb must divide N")
    if nb != N and (nb * C) % 8 != 0:
        raise ValueError("nb*C must be a multiple of 8 (or nb == N)")
    grid = (N // nb,)

    # Block-diagonal weights: one matmul applies the 1x1 conv to all nb samples.
    eye_nb = jnp.eye(nb, dtype=f32)
    w1bd = jnp.kron(eye_nb, w1f)                         # (nb*midp, nb*C)
    whbd = jnp.kron(eye_nb, whp)                         # (nb*C, nb*midp)
    wwbd = jnp.kron(eye_nb, wwp)                         # (nb*C, nb*midp)
    shift_col = jnp.tile(shiftp, nb).reshape(nb * midp, 1)

    x2 = x.reshape(N * C, HW)                            # lane-dense, free reshape

    block_bytes = nb * C * HW * itemsize
    weight_bytes = 4 * (pool.size + eh.size + ew.size + w1bd.size
                        + whbd.size + wwbd.size + shift_col.size)
    interm_bytes = 8 * nb * C * HW * 4
    vmem_limit = int(min(64 * 2**20,
                         max(16 * 2**20,
                             4 * block_bytes + weight_bytes + interm_bytes
                             + 2 * 2**20)))

    flops = 2 * N * C * HW * L                              # pooling
    flops += 2 * (N // nb) * (nb * midp) * (nb * C) * L     # conv1x1 (blockdiag)
    flops += 2 * 2 * (N // nb) * (nb * C) * (nb * midp) * L # F_h / F_w
    flops += 2 * 2 * N * C * L * HW                         # gate expansion
    flops += 3 * N * C * HW                                 # elementwise
    cost = pl.CostEstimate(flops=int(flops),
                           transcendentals=int(2 * N * C * L),
                           bytes_accessed=int(2 * N * C * HW * itemsize
                                              + weight_bytes))

    kernel = _make_kernel(mxu_dtype)
    out2 = pl.pallas_call(
        kernel,
        out_shape=jax.ShapeDtypeStruct((N * C, HW), x.dtype),
        grid=grid,
        in_specs=[
            pl.BlockSpec((nb * C, HW), lambda n: (n, 0)),        # x block
            pl.BlockSpec((HW, L), lambda n: (0, 0)),             # pooling matrix
            pl.BlockSpec((nb * midp, nb * C), lambda n: (0, 0)), # conv1x1 (BN folded)
            pl.BlockSpec((nb * midp, 1), lambda n: (0, 0)),      # BN shift column
            pl.BlockSpec((nb * C, nb * midp), lambda n: (0, 0)), # F_h weight
            pl.BlockSpec((nb * C, nb * midp), lambda n: (0, 0)), # F_w weight
            pl.BlockSpec((L, HW), lambda n: (0, 0)),             # h expansion
            pl.BlockSpec((L, HW), lambda n: (0, 0)),             # w expansion
        ],
        out_specs=pl.BlockSpec((nb * C, HW), lambda n: (n, 0)),
        compiler_params=pltpu.CompilerParams(
            dimension_semantics=("parallel",),
            vmem_limit_bytes=vmem_limit),
        cost_estimate=cost,
    )(x2, pool, w1bd, shift_col, whbd, wwbd, eh, ew)
    return out2.reshape(N, C, H, W)


def ca_block_ref(x, w1, gamma, beta, rmean, rvar, wh, ww, eps=1e-5):
    """Plain-JAX reference replicating the PyTorch forward (eval-mode BN)."""
    hp = jax.lax.Precision.HIGHEST
    x_h = jnp.mean(x, axis=3)                            # (N, C, H)
    x_w = jnp.mean(x, axis=2)                            # (N, C, W)
    cat = jnp.concatenate([x_h, x_w], axis=2)            # (N, C, H+W)
    y = jnp.einsum('oc,ncl->nol', w1, cat, precision=hp)
    y = (y - rmean[None, :, None]) / jnp.sqrt(rvar[None, :, None] + eps)
    y = y * gamma[None, :, None] + beta[None, :, None]
    y = jnp.maximum(y, 0.0)
    H = x.shape[2]
    s_h = jax.nn.sigmoid(jnp.einsum('om,nml->nol', wh, y[:, :, :H], precision=hp))
    s_w = jax.nn.sigmoid(jnp.einsum('om,nml->nol', ww, y[:, :, H:], precision=hp))
    return x * s_h[:, :, :, None] * s_w[:, :, None, :]


if __name__ == "__main__":
    # Small shapes consistent with the module (reduction=16 => channel >= 16).
    N, C, H, W = 4, 64, 8, 8
    reduction = 16
    mid = C // reduction
    eps = 1e-5

    key = jax.random.PRNGKey(0)
    kx, k1, k2, k3, k4, k5, k6, k7 = jax.random.split(key, 8)

    x = jax.random.normal(kx, (N, C, H, W), dtype=jnp.float32)

    # 1x1 conv weights ((out, in, 1, 1) stored as 2-D).
    w1 = jax.random.normal(k1, (mid, C), dtype=jnp.float32) * 0.1
    wh = jax.random.normal(k2, (C, mid), dtype=jnp.float32) * 0.1
    ww = jax.random.normal(k3, (C, mid), dtype=jnp.float32) * 0.1

    # BatchNorm (eval-mode) deterministic parameters.
    gamma = 1.0 + 0.1 * jax.random.normal(k4, (mid,), dtype=jnp.float32)
    beta = 0.1 * jax.random.normal(k5, (mid,), dtype=jnp.float32)
    rmean = 0.1 * jax.random.normal(k6, (mid,), dtype=jnp.float32)
    rvar = 1.0 + 0.1 * jax.random.uniform(k7, (mid,), dtype=jnp.float32)

    out = ca_block(x, w1, gamma, beta, rmean, rvar, wh, ww, eps=eps)
    out = jax.block_until_ready(out)

    ref = jax.block_until_ready(
        ca_block_ref(x, w1, gamma, beta, rmean, rvar, wh, ww, eps))

    if not jnp.allclose(out, ref, atol=5e-5, rtol=5e-5):
        max_err = float(jnp.max(jnp.abs(out - ref)))
        raise AssertionError(
            f"Pallas CA_Block output mismatch vs JAX reference (max abs err {max_err})")

    print("KERNEL_OK")
</pallas_src>

<mosaic_0001>
module attributes {stable_mosaic.version = 11 : i64} {
  func.func @kernel(%arg0: i32, %arg1: memref<128x64xf32, #tpu.memory_space<vmem>>, %arg2: memref<64x16xf32, #tpu.memory_space<vmem>>, %arg3: memref<16x128xf32, #tpu.memory_space<vmem>>, %arg4: memref<16x1xf32, #tpu.memory_space<vmem>>, %arg5: memref<128x16xf32, #tpu.memory_space<vmem>>, %arg6: memref<128x16xf32, #tpu.memory_space<vmem>>, %arg7: memref<16x64xf32, #tpu.memory_space<vmem>>, %arg8: memref<16x64xf32, #tpu.memory_space<vmem>>, %arg9: memref<128x64xf32, #tpu.memory_space<vmem>>) attributes {dimension_semantics = [#tpu.dimension_semantics<parallel>], iteration_bounds = array<i64: 2>, scalar_prefetch = 0 : i64, scratch_operands = 0 : i64, tpu.core_type = #tpu.core_type<tc>, window_params = [{transform_indices = @transform_0, window_bounds = array<i64: 128, 64>}, {pipeline_mode = #tpu.pipeline_mode<synchronous>, transform_indices = @transform_1, window_bounds = array<i64: 64, 16>}, {pipeline_mode = #tpu.pipeline_mode<synchronous>, transform_indices = @transform_2, window_bounds = array<i64: 16, 128>}, {pipeline_mode = #tpu.pipeline_mode<synchronous>, transform_indices = @transform_3, window_bounds = array<i64: 16, 1>}, {pipeline_mode = #tpu.pipeline_mode<synchronous>, transform_indices = @transform_4, window_bounds = array<i64: 128, 16>}, {pipeline_mode = #tpu.pipeline_mode<synchronous>, transform_indices = @transform_5, window_bounds = array<i64: 128, 16>}, {pipeline_mode = #tpu.pipeline_mode<synchronous>, transform_indices = @transform_6, window_bounds = array<i64: 16, 64>}, {pipeline_mode = #tpu.pipeline_mode<synchronous>, transform_indices = @transform_7, window_bounds = array<i64: 16, 64>}, {transform_indices = @transform_8, window_bounds = array<i64: 128, 64>}]} {
    %c0 = arith.constant 0 : index
    %c0_0 = arith.constant 0 : index
    %0 = vector.load %arg1[%c0, %c0_0] : memref<128x64xf32, #tpu.memory_space<vmem>>, vector<128x64xf32>
    %c0_1 = arith.constant 0 : index
    %c0_2 = arith.constant 0 : index
    %1 = vector.load %arg2[%c0_1, %c0_2] : memref<64x16xf32, #tpu.memory_space<vmem>>, vector<64x16xf32>
    %cst = arith.constant dense<0.000000e+00> : vector<128x16xf32>
    %2 = tpu.matmul %0, %1, %cst {dimension_numbers = #tpu.dot_dimension_numbers<[1], [0], [0], [1], [0, 0, 1, 1], [], []>, precision = #tpu.contract_precision<fp32>} : vector<128x64xf32>, vector<64x16xf32>, vector<128x16xf32> -> vector<128x16xf32>
    %c0_3 = arith.constant 0 : index
    %c0_4 = arith.constant 0 : index
    %3 = vector.load %arg3[%c0_3, %c0_4] : memref<16x128xf32, #tpu.memory_space<vmem>>, vector<16x128xf32>
    %cst_5 = arith.constant dense<0.000000e+00> : vector<16x16xf32>
    %4 = tpu.matmul %3, %2, %cst_5 {dimension_numbers = #tpu.dot_dimension_numbers<[1], [0], [0], [1], [0, 0, 1, 1], [], []>, precision = #tpu.contract_precision<fp32>} : vector<16x128xf32>, vector<128x16xf32>, vector<16x16xf32> -> vector<16x16xf32>
    %c0_6 = arith.constant 0 : index
    %c0_7 = arith.constant 0 : index
    %5 = vector.load %arg4[%c0_6, %c0_7] : memref<16x1xf32, #tpu.memory_space<vmem>>, vector<16x1xf32>
    %6 = vector.broadcast %5 : vector<16x1xf32> to vector<16x16xf32>
    %7 = arith.addf %4, %6 : vector<16x16xf32>
    %cst_8 = arith.constant 0.000000e+00 : f32
    %8 = vector.broadcast %cst_8 : f32 to vector<16x16xf32>
    %9 = arith.maximumf %7, %8 : vector<16x16xf32>
    %c0_9 = arith.constant 0 : index
    %c0_10 = arith.constant 0 : index
    %10 = vector.load %arg5[%c0_9, %c0_10] : memref<128x16xf32, #tpu.memory_space<vmem>>, vector<128x16xf32>
    %cst_11 = arith.constant dense<0.000000e+00> : vector<128x16xf32>
    %11 = tpu.matmul %10, %9, %cst_11 {dimension_numbers = #tpu.dot_dimension_numbers<[1], [0], [0], [1], [0, 0, 1, 1], [], []>, precision = #tpu.contract_precision<fp32>} : vector<128x16xf32>, vector<16x16xf32>, vector<128x16xf32> -> vector<128x16xf32>
    %12 = arith.negf %11 : vector<128x16xf32>
    %13 = math.exp %12 : vector<128x16xf32>
    %cst_12 = arith.constant 1.000000e+00 : f32
    %14 = vector.broadcast %cst_12 : f32 to vector<128x16xf32>
    %15 = arith.addf %14, %13 : vector<128x16xf32>
    %16 = arith.divf %14, %15 : vector<128x16xf32>
    %c0_13 = arith.constant 0 : index
    %c0_14 = arith.constant 0 : index
    %17 = vector.load %arg6[%c0_13, %c0_14] : memref<128x16xf32, #tpu.memory_space<vmem>>, vector<128x16xf32>
    %cst_15 = arith.constant dense<0.000000e+00> : vector<128x16xf32>
    %18 = tpu.matmul %17, %9, %cst_15 {dimension_numbers = #tpu.dot_dimension_numbers<[1], [0], [0], [1], [0, 0, 1, 1], [], []>, precision = #tpu.contract_precision<fp32>} : vector<128x16xf32>, vector<16x16xf32>, vector<128x16xf32> -> vector<128x16xf32>
    %19 = arith.negf %18 : vector<128x16xf32>
    %20 = math.exp %19 : vector<128x16xf32>
    %cst_16 = arith.constant 1.000000e+00 : f32
    %21 = vector.broadcast %cst_16 : f32 to vector<128x16xf32>
    %22 = arith.addf %21, %20 : vector<128x16xf32>
    %23 = arith.divf %21, %22 : vector<128x16xf32>
    %c0_17 = arith.constant 0 : index
    %c0_18 = arith.constant 0 : index
    %24 = vector.load %arg7[%c0_17, %c0_18] : memref<16x64xf32, #tpu.memory_space<vmem>>, vector<16x64xf32>
    %cst_19 = arith.constant dense<0.000000e+00> : vector<128x64xf32>
    %25 = tpu.matmul %16, %24, %cst_19 {dimension_numbers = #tpu.dot_dimension_numbers<[1], [0], [0], [1], [0, 0, 1, 1], [], []>, precision = #tpu.contract_precision<fp32>} : vector<128x16xf32>, vector<16x64xf32>, vector<128x64xf32> -> vector<128x64xf32>
    %c0_20 = arith.constant 0 : index
    %c0_21 = arith.constant 0 : index
    %26 = vector.load %arg8[%c0_20, %c0_21] : memref<16x64xf32, #tpu.memory_space<vmem>>, vector<16x64xf32>
    %cst_22 = arith.constant dense<0.000000e+00> : vector<128x64xf32>
    %27 = tpu.matmul %23, %26, %cst_22 {dimension_numbers = #tpu.dot_dimension_numbers<[1], [0], [0], [1], [0, 0, 1, 1], [], []>, precision = #tpu.contract_precision<fp32>} : vector<128x16xf32>, vector<16x64xf32>, vector<128x64xf32> -> vector<128x64xf32>
    %28 = arith.mulf %25, %27 : vector<128x64xf32>
    %29 = arith.mulf %0, %28 : vector<128x64xf32>
    %c0_23 = arith.constant 0 : index
    %c0_24 = arith.constant 0 : index
    %30 = vector.load %arg9[%c0_23, %c0_24] : memref<128x64xf32, #tpu.memory_space<vmem>>, vector<128x64xf32>
    tpu.vector_store %arg9[%c0_23, %c0_24], %29 {strides = array<i32>} : memref<128x64xf32, #tpu.memory_space<vmem>>, vector<128x64xf32>,
    return
  }
  func.func @transform_0(%arg0: i32) -> (i32, i32) {
    %c0_i32 = arith.constant 0 : i32
    %c0_i32_0 = arith.constant 0 : i32
    return %arg0, %c0_i32 : i32, i32
  }
  func.func @transform_1(%arg0: i32) -> (i32, i32) {
    %c0_i32 = arith.constant 0 : i32
    %c0_i32_0 = arith.constant 0 : i32
    %c0_i32_1 = arith.constant 0 : i32
    return %c0_i32, %c0_i32_0 : i32, i32
  }
  func.func @transform_2(%arg0: i32) -> (i32, i32) {
    %c0_i32 = arith.constant 0 : i32
    %c0_i32_0 = arith.constant 0 : i32
    %c0_i32_1 = arith.constant 0 : i32
    return %c0_i32, %c0_i32_0 : i32, i32
  }
  func.func @transform_3(%arg0: i32) -> (i32, i32) {
    %c0_i32 = arith.constant 0 : i32
    %c0_i32_0 = arith.constant 0 : i32
    %c0_i32_1 = arith.constant 0 : i32
    return %c0_i32, %c0_i32_0 : i32, i32
  }
  func.func @transform_4(%arg0: i32) -> (i32, i32) {
    %c0_i32 = arith.constant 0 : i32
    %c0_i32_0 = arith.constant 0 : i32
    %c0_i32_1 = arith.constant 0 : i32
    return %c0_i32, %c0_i32_0 : i32, i32
  }
  func.func @transform_5(%arg0: i32) -> (i32, i32) {
    %c0_i32 = arith.constant 0 : i32
    %c0_i32_0 = arith.constant 0 : i32
    %c0_i32_1 = arith.constant 0 : i32
    return %c0_i32, %c0_i32_0 : i32, i32
  }
  func.func @transform_6(%arg0: i32) -> (i32, i32) {
    %c0_i32 = arith.constant 0 : i32
    %c0_i32_0 = arith.constant 0 : i32
    %c0_i32_1 = arith.constant 0 : i32
    return %c0_i32, %c0_i32_0 : i32, i32
  }
  func.func @transform_7(%arg0: i32) -> (i32, i32) {
    %c0_i32 = arith.constant 0 : i32
    %c0_i32_0 = arith.constant 0 : i32
    %c0_i32_1 = arith.constant 0 : i32
    return %c0_i32, %c0_i32_0 : i32, i32
  }
  func.func @transform_8(%arg0: i32) -> (i32, i32) {
    %c0_i32 = arith.constant 0 : i32
    %c0_i32_0 = arith.constant 0 : i32
    return %arg0, %c0_i32 : i32, i32
  }
}

</mosaic_0001>

<bundles_post_ra>
// kernel: tpu_custom_call.1
= control target key start
LH: loop header
LB: loop body
LE: loop exit
PB: predicated region body
PF: predicated region fallthrough
CT: control target
= control target key end

     0   :  { %s10060_s27 = smov 0   ;;  %s12081_s0 = inlined_call_operand.vmem [shape: f32[256,64], index: 0, kind: input, shape index: {}]   ;;  %s12082_s1 = inlined_call_operand.vmem [shape: f32[64,16], index: 1, kind: input, shape index: {}]   ;;  %s12083_s2 = inlined_call_operand.vmem [shape: f32[16,128], index: 2, kind: input, shape index: {}]   ;;  %s12084_s3 = inlined_call_operand.vmem [shape: f32[16,1], index: 3, kind: input, shape index: {}]   ;;  %s12085_s4 = inlined_call_operand.vmem [shape: f32[128,16], index: 4, kind: input, shape index: {}]   ;;  %s12086_s5 = inlined_call_operand.vmem [shape: f32[128,16], index: 5, kind: input, shape index: {}]   ;;  %s12087_s6 = inlined_call_operand.vmem [shape: f32[16,64], index: 6, kind: input, shape index: {}]   ;;  %s12088_s7 = inlined_call_operand.vmem [shape: f32[16,64], index: 7, kind: input, shape index: {}]   ;;  %s12089_s8 = inlined_call_operand.vmem [shape: f32[256,64], index: 8, kind: output, shape index: {}]  }
   0x1 LB: > { %s7205_s28 = sadd.s32 4294967295, %s10012_s27   ;;  %p7209_p0 = scmp.ge.s32.totalorder %s10012_s27, 1  ;;  %s10012_s27 = sphi %s10060_s27, %s18_s27  }
   0x2   : > { %p263_p1 = scmp.lt.s32.totalorder %s10012_s27, 3 }
   0x4   : > { %p264_p2 = pnand %p7209_p0, %p263_p1 }
   0x6   : > { %267 = sbr.rel (%p264_p2) target bundleno = 1676 (0x68c), region = 52 }
   0xd   : > { %v325_v0 = vld [vmem:[%s12082_s1] sm:$0xff]  ;;  %v326_v1 = vld [vmem:[%s12082_s1 + $0x8] sm:$0xff]  ;;  %v327_v2 = vld [vmem:[%s12082_s1 + $0x10] sm:$0xff]  ;;  %s7210_s13 = sshll.u32 %s7205_s28, 4  ;;  %vm333_vm0 = vcmask 523264   ;;  %vm2280_vm1 = vcmask 130048  }
   0xe   : > { %v383_v3 = vand.u32 4294901760, %v325_v0  ;;  %v386_v4 = vand.u32 4294901760, %v326_v1  ;;  %v328_v5 = vld [vmem:[%s12082_s1 + $0x18] sm:$0xff]  ;;  %v389_v6 = vand.u32 4294901760, %v327_v2  ;;  %v329_v7 = vld [vmem:[%s12082_s1 + $0x20] sm:$0xff]  ;;  %v330_v8 = vld [vmem:[%s12082_s1 + $0x28] sm:$0xff] }
   0xf   : > { %v392_v9 = vand.u32 4294901760, %v328_v5  ;;  %v395_v10 = vand.u32 4294901760, %v329_v7  ;;  %v398_v11 = vand.u32 4294901760, %v330_v8  ;;  %v331_v12 = vld [vmem:[%s12082_s1 + $0x30] sm:$0xff]  ;;  %v332_v13 = vld [vmem:[%s12082_s1 + $0x38] sm:$0xff]  ;;  %p298_p3 = scmp.lt.s32.totalorder %s7210_s13, 31 }
  0x10   : > { %v10092_v14 = vpack.c.bf16 %v386_v4, %v383_v3  ;;  %v401_v15 = vand.u32 4294901760, %v331_v12  ;;  %v404_v16 = vand.u32 4294901760, %v332_v13  ;;  %v10094_v17 = vsub.f32 %v325_v0, %v383_v3 }
  0x11   : > { %v10096_v18 = vpack.c.bf16 %v392_v9, %v389_v6  ;;  %s12501_s13 = smov (!%p298_p3, %s7210_s13), 31  ;;  %v10100_v19 = vsub.f32 %v326_v1, %v386_v4  ;;  %v10102_v20 = vsub.f32 %v327_v2, %v389_v6  ;;  %v10106_v22 = vsub.f32 %v328_v5, %v392_v9 }
  0x12   : > { %9055 = vmatprep.subr.bf16.mxu0 %v10092_v14  ;;  %v618_v21 = vand.u32 4294901760, %v10094_v17  ;;  %v10108_v23 = vsub.f32 %v329_v7, %v395_v10  ;;  %v10111_v24 = vpack.c.bf16 %v398_v11, %v395_v10  ;;  %s7211_s24 = sshll.u32 %s12501_s13, 3  ;;  %v10116_v27 = vsub.f32 %v330_v8, %v398_v11 }
  0x13   : > { %9057 = vmatpush3.bf16.msra.mxu0 %v10092_v14  ;;  %v625_v25 = vand.u32 4294901760, %v10100_v19  ;;  %v12104_v26 = vand.u32 4294901760, %v10102_v20  ;;  %v10119_v28 = vpack.c.bf16 %v404_v16, %v401_v15  ;;  %s10126_s28 = scalar_lea.vmem %s12081_s0, %s7211_s24  ;;  %v12101_v30 = vand.u32 4294901760, %v10106_v22  ;;  %s12028_s18 = scalar_lea.vmem %s12089_s8, %s7211_s24 }
  0x14   : > { %9059 = vmatprep.subr.bf16.mxu0 %v10096_v18  ;;  %v10131_v29 = vsub.f32 %v10094_v17, %v618_v21  ;;  %v10134_v31 = vsub.f32 %v331_v12, %v401_v15  ;;  %v309_v32 = vld [vmem:[%s10126_s28] sm:$0xff]  ;;  %v310_v33 = vld [vmem:[%s10126_s28 + $0x8] sm:$0xff]  ;;  %v311_v34 = vld [vmem:[%s10126_s28 + $0x10] sm:$0xff]  ;;  %v12100_v36 = vand.u32 4294901760, %v10108_v23  ;;  %v12099_v37 = vand.u32 4294901760, %v10116_v27 }
  0x15   : > { %v10142_v35 = vsub.f32 %v10100_v19, %v625_v25  ;;  %v10146_v38 = vsub.f32 %v332_v13, %v404_v16  ;;  %v335_v39 = vsel %vm333_vm0, %v309_v32, 0  ;;  %v338_v40 = vsel %vm333_vm0, %v310_v33, 0  ;;  %v312_v42 = vld [vmem:[%s10126_s28 + $0x18] sm:$0xff]  ;;  %v313_v43 = vld [vmem:[%s10126_s28 + $0x20] sm:$0xff]  ;;  %v314_v44 = vld [vmem:[%s10126_s28 + $0x28] sm:$0xff] }
  0x16   : > { %v341_v41 = vsel %vm333_vm0, %v311_v34, 0  ;;  %v10157_v45 = vsub.f32 %v10102_v20, %v12104_v26  ;;  %v10160_v46 = vand.u32 4294901760, %v335_v39  ;;  %v10162_v47 = vand.u32 4294901760, %v338_v40  ;;  %v315_v50 = vld [vmem:[%s10126_s28 + $0x30] sm:$0xff]  ;;  %v316_v51 = vld [vmem:[%s10126_s28 + $0x38] sm:$0xff]  ;;  %v317_v32 = vld [vmem:[%s10126_s28 + $0x40] sm:$0xff] }
  0x17   : > { %9061 = vmatpush3.bf16.msra.mxu0 %v10096_v18  ;;  %v10164_v48 = vand.u32 4294901760, %v341_v41  ;;  %v344_v49 = vsel %vm333_vm0, %v312_v42, 0  ;;  %v347_v53 = vsel %vm333_vm0, %v313_v43, 0  ;;  %v350_v54 = vsel %vm333_vm0, %v314_v44, 0  ;;  %v318_v33 = vld [vmem:[%s10126_s28 + $0x48] sm:$0xff] }
  0x18   : > { %9063 = vmatprep.subr.bf16.mxu0 %v10111_v24  ;;  %v10170_v52 = vand.u32 4294901760, %v344_v49  ;;  %v353_v55 = vsel %vm333_vm0, %v315_v50, 0  ;;  %v10176_v56 = vsub.f32 %v335_v39, %v10160_v46  ;;  %v10179_v57 = vsub.f32 %v338_v40, %v10162_v47  ;;  %v320_v50 = vld [vmem:[%s10126_s28 + $0x58] sm:$0xff] }
  0x19   : > { %v10182_v58 = vsub.f32 %v341_v41, %v10164_v48  ;;  %v10184_v59 = vand.u32 4294901760, %v347_v53  ;;  %v10189_v61 = vand.u32 4294901760, %v350_v54  ;;  %v10191_v62 = vand.u32 4294901760, %v353_v55 }
  0x1a   : > { %v10187_v60 = vsub.f32 %v344_v49, %v10170_v52  ;;  %v356_v63 = vsel %vm333_vm0, %v316_v51, 0  ;;  %v12098_v0 = vand.u32 4294901760, %v10176_v56  ;;  %v12097_v1 = vand.u32 4294901760, %v10179_v57  ;;  %v319_v49 = vld [vmem:[%s10126_s28 + $0x50] sm:$0xff] }
  0x1b   : > { %9065 = vmatpush3.bf16.msra.mxu0 %v10111_v24  ;;  %v12096_v2 = vand.u32 4294901760, %v10182_v58  ;;  %v10199_v3 = vsub.f32 %v347_v53, %v10184_v59  ;;  %v10204_v5 = vsub.f32 %v350_v54, %v10189_v61  ;;  %v10207_v6 = vsub.f32 %v353_v55, %v10191_v62 }
  0x1c   : > { %9067 = vmatprep.subr.bf16.mxu0 %v10119_v28  ;;  %v12094_v4 = vand.u32 4294901760, %v10187_v60  ;;  %v10209_v7 = vand.u32 4294901760, %v356_v63  ;;  %v458_v8 = vsub.f32 %v10176_v56, %v12098_v0  ;;  %v468_v9 = vsub.f32 %v10179_v57, %v12097_v1  ;;  %v324_v1 = vld [vmem:[%s10126_s28 + $0x78] sm:$0xff] }
  0x1d   : > { %v478_v10 = vsub.f32 %v10182_v58, %v12096_v2  ;;  %v12092_v11 = vand.u32 4294901760, %v10199_v3  ;;  %v12091_v13 = vand.u32 4294901760, %v10204_v5  ;;  %v12090_v15 = vand.u32 4294901760, %v10207_v6 }
  0x1e   : > { %v488_v12 = vsub.f32 %v10187_v60, %v12094_v4  ;;  %v10227_v16 = vsub.f32 %v356_v63, %v10209_v7  ;;  %v459_v34 = vand.u32 4294901760, %v458_v8  ;;  %v469_v39 = vand.u32 4294901760, %v468_v9 }
  0x1f   : > { %9069 = vmatpush3.bf16.msra.mxu0 %v10119_v28  ;;  %v479_v40 = vand.u32 4294901760, %v478_v10  ;;  %v498_v41 = vsub.f32 %v10199_v3, %v12092_v11  ;;  %v508_v42 = vsub.f32 %v10204_v5, %v12091_v13  ;;  %v518_v43 = vsub.f32 %v10207_v6, %v12090_v15 }
  0x20   : > { %v12093_v44 = vand.u32 4294901760, %v10227_v16  ;;  %v640_v51 = vsub.f32 %v10106_v22, %v12101_v30  ;;  %7948 = vmatprep.mubr.f32.mxu0 %v459_v34  ;;  %v489_v53 = vand.u32 4294901760, %v488_v12  ;;  %v359_v54 = vsel %vm333_vm0, %v317_v32, 0  ;;  %v321_v34 = vld [vmem:[%s10126_s28 + $0x60] sm:$0xff] }
  0x21   : > { %v362_v55 = vsel %vm333_vm0, %v318_v33, 0  ;;  %v620_v63 = vand.u32 4294901760, %v10131_v29  ;;  %v499_v8 = vand.u32 4294901760, %v498_v41  ;;  %v509_v9 = vand.u32 4294901760, %v508_v42 }
  0x22   : > { %7949 = vmatmul.mubr.f32.vlgmr.msra.gmra.mrb[0].mxu0 %v469_v39  ;;  %v519_v10 = vand.u32 4294901760, %v518_v43  ;;  %v10250_v15 = vand.u32 4294901760, %v359_v54  ;;  %v10252_v13 = vand.u32 4294901760, %v362_v55  ;;  %v627_v11 = vand.u32 4294901760, %v10142_v35 }
  0x23   : > { %7951 = vmatprep.mubr.f32.mxu0 %v479_v40  ;;  %v365_v12 = vsel %vm333_vm0, %v319_v49, 0  ;;  %v368_v32 = vsel %vm333_vm0, %v320_v50, 0  ;;  %v528_v29 = vsub.f32 %v10227_v16, %v12093_v44  ;;  %v322_v40 = vld [vmem:[%s10126_s28 + $0x68] sm:$0xff]  ;;  %v634_v43 = vand.u32 4294901760, %v10157_v45 }
  0x24   : > { %v10262_v33 = vsub.f32 %v359_v54, %v10250_v15  ;;  %v10264_v39 = vand.u32 4294901760, %v365_v12  ;;  %v10266_v41 = vand.u32 4294901760, %v368_v32  ;;  %v10270_v42 = vsub.f32 %v362_v55, %v10252_v13 }
  0x25   : > { %v9070_v35 = vpack.c.bf16 %v627_v11, %v620_v63  ;;  %v641_v49 = vand.u32 4294901760, %v640_v51  ;;  %v371_v4 = vsel %vm333_vm0, %v321_v34, 0  ;;  %v374_v45 = vsel %vm333_vm0, %v322_v40, 0 }
  0x26   : > { %7952 = vmatmul.mubr.f32.gmra.mrb[2].mxu0 %v489_v53  ;;  %v12095_v50 = vand.u32 4294901760, %v10262_v33  ;;  %v10275_v44 = vsub.f32 %v365_v12, %v10264_v39  ;;  %v10278_v54 = vsub.f32 %v368_v32, %v10266_v41  ;;  %v12102_v55 = vand.u32 4294901760, %v10270_v42 }
  0x27   : > { %7954 = vmatprep.mubr.f32.mxu0 %v499_v8  ;;  %9071 = vmatprep.subr.bf16.mxu0 %v9070_v35  ;;  %v9074_v11 = vpack.c.bf16 %v641_v49, %v634_v43  ;;  %v10282_v63 = vand.u32 4294901760, %v371_v4  ;;  %v10290_v32 = vand.u32 4294901760, %v374_v45  ;;  %v647_v34 = vsub.f32 %v10108_v23, %v12100_v36  ;;  %v323_v43 = vld [vmem:[%s10126_s28 + $0x70] sm:$0xff] }
  0x28   : > { %v538_v51 = vsub.f32 %v10262_v33, %v12095_v50  ;;  %9073 = vmatpush3.bf16.msra.mxu0 %v9070_v35  ;;  %v12103_v53 = vand.u32 4294901760, %v10275_v44  ;;  %v12105_v12 = vand.u32 4294901760, %v10278_v54  ;;  %v654_v40 = vsub.f32 %v10116_v27, %v12099_v37 }
  0x29   : > { %9075 = vmatprep.subr.bf16.mxu0 %v9074_v11  ;;  %v10293_v8 = vsub.f32 %v371_v4, %v10282_v63  ;;  %v660_v35 = vand.u32 4294901760, %v10134_v31  ;;  %v529_v49 = vand.u32 4294901760, %v528_v29  ;;  %v548_v2 = vsub.f32 %v10270_v42, %v12102_v55 }
  0x2a   : > { %7955 = vmatmul.mubr.f32.gmra.mrb[4].mxu0 %v509_v9  ;;  %v539_v50 = vand.u32 4294901760, %v538_v51  ;;  %v10307_v4 = vsub.f32 %v374_v45, %v10290_v32  ;;  %v558_v0 = vsub.f32 %v10275_v44, %v12103_v53  ;;  %v648_v36 = vand.u32 4294901760, %v647_v34 }
  0x2b   : > { %7957 = vmatprep.mubr.f32.mxu0 %v519_v10  ;;  %v12107_v37 = vand.u32 4294901760, %v10293_v8  ;;  %v655_v30 = vand.u32 4294901760, %v654_v40  ;;  %v568_v9 = vsub.f32 %v10278_v54, %v12105_v12  ;;  %v377_v29 = vsel %vm333_vm0, %v323_v43, 0 }
  0x2c   : > { %12275 = vst [vmem:[#allocation2_spill] sm:$0xff] %v10307_v4  ;;  %9077 = vmatpush3.bf16.msra.mxu0 %v9074_v11  ;;  %v12106_v45 = vand.u32 4294901760, %v10307_v4  ;;  %v10319_v55 = vand.u32 4294901760, %v377_v29  ;;  %v380_v10 = vsel %vm333_vm0, %v324_v1, 0  ;;  %v549_v53 = vand.u32 4294901760, %v548_v2 }
  0x2d   : > { %v9078_v51 = vpack.c.bf16 %v655_v30, %v648_v36  ;;  %v10322_v26 = vand.u32 4294901760, %v380_v10  ;;  %v661_v34 = vsub.f32 %v10134_v31, %v660_v35  ;;  %v667_v40 = vand.u32 4294901760, %v10146_v38 }
  0x2e   : > { %7958 = vmatmul.mubr.f32.gmra.mrb[6].mxu0 %v529_v49  ;;  %v559_v12 = vand.u32 4294901760, %v558_v0  ;;  %v578_v11 = vsub.f32 %v10293_v8, %v12107_v37  ;;  %v10330_v30 = vsub.f32 %v377_v29, %v10319_v55  ;;  %v569_v43 = vand.u32 4294901760, %v568_v9 }
  0x2f   : > { %7960 = vmatprep.mubr.f32.mxu0 %v539_v50  ;;  %9079 = vmatprep.subr.bf16.mxu0 %v9078_v51  ;;  %v10333_v36 = vsub.f32 %v380_v10, %v10322_v26  ;;  %v662_v1 = vand.u32 4294901760, %v661_v34  ;;  %v668_v2 = vsub.f32 %v10146_v38, %v667_v40  ;;  %v588_v0 = vsub.f32 %v10307_v4, %v12106_v45 }
  0x30   : > { %9081 = vmatpush3.bf16.msra.mxu0 %v9078_v51  ;;  %v10344_v49 = vpack.c.bf16 %v625_v25, %v618_v21  ;;  %v12276_v10 = vand.u32 4294901760, %v10102_v20  ;;  %v12277_v9 = vand.u32 4294901760, %v10106_v22  ;;  %v12279_v45 = vand.u32 4294901760, %v10108_v23 }
  0x31   : > { %v669_v51 = vand.u32 4294901760, %v668_v2  ;;  %v12280_v37 = vand.u32 4294901760, %v10116_v27  ;;  %v579_v4 = vand.u32 4294901760, %v578_v11  ;;  %v12281_v21 = vand.u32 4294901760, %v10330_v30 }
  0x32   : > { %7961 = vmatmul.mubr.f32.gmra.mrb[8].mxu0 %v549_v53  ;;  %v10351_v34 = vpack.c.bf16 %v12277_v9, %v12276_v10  ;;  %v10362_v53 = vpack.c.bf16 %v667_v40, %v660_v35  ;;  %v9086_v29 = vpack.c.bf16 %v10100_v19, %v10094_v17  ;;  %v589_v10 = vand.u32 4294901760, %v588_v0 }
  0x33   : > { %v10357_v50 = vpack.c.bf16 %v12280_v37, %v12279_v45  ;;  %7963 = vmatprep.mubr.f32.mxu0 %v559_v12  ;;  %v598_v25 = vsub.f32 %v10330_v30, %v12281_v21  ;;  %v9082_v2 = vpack.c.bf16 %v669_v51, %v662_v1  ;;  %v12282_v9 = vand.u32 4294901760, %v10333_v36 }
  0x34   : > { %12278 = vst [vmem:[#allocation3_spill] sm:$0xff] %v10351_v34  ;;  %v9090_v17 = vpack.c.bf16 %v10106_v22, %v10102_v20  ;;  %v9094_v19 = vpack.c.bf16 %v10116_v27, %v10108_v23  ;;  %v9098_v35 = vpack.c.bf16 %v10146_v38, %v10134_v31  ;;  %v12283_v20 = vld [vmem:[#allocation2_spill] sm:$0xff]  ;;  %v12284_v22 = vand.u32 4294901760, %v10176_v56 }
  0x35   : > { %v608_v34 = vsub.f32 %v10333_v36, %v12282_v9  ;;  %9083 = vmatprep.subr.bf16.mxu0 %v9082_v2  ;;  %v599_v37 = vand.u32 4294901760, %v598_v25  ;;  %v12285_v23 = vand.u32 4294901760, %v10179_v57  ;;  %v12286_v27 = vand.u32 4294901760, %v10182_v58 }
  0x36   : > { %7964 = vmatmul.mubr.f32.gmra.mrb[10].mxu0 %v569_v43  ;;  %v12288_v38 = vand.u32 4294901760, %v10187_v60  ;;  %v12297_v45 = vand.u32 4294901760, %v10293_v8  ;;  %v12300_v40 = vmov %v12282_v9 }
  0x37   : > { %7966 = vmatprep.mubr.f32.mxu0 %v579_v4  ;;  %9085 = vmatpush3.bf16.msra.mxu0 %v9082_v2  ;;  %v609_v12 = vand.u32 4294901760, %v608_v34  ;;  %v12289_v4 = vand.u32 4294901760, %v10199_v3 }
  0x38   : > { %9087 = vmatprep.subr.bf16.mxu0 %v9086_v29 }
  0x3a   : > { %7967 = vmatmul.mubr.f32.gmra.mrb[12].mxu0 %v589_v10 }
  0x3b   : > { %7969 = vmatprep.mubr.f32.mxu0 %v599_v37  ;;  %v12287_v31 = vld [vmem:[#allocation3_spill] sm:$0xff] }
  0x3e   : > { %7970 = vmatmul.mubr.f32.gmra.mrb[14].mxu0 %v609_v12  ;;  %v1565_v12 = vld [vmem:[%s12083_s2 + $0x8] sm:$0xff] }
  0x3f   : > { %7988 = vmatprep.mubr.f32.mxu0 %v10160_v46 }
  0x42   : > { %7989 = vmatmul.mubr.f32.vlgmr.msra.gmra.mrb[0].mxu0 %v10162_v47 }
  0x43   : > { %7991 = vmatprep.mubr.f32.mxu0 %v10164_v48  ;;  %9089 = vmatpush3.bf16.msra.mxu0 %v9086_v29 }
  0x44   : > { %9091 = vmatprep.subr.bf16.mxu0 %v9090_v17 }
  0x46   : > { %7992 = vmatmul.mubr.f32.gmra.mrb[2].mxu0 %v10170_v52 }
  0x47   : > { %7994 = vmatprep.mubr.f32.mxu0 %v10184_v59  ;;  %9093 = vmatpush3.bf16.msra.mxu0 %v9090_v17 }
  0x48   : > { %9095 = vmatprep.subr.bf16.mxu0 %v9094_v19 }
  0x4a   : > { %7995 = vmatmul.mubr.f32.gmra.mrb[4].mxu0 %v10189_v61 }
  0x4b   : > { %7997 = vmatprep.mubr.f32.mxu0 %v10191_v62  ;;  %9097 = vmatpush3.bf16.msra.mxu0 %v9094_v19 }
  0x4c   : > { %9099 = vmatprep.subr.bf16.mxu0 %v9098_v35 }
  0x4e   : > { %7998 = vmatmul.mubr.f32.gmra.mrb[6].mxu0 %v10209_v7 }
  0x4f   : > { %8000 = vmatprep.mubr.f32.mxu0 %v10250_v15  ;;  %9101 = vmatpush3.bf16.msra.mxu0 %v9098_v35 }
  0x50   : > { %9103 = vmatprep.subr.bf16.mxu0 %v10092_v14 }
  0x52   : > { %8001 = vmatmul.mubr.f32.gmra.mrb[8].mxu0 %v10252_v13 }
  0x53   : > { %8003 = vmatprep.mubr.f32.mxu0 %v10264_v39 }
  0x56   : > { %8004 = vmatmul.mubr.f32.gmra.mrb[10].mxu0 %v10266_v41 }
  0x57   : > { %8006 = vmatprep.mubr.f32.mxu0 %v10282_v63 }
  0x5a   : > { %8007 = vmatmul.mubr.f32.gmra.mrb[12].mxu0 %v10290_v32 }
  0x5b   : > { %8009 = vmatprep.mubr.f32.mxu0 %v10319_v55 }
  0x5e   : > { %8010 = vmatmul.mubr.f32.gmra.mrb[14].mxu0 %v10322_v26 }
  0x5f   : > { %8028 = vmatprep.mubr.f32.mxu0 %v10176_v56  ;;  %v12290_v56 = vand.u32 4294901760, %v10204_v5 }
  0x62   : > { %8029 = vmatmul.mubr.f32.vlgmr.msra.gmra.mrb[0].mxu0 %v10179_v57  ;;  %v12291_v57 = vand.u32 4294901760, %v10207_v6 }
  0x63   : > { %8031 = vmatprep.mubr.f32.mxu0 %v10182_v58  ;;  %9105 = vmatpush3.bf16.msra.mxu0 %v10092_v14  ;;  %v12292_v58 = vand.u32 4294901760, %v10227_v16 }
  0x64   : > { %9107 = vmatprep.subr.bf16.mxu0 %v10096_v18 }
  0x66   : > { %8032 = vmatmul.mubr.f32.gmra.mrb[2].mxu0 %v10187_v60  ;;  %v12293_v60 = vand.u32 4294901760, %v10262_v33 }
  0x67   : > { %8034 = vmatprep.mubr.f32.mxu0 %v10199_v3  ;;  %9109 = vmatpush3.bf16.msra.mxu0 %v10096_v18  ;;  %v12294_v3 = vand.u32 4294901760, %v10270_v42 }
  0x68   : > { %9111 = vmatprep.subr.bf16.mxu0 %v10111_v24 }
  0x6a   : > { %8035 = vmatmul.mubr.f32.gmra.mrb[4].mxu0 %v10204_v5  ;;  %v12295_v5 = vand.u32 4294901760, %v10275_v44 }
  0x6b   : > { %8037 = vmatprep.mubr.f32.mxu0 %v10207_v6  ;;  %9113 = vmatpush3.bf16.msra.mxu0 %v10111_v24  ;;  %v12296_v6 = vand.u32 4294901760, %v10278_v54 }
  0x6c   : > { %9115 = vmatprep.subr.bf16.mxu0 %v10119_v28 }
  0x6e   : > { %8038 = vmatmul.mubr.f32.gmra.mrb[6].mxu0 %v10227_v16  ;;  %v12298_v16 = vand.u32 4294901760, %v12283_v20 }
  0x6f   : > { %8040 = vmatprep.mubr.f32.mxu0 %v10262_v33  ;;  %9117 = vmatpush3.bf16.msra.mxu0 %v10119_v28  ;;  %v12299_v33 = vmov %v12281_v21 }
  0x70   : > { %9119 = vmatprep.subr.bf16.mxu0 %v10344_v49 }
  0x72   : > { %8041 = vmatmul.mubr.f32.gmra.mrb[8].mxu0 %v10270_v42 }
  0x73   : > { %8043 = vmatprep.mubr.f32.mxu0 %v10275_v44 }
  0x76   : > { %8044 = vmatmul.mubr.f32.gmra.mrb[10].mxu0 %v10278_v54 }
  0x77   : > { %8046 = vmatprep.mubr.f32.mxu0 %v10293_v8 }
  0x7a   : > { %8047 = vmatmul.mubr.f32.gmra.mrb[12].mxu0 %v12283_v20 }
  0x7b   : > { %8049 = vmatprep.mubr.f32.mxu0 %v10330_v30 }
  0x7e   : > { %8050 = vmatmul.mubr.f32.gmra.mrb[14].mxu0 %v10333_v36 }
  0x7f   : > { %8068 = vmatprep.mubr.f32.mxu0 %v12284_v22 }
  0x82   : > { %8069 = vmatmul.mubr.f32.vlgmr.msra.gmra.mrb[0].mxu0 %v12285_v23 }
  0x83   : > { %8071 = vmatprep.mubr.f32.mxu0 %v12286_v27  ;;  %9121 = vmatpush3.bf16.msra.mxu0 %v10344_v49 }
  0x84   : > { %9123 = vmatprep.subr.bf16.mxu0 %v12287_v31 }
  0x86   : > { %8072 = vmatmul.mubr.f32.gmra.mrb[2].mxu0 %v12288_v38 }
  0x87   : > { %8074 = vmatprep.mubr.f32.mxu0 %v12289_v4  ;;  %9125 = vmatpush3.bf16.msra.mxu0 %v12287_v31 }
  0x88   : > { %9127 = vmatprep.subr.bf16.mxu0 %v10357_v50 }
  0x8a   : > { %8075 = vmatmul.mubr.f32.gmra.mrb[4].mxu0 %v12290_v56 }
  0x8b   : > { %8077 = vmatprep.mubr.f32.mxu0 %v12291_v57  ;;  %9129 = vmatpush3.bf16.msra.mxu0 %v10357_v50  ;;  %v10534_v57 = vand.u32 4294901760, %v1565_v12 }
  0x8c   : > { %9131 = vmatprep.subr.bf16.mxu0 %v10362_v53 }
  0x8e   : > { %8078 = vmatmul.mubr.f32.gmra.mrb[6].mxu0 %v12292_v58 }
  0x8f   : > { %8080 = vmatprep.mubr.f32.mxu0 %v12293_v60  ;;  %9133 = vmatpush3.bf16.msra.mxu0 %v10362_v53 }
  0x90   : > { %9135 = vmatprep.subr.bf16.mxu0 %v10092_v14 }
  0x92   : > { %8081 = vmatmul.mubr.f32.gmra.mrb[8].mxu0 %v12294_v3 }
  0x93   : > { %8083 = vmatprep.mubr.f32.mxu0 %v12295_v5 }
  0x96   : > { %8084 = vmatmul.mubr.f32.gmra.mrb[10].mxu0 %v12296_v6 }
  0x97   : > { %8086 = vmatprep.mubr.f32.mxu0 %v12297_v45 }
  0x9a   : > { %8087 = vmatmul.mubr.f32.gmra.mrb[12].mxu0 %v12298_v16 }
  0x9b   : > { %8089 = vmatprep.mubr.f32.mxu0 %v12299_v33 }
  0x9e   : > { %8090 = vmatmul.mubr.f32.gmra.mrb[14].mxu0 %v12300_v40 }
  0x9f   : > { %8108 = vmatprep.mubr.f32.mxu0 %v10160_v46 }
  0xa2   : > { %8109 = vmatmul.mubr.f32.vlgmr.msra.gmra.mrb[0].mxu0 %v10162_v47 }
  0xa3   : > { %8111 = vmatprep.mubr.f32.mxu0 %v10164_v48  ;;  %9137 = vmatpush3.bf16.msra.mxu0 %v10092_v14  ;;  %v1564_v14 = vld [vmem:[%s12083_s2] sm:$0xff] }
  0xa4   : > { %9139 = vmatprep.subr.bf16.mxu0 %v10096_v18 }
  0xa6   : > { %8112 = vmatmul.mubr.f32.gmra.mrb[2].mxu0 %v10170_v52 }
  0xa7   : > { %8114 = vmatprep.mubr.f32.mxu0 %v10184_v59  ;;  %9141 = vmatpush3.bf16.msra.mxu0 %v10096_v18  ;;  %v10498_v18 = vand.u32 4294901760, %v1564_v14 }
  0xa8   : > { %9143 = vmatprep.subr.bf16.mxu0 %v10111_v24 }
  0xaa   : > { %8115 = vmatmul.mubr.f32.gmra.mrb[4].mxu0 %v10189_v61 }
  0xab   : > { %8117 = vmatprep.mubr.f32.mxu0 %v10191_v62  ;;  %9145 = vmatpush3.bf16.msra.mxu0 %v10111_v24  ;;  %v10501_v24 = vsub.f32 %v1564_v14, %v10498_v18 }
  0xac   : > { %9147 = vmatprep.subr.bf16.mxu0 %v10119_v28 }
  0xae   : > { %8118 = vmatmul.mubr.f32.gmra.mrb[6].mxu0 %v10209_v7 }
  0xaf   : > { %8120 = vmatprep.mubr.f32.mxu0 %v10250_v15  ;;  %9149 = vmatpush3.bf16.msra.mxu0 %v10119_v28  ;;  %v1661_v28 = vand.u32 4294901760, %v10501_v24 }
  0xb2   : > { %8121 = vmatmul.mubr.f32.gmra.mrb[8].mxu0 %v10252_v13 }
  0xb3   : > { %8123 = vmatprep.mubr.f32.mxu0 %v10264_v39 }
  0xb6   : > { %8124 = vmatmul.mubr.f32.gmra.mrb[10].mxu0 %v10266_v41 }
  0xb7   : > { %8126 = vmatprep.mubr.f32.mxu0 %v10282_v63 }
  0xba   : > { %8127 = vmatmul.mubr.f32.gmra.mrb[12].mxu0 %v10290_v32 }
  0xbb   : > { %8129 = vmatprep.mubr.f32.mxu0 %v10319_v55 }
  0xbe   : > { %8130 = vmatmul.mubr.f32.gmra.mrb[14].mxu0 %v10322_v26 }
  0xbf   : > { %8148 = vmatprep.mubr.f32.mxu0 %v10160_v46  ;;  %v1662_v46 = vsub.f32 %v10501_v24, %v1661_v28 }
  0xc2   : > { %8149 = vmatmul.mubr.f32.vlgmr.msra.gmra.mrb[0].mxu0 %v10162_v47  ;;  %v1663_v47 = vand.u32 4294901760, %v1662_v46 }
  0xc3   : > { %8151 = vmatprep.mubr.f32.mxu0 %v10164_v48 }
  0xc4   : > { %8204 = vmatprep.mubr.f32.mxu1 %v1663_v47 }
  0xc6   : > { %8152 = vmatmul.mubr.f32.gmra.mrb[2].mxu0 %v10170_v52 }
  0xc7   : > { %8154 = vmatprep.mubr.f32.mxu0 %v10184_v59 }
  0xca   : > { %8155 = vmatmul.mubr.f32.gmra.mrb[4].mxu0 %v10189_v61 }
  0xcb   : > { %8157 = vmatprep.mubr.f32.mxu0 %v10191_v62 }
  0xce   : > { %8158 = vmatmul.mubr.f32.gmra.mrb[6].mxu0 %v10209_v7 }
  0xcf   : > { %8160 = vmatprep.mubr.f32.mxu0 %v10250_v15 }
  0xd2   : > { %8161 = vmatmul.mubr.f32.gmra.mrb[8].mxu0 %v10252_v13 }
  0xd3   : > { %8163 = vmatprep.mubr.f32.mxu0 %v10264_v39 }
  0xd6   : > { %8164 = vmatmul.mubr.f32.gmra.mrb[10].mxu0 %v10266_v41 }
  0xd7   : > { %8166 = vmatprep.mubr.f32.mxu0 %v10282_v63 }
  0xda   : > { %8167 = vmatmul.mubr.f32.gmra.mrb[12].mxu0 %v10290_v32 }
  0xdb   : > { %8169 = vmatprep.mubr.f32.mxu0 %v10319_v55 }
  0xde   : > { %8170 = vmatmul.mubr.f32.gmra.mrb[14].mxu0 %v10322_v26 }
 0x195   : > { %v8150_v48 = vpop.f32.mrb[0].mxu0 }
 0x196   : > { %v1582_v52 = vand.u32 4294901760, %v8150_v48  ;;  %v1470_v26 = vpop.f32.mrb[1].mxu0 }
 0x197   : > { %v1579_v59 = vand.u32 4294901760, %v1470_v26 }
 0x198   : > { %v1688_v61 = vsub.f32 %v8150_v48, %v1582_v52 }
 0x199   : > { %v10507_v62 = vpack.c.bf16 %v1582_v52, %v1579_v59  ;;  %v1681_v7 = vsub.f32 %v1470_v26, %v1579_v59  ;;  %v8153_v13 = vpop.f32.mrb[2].mxu0 }
 0x19a   : > { %v1689_v15 = vand.u32 4294901760, %v1688_v61  ;;  %v1588_v44 = vand.u32 4294901760, %v8153_v13  ;;  %v1482_v39 = vpop.f32.mrb[3].mxu0 }
 0x19b   : > { %v1682_v41 = vand.u32 4294901760, %v1681_v7  ;;  %v1585_v42 = vand.u32 4294901760, %v1482_v39  ;;  %9151 = vmatprep.subr.bf16.mxu1 %v10507_v62  ;;  %v10510_v54 = vpack.c.bf16 %v1688_v61, %v1681_v7 }
 0x19c   : > { %v1690_v55 = vsub.f32 %v1688_v61, %v1689_v15  ;;  %v1702_v63 = vsub.f32 %v8153_v13, %v1588_v44  ;;  %9153 = vmatpush3.bf16.msra.mxu1 %v10507_v62  ;;  %v10547_v61 = vsub.f32 %v1565_v12, %v10534_v57 }
 0x19d   : > { %v1683_v32 = vsub.f32 %v1681_v7, %v1682_v41  ;;  %v10513_v8 = vpack.c.bf16 %v1588_v44, %v1585_v42  ;;  %v1695_v11 = vsub.f32 %v1482_v39, %v1585_v42  ;;  %v8156_v30 = vpop.f32.mrb[4].mxu0  ;;  %v10515_v36 = vpack.c.bf16 %v1689_v15, %v1682_v41 }
 0x19e   : > { %v1703_v1 = vand.u32 4294901760, %v1702_v63  ;;  %v1594_v43 = vand.u32 4294901760, %v8156_v30  ;;  %v1494_v0 = vpop.f32.mrb[5].mxu0  ;;  %v1691_v50 = vand.u32 4294901760, %v1690_v55 }
 0x19f   : > { %v1696_v49 = vand.u32 4294901760, %v1695_v11  ;;  %v1591_v29 = vand.u32 4294901760, %v1494_v0  ;;  %9155 = vmatprep.subr.bf16.mxu1 %v10513_v8  ;;  %v1684_v51 = vand.u32 4294901760, %v1683_v32  ;;  %v10518_v34 = vpack.c.bf16 %v1702_v63, %v1695_v11 }
 0x1a0   : > { %v1704_v21 = vsub.f32 %v1702_v63, %v1703_v1  ;;  %v1716_v25 = vsub.f32 %v8156_v30, %v1594_v43  ;;  %9157 = vmatpush3.bf16.msra.mxu1 %v10513_v8 }
 0x1a1   : > { %v1697_v53 = vsub.f32 %v1695_v11, %v1696_v49  ;;  %v10521_v2 = vpack.c.bf16 %v1594_v43, %v1591_v29  ;;  %v1709_v10 = vsub.f32 %v1494_v0, %v1591_v29  ;;  %v8159_v9 = vpop.f32.mrb[6].mxu0  ;;  %v10523_v37 = vpack.c.bf16 %v1691_v50, %v1684_v51 }
 0x1a2   : > { %v1717_v17 = vand.u32 4294901760, %v1716_v25  ;;  %v1600_v19 = vand.u32 4294901760, %v8159_v9  ;;  %v1506_v35 = vpop.f32.mrb[7].mxu0  ;;  %v1705_v20 = vand.u32 4294901760, %v1704_v21  ;;  %v10528_v22 = vpack.c.bf16 %v1703_v1, %v1696_v49 }
 0x1a3   : > { %v1710_v23 = vand.u32 4294901760, %v1709_v10  ;;  %v1597_v27 = vand.u32 4294901760, %v1506_v35  ;;  %9159 = vmatprep.subr.bf16.mxu1 %v10521_v2  ;;  %v1698_v31 = vand.u32 4294901760, %v1697_v53  ;;  %v10531_v38 = vpack.c.bf16 %v1716_v25, %v1709_v10 }
 0x1a4   : > { %v1718_v4 = vsub.f32 %v1716_v25, %v1717_v17  ;;  %v1730_v56 = vsub.f32 %v8159_v9, %v1600_v19  ;;  %9161 = vmatpush3.bf16.msra.mxu1 %v10521_v2  ;;  %v1671_v49 = vand.u32 4294901760, %v10547_v61 }
 0x1a5   : > { %v1711_v58 = vsub.f32 %v1709_v10, %v1710_v23  ;;  %v10536_v60 = vpack.c.bf16 %v1600_v19, %v1597_v27  ;;  %v1723_v3 = vsub.f32 %v1506_v35, %v1597_v27  ;;  %v8162_v5 = vpop.f32.mrb[8].mxu0  ;;  %v10538_v6 = vpack.c.bf16 %v1705_v20, %v1698_v31 }
 0x1a6   : > { %v1731_v45 = vand.u32 4294901760, %v1730_v56  ;;  %v1606_v16 = vand.u32 4294901760, %v8162_v5  ;;  %v1518_v33 = vpop.f32.mrb[9].mxu0  ;;  %v1719_v40 = vand.u32 4294901760, %v1718_v4  ;;  %v10540_v14 = vpack.c.bf16 %v1717_v17, %v1710_v23 }
 0x1a7   : > { %v1724_v46 = vand.u32 4294901760, %v1723_v3  ;;  %v1603_v47 = vand.u32 4294901760, %v1518_v33  ;;  %9163 = vmatprep.subr.bf16.mxu1 %v10536_v60  ;;  %v1712_v48 = vand.u32 4294901760, %v1711_v58  ;;  %v10543_v52 = vpack.c.bf16 %v1730_v56, %v1723_v3 }
 0x1a8   : > { %v1732_v26 = vsub.f32 %v1730_v56, %v1731_v45  ;;  %v1744_v59 = vsub.f32 %v8162_v5, %v1606_v16  ;;  %9165 = vmatpush3.bf16.msra.mxu1 %v10536_v60  ;;  %v1672_v56 = vsub.f32 %v10547_v61, %v1671_v49 }
 0x1a9   : > { %v1725_v7 = vsub.f32 %v1723_v3, %v1724_v46  ;;  %v10549_v13 = vpack.c.bf16 %v1606_v16, %v1603_v47  ;;  %v1737_v15 = vsub.f32 %v1518_v33, %v1603_v47  ;;  %v8165_v44 = vpop.f32.mrb[10].mxu0  ;;  %v10551_v39 = vpack.c.bf16 %v1719_v40, %v1712_v48 }
 0x1aa   : > { %v1745_v41 = vand.u32 4294901760, %v1744_v59  ;;  %v1612_v42 = vand.u32 4294901760, %v8165_v44  ;;  %v1530_v55 = vpop.f32.mrb[11].mxu0  ;;  %v1733_v63 = vand.u32 4294901760, %v1732_v26  ;;  %v10553_v32 = vpack.c.bf16 %v1731_v45, %v1724_v46 }
 0x1ab   : > { %v1738_v11 = vand.u32 4294901760, %v1737_v15  ;;  %v1609_v30 = vand.u32 4294901760, %v1530_v55  ;;  %9167 = vmatprep.subr.bf16.mxu1 %v10549_v13  ;;  %v1726_v1 = vand.u32 4294901760, %v1725_v7  ;;  %v10556_v43 = vpack.c.bf16 %v1744_v59, %v1737_v15 }
 0x1ac   : > { %v1746_v0 = vsub.f32 %v1744_v59, %v1745_v41  ;;  %v1758_v50 = vsub.f32 %v8165_v44, %v1612_v42  ;;  %9169 = vmatpush3.bf16.msra.mxu1 %v10549_v13 }
 0x1ad   : > { %v1739_v29 = vsub.f32 %v1737_v15, %v1738_v11  ;;  %v10560_v51 = vpack.c.bf16 %v1612_v42, %v1609_v30  ;;  %v1751_v21 = vsub.f32 %v1530_v55, %v1609_v30  ;;  %v8168_v25 = vpop.f32.mrb[12].mxu0  ;;  %v9194_v53 = vpack.c.bf16 %v1733_v63, %v1726_v1 }
 0x1ae   : > { %v1759_v10 = vand.u32 4294901760, %v1758_v50  ;;  %v1618_v9 = vand.u32 4294901760, %v8168_v25  ;;  %v1542_v12 = vpop.f32.mrb[13].mxu0  ;;  %v1747_v17 = vand.u32 4294901760, %v1746_v0  ;;  %v10562_v19 = vpack.c.bf16 %v1745_v41, %v1738_v11 }
 0x1af   : > { %v1752_v35 = vand.u32 4294901760, %v1751_v21  ;;  %v1615_v20 = vand.u32 4294901760, %v1542_v12  ;;  %9171 = vmatprep.subr.bf16.mxu1 %v10560_v51  ;;  %v1740_v23 = vand.u32 4294901760, %v1739_v29  ;;  %v10565_v27 = vpack.c.bf16 %v1758_v50, %v1751_v21 }
 0x1b0   : > { %v1760_v31 = vsub.f32 %v1758_v50, %v1759_v10  ;;  %v1772_v4 = vsub.f32 %v8168_v25, %v1618_v9  ;;  %9173 = vmatpush3.bf16.msra.mxu1 %v10560_v51  ;;  %v1673_v29 = vand.u32 4294901760, %v1672_v56 }
 0x1b1   : > { %v1753_v58 = vsub.f32 %v1751_v21, %v1752_v35  ;;  %v10571_v3 = vpack.c.bf16 %v1618_v9, %v1615_v20  ;;  %v1765_v5 = vsub.f32 %v1542_v12, %v1615_v20  ;;  %v8171_v45 = vpop.f32.mrb[14].mxu0  ;;  %v9198_v16 = vpack.c.bf16 %v1747_v17, %v1740_v23 }
 0x1b2   : > { %v1773_v33 = vand.u32 4294901760, %v1772_v4  ;;  %v1624_v40 = vand.u32 4294901760, %v8171_v45  ;;  %v1554_v46 = vpop.f32.mrb[15].mxu0  ;;  %v1761_v47 = vand.u32 4294901760, %v1760_v31  ;;  %v10573_v48 = vpack.c.bf16 %v1759_v10, %v1752_v35  ;;  %v3532_v31 = vld [vmem:[%s12086_s5 + $0x18] sm:$0xff] }
 0x1b3   : > { %v1766_v26 = vand.u32 4294901760, %v1765_v5  ;;  %v1621_v59 = vand.u32 4294901760, %v1554_v46  ;;  %9175 = vmatprep.subr.bf16.mxu1 %v10571_v3  ;;  %v1754_v7 = vand.u32 4294901760, %v1753_v58  ;;  %v9238_v15 = vpack.c.bf16 %v1772_v4, %v1765_v5 }
 0x1b4   : > { %v1774_v44 = vsub.f32 %v1772_v4, %v1773_v33  ;;  %v1786_v41 = vsub.f32 %v8171_v45, %v1624_v40  ;;  %9177 = vmatpush3.bf16.msra.mxu1 %v10571_v3  ;;  %v2268_v4 = vld [vmem:[%s12085_s4 + $0x20] sm:$0xff] }
 0x1b5   : > { %v1767_v42 = vsub.f32 %v1765_v5, %v1766_v26  ;;  %v10577_v55 = vpack.c.bf16 %v1624_v40, %v1621_v59  ;;  %v1779_v63 = vsub.f32 %v1554_v46, %v1621_v59  ;;  %v9202_v11 = vpack.c.bf16 %v1761_v47, %v1754_v7  ;;  %v3533_v45 = vld [vmem:[%s12086_s5 + $0x20] sm:$0xff] }
 0x1b6   : > { %v1787_v30 = vand.u32 4294901760, %v1786_v41  ;;  %v1775_v1 = vand.u32 4294901760, %v1774_v44  ;;  %v10579_v0 = vpack.c.bf16 %v1773_v33, %v1766_v26  ;;  %v3534_v33 = vld [vmem:[%s12086_s5 + $0x28] sm:$0xff]  ;;  %v3555_v40 = vsel %vm2280_vm1, %v3532_v31, 0 }
 0x1b7   : > { %v1780_v50 = vand.u32 4294901760, %v1779_v63  ;;  %9179 = vmatprep.subr.bf16.mxu1 %v10577_v55  ;;  %v1768_v21 = vand.u32 4294901760, %v1767_v42  ;;  %v9242_v25 = vpack.c.bf16 %v1786_v41, %v1779_v63  ;;  %v2294_v46 = vsel %vm2280_vm1, %v2268_v4, 0  ;;  %v2270_v42 = vld [vmem:[%s12085_s4 + $0x30] sm:$0xff]  ;;  %v2272_v4 = vld [vmem:[%s12085_s4 + $0x40] sm:$0xff] }
 0x1b8   : > { %v1788_v10 = vsub.f32 %v1786_v41, %v1787_v30  ;;  %9181 = vmatpush3.bf16.msra.mxu1 %v10577_v55  ;;  %v3558_v26 = vsel %vm2280_vm1, %v3533_v45, 0  ;;  %v3561_v41 = vsel %vm2280_vm1, %v3534_v33, 0 }
 0x1b9   : > { %v1781_v9 = vsub.f32 %v1779_v63, %v1780_v50  ;;  %9183 = vmatprep.subr.bf16.mxu1 %v10523_v37  ;;  %v9206_v12 = vpack.c.bf16 %v1775_v1, %v1768_v21  ;;  %v10584_v17 = vpack.c.bf16 %v1787_v30, %v1780_v50  ;;  %v10762_v63 = vand.u32 4294901760, %v2294_v46 }
 0x1ba   : > { %v1789_v35 = vand.u32 4294901760, %v1788_v10  ;;  %v10767_v30 = vand.u32 4294901760, %v3558_v26  ;;  %v2300_v21 = vsel %vm2280_vm1, %v2270_v42, 0 }
 0x1bb   : > { %8205 = vmatmul.mubr.f32.vlgmr.msra.gmra.mrb[0].mxu1 %v1673_v29  ;;  %v1782_v20 = vand.u32 4294901760, %v1781_v9  ;;  %v10775_v29 = vand.u32 4294901760, %v3561_v41 }
 0x1bc   : > { %9185 = vmatpush3.bf16.msra.mxu1 %v10523_v37  ;;  %8239 = vmatprep.mubr.f32.mxu1 %v10498_v18  ;;  %v1566_v37 = vld [vmem:[%s12084_s3] sm:$0xff] }
 0x1bd   : > { %9187 = vmatprep.subr.bf16.mxu1 %v10538_v6  ;;  %v9210_v23 = vpack.c.bf16 %v1789_v35, %v1782_v20  ;;  %v10786_v35 = vsub.f32 %v2294_v46, %v10762_v63  ;;  %v10789_v20 = vsub.f32 %v3558_v26, %v10767_v30 }
 0x1bf   : > { %12309 = vst [vmem:[#allocation10_spill] sm:$0xff] %v10786_v35  ;;  %12310 = vst [vmem:[#allocation11_spill] sm:$0xff] %v10789_v20 }
 0x1c0   : > { %9189 = vmatpush3.bf16.msra.mxu1 %v10538_v6  ;;  %v10014_v6 = vmov 0  }
 0x1c1   : > { %9191 = vmatprep.subr.bf16.mxu1 %v10551_v39  ;;  %9861 = vset.pattern.permute.xlu0 %v10014_v6  ;;  %v2271_v6 = vld [vmem:[%s12085_s4 + $0x38] sm:$0xff] }
 0x1c2   : > { %1570 = vperm.xlu0 %9861, %v1566_v37   ;;  %v10794_v37 = vand.u32 4294901760, %v2300_v21 }
 0x1c4   : > { %9193 = vmatpush3.bf16.msra.mxu1 %v10551_v39  ;;  %v1567_v39 = vld [vmem:[%s12084_s3 + $0x8] sm:$0xff] }
 0x1c5   : > { %9195 = vmatprep.subr.bf16.mxu1 %v9194_v53 }
 0x1c6   : > { %1575 = vperm.xlu0 %9861, %v1567_v39   ;;  %v3536_v39 = vld [vmem:[%s12086_s5 + $0x38] sm:$0xff] }
 0x1c8   : > { %9197 = vmatpush3.bf16.msra.mxu1 %v9194_v53 }
 0x1c9   : > { %9199 = vmatprep.subr.bf16.mxu1 %v9198_v16 }
 0x1cc   : > { %9201 = vmatpush3.bf16.msra.mxu1 %v9198_v16  ;;  %v2269_v16 = vld [vmem:[%s12085_s4 + $0x28] sm:$0xff] }
 0x1cd   : > { %9203 = vmatprep.subr.bf16.mxu1 %v9202_v11  ;;  %v2297_v59 = vsel %vm2280_vm1, %v2269_v16, 0 }
 0x1ce   : > { %v10769_v1 = vand.u32 4294901760, %v2297_v59 }
 0x1d0   : > { %9205 = vmatpush3.bf16.msra.mxu1 %v9202_v11  ;;  %v3535_v11 = vld [vmem:[%s12086_s5 + $0x30] sm:$0xff] }
 0x1d1   : > { %9207 = vmatprep.subr.bf16.mxu1 %v9206_v12 }
 0x1d4   : > { %9209 = vmatpush3.bf16.msra.mxu1 %v9206_v12  ;;  %v3564_v12 = vsel %vm2280_vm1, %v3535_v11, 0 }
 0x1d5   : > { %9211 = vmatprep.subr.bf16.mxu1 %v9210_v23 }
 0x1d8   : > { %9213 = vmatpush3.bf16.msra.mxu1 %v9210_v23  ;;  %v10792_v23 = vsub.f32 %v2297_v59, %v10769_v1 }
 0x1d9   : > { %9215 = vmatprep.subr.bf16.mxu1 %v10510_v54 }
 0x1da   : > { %12311 = vst [vmem:[#allocation12_spill] sm:$0xff] %v10792_v23 }
 0x1db   : > { %8240 = vmatmul.mubr.f32.vlgmr.msra.gmra.mrb[0].mxu1 %v10534_v57 }
 0x1dc   : > { %9217 = vmatpush3.bf16.msra.mxu1 %v10510_v54  ;;  %8274 = vmatprep.mubr.f32.mxu1 %v10501_v24  ;;  %v3529_v24 = vld [vmem:[%s12086_s5] sm:$0xff] }
 0x1dd   : > { %9219 = vmatprep.subr.bf16.mxu1 %v10518_v34 }
 0x1e0   : > { %9221 = vmatpush3.bf16.msra.mxu1 %v10518_v34 }
 0x1e1   : > { %9223 = vmatprep.subr.bf16.mxu1 %v10531_v38 }
 0x1e4   : > { %9225 = vmatpush3.bf16.msra.mxu1 %v10531_v38 }
 0x1e5   : > { %9227 = vmatprep.subr.bf16.mxu1 %v10543_v52 }
 0x1e8   : > { %9229 = vmatpush3.bf16.msra.mxu1 %v10543_v52  ;;  %v2265_v52 = vld [vmem:[%s12085_s4 + $0x8] sm:$0xff] }
 0x1e9   : > { %9231 = vmatprep.subr.bf16.mxu1 %v10556_v43 }
 0x1ec   : > { %9233 = vmatpush3.bf16.msra.mxu1 %v10556_v43  ;;  %v2285_v43 = vsel %vm2280_vm1, %v2265_v52, 0 }
 0x1ed   : > { %9235 = vmatprep.subr.bf16.mxu1 %v10565_v27 }
 0x1f0   : > { %9237 = vmatpush3.bf16.msra.mxu1 %v10565_v27  ;;  %v10714_v27 = vand.u32 4294901760, %v2285_v43 }
 0x1f1   : > { %9239 = vmatprep.subr.bf16.mxu1 %v9238_v15 }
 0x1f2   : > { %v10741_v47 = vsub.f32 %v2285_v43, %v10714_v27  ;;  %v12115_v43 = vand.u32 4294901760, %v10789_v20 }
 0x1f4   : > { %9241 = vmatpush3.bf16.msra.mxu1 %v9238_v15  ;;  %12303 = vst [vmem:[#allocation4_spill] sm:$0xff] %v10741_v47 }
 0x1f5   : > { %9243 = vmatprep.subr.bf16.mxu1 %v9242_v25 }
 0x1f8   : > { %9245 = vmatpush3.bf16.msra.mxu1 %v9242_v25 }
 0x1f9   : > { %9247 = vmatprep.subr.bf16.mxu1 %v10507_v62 }
 0x1fb   : > { %8275 = vmatmul.mubr.f32.vlgmr.msra.gmra.mrb[0].mxu1 %v10547_v61  ;;  %v3530_v61 = vld [vmem:[%s12086_s5 + $0x8] sm:$0xff] }
 0x1fc   : > { %9249 = vmatpush3.bf16.msra.mxu1 %v10507_v62  ;;  %8309 = vmatprep.mubr.f32.mxu1 %v1661_v28 }
 0x1fd   : > { %9251 = vmatprep.subr.bf16.mxu1 %v10513_v8 }
 0x200   : > { %9253 = vmatpush3.bf16.msra.mxu1 %v10513_v8 }
 0x201   : > { %9255 = vmatprep.subr.bf16.mxu1 %v10521_v2 }
 0x204   : > { %9257 = vmatpush3.bf16.msra.mxu1 %v10521_v2 }
 0x205   : > { %9259 = vmatprep.subr.bf16.mxu1 %v10536_v60 }
 0x208   : > { %9261 = vmatpush3.bf16.msra.mxu1 %v10536_v60 }
 0x209   : > { %9263 = vmatprep.subr.bf16.mxu1 %v10549_v13 }
 0x20c   : > { %9265 = vmatpush3.bf16.msra.mxu1 %v10549_v13 }
 0x20d   : > { %9267 = vmatprep.subr.bf16.mxu1 %v10560_v51 }
 0x210   : > { %9269 = vmatpush3.bf16.msra.mxu1 %v10560_v51 }
 0x211   : > { %9271 = vmatprep.subr.bf16.mxu1 %v10571_v3 }
 0x214   : > { %9273 = vmatpush3.bf16.msra.mxu1 %v10571_v3 }
 0x215   : > { %9275 = vmatprep.subr.bf16.mxu1 %v10577_v55 }
 0x218   : > { %9277 = vmatpush3.bf16.msra.mxu1 %v10577_v55 }
 0x219   : > { %9279 = vmatprep.subr.bf16.mxu1 %v10515_v36 }
 0x21b   : > { %8310 = vmatmul.mubr.f32.vlgmr.msra.gmra.mrb[0].mxu1 %v1671_v49  ;;  %v3549_v49 = vsel %vm2280_vm1, %v3530_v61, 0  ;;  %v12111_v61 = vand.u32 4294901760, %v10786_v35 }
 0x21c   : > { %9281 = vmatpush3.bf16.msra.mxu1 %v10515_v36  ;;  %8344 = vmatprep.mubr.f32.mxu1 %v10498_v18  ;;  %v10722_v56 = vand.u32 4294901760, %v3549_v49 }
 0x21d   : > { %9283 = vmatprep.subr.bf16.mxu1 %v10528_v22  ;;  %v10865_v59 = vsub.f32 %v10786_v35, %v12111_v61 }
 0x21e   : > { %v10748_v7 = vsub.f32 %v3549_v49, %v10722_v56  ;;  %v12118_v49 = vand.u32 4294901760, %v10792_v23 }
 0x220   : > { %9285 = vmatpush3.bf16.msra.mxu1 %v10528_v22  ;;  %12304 = vst [vmem:[#allocation5_spill] sm:$0xff] %v10748_v7  ;;  %v12120_v25 = vand.u32 4294901760, %v10748_v7 }
 0x221   : > { %9287 = vmatprep.subr.bf16.mxu1 %v10540_v14 }
 0x224   : > { %9289 = vmatpush3.bf16.msra.mxu1 %v10540_v14 }
 0x225   : > { %9291 = vmatprep.subr.bf16.mxu1 %v10553_v32 }
 0x228   : > { %9293 = vmatpush3.bf16.msra.mxu1 %v10553_v32  ;;  %v3531_v32 = vld [vmem:[%s12086_s5 + $0x10] sm:$0xff] }
 0x229   : > { %9295 = vmatprep.subr.bf16.mxu1 %v10562_v19  ;;  %v3552_v53 = vsel %vm2280_vm1, %v3531_v32, 0  ;;  %v3567_v32 = vsel %vm2280_vm1, %v3536_v39, 0  ;;  %v2306_v39 = vsel %vm2280_vm1, %v2272_v4, 0 }
 0x22a   : > { %v10853_v33 = vand.u32 4294901760, %v3567_v32 }
 0x22c   : > { %9297 = vmatpush3.bf16.msra.mxu1 %v10562_v19  ;;  %v2267_v19 = vld [vmem:[%s12085_s4 + $0x18] sm:$0xff] }
 0x22d   : > { %9299 = vmatprep.subr.bf16.mxu1 %v10573_v48  ;;  %v2291_v5 = vsel %vm2280_vm1, %v2267_v19, 0 }
 0x230   : > { %9301 = vmatpush3.bf16.msra.mxu1 %v10573_v48  ;;  %v10743_v48 = vand.u32 4294901760, %v2291_v5 }
 0x231   : > { %9303 = vmatprep.subr.bf16.mxu1 %v10579_v0 }
 0x232   : > { %v10773_v50 = vsub.f32 %v2291_v5, %v10743_v48 }
 0x234   : > { %9305 = vmatpush3.bf16.msra.mxu1 %v10579_v0  ;;  %v12116_v0 = vand.u32 4294901760, %v10741_v47  ;;  %12307 = vst [vmem:[#allocation8_spill] sm:$0xff] %v10773_v50 }
 0x235   : > { %9307 = vmatprep.subr.bf16.mxu1 %v10584_v17 }
 0x238   : > { %9309 = vmatpush3.bf16.msra.mxu1 %v10584_v17 }
 0x239   : > { %9311 = vmatprep.subr.bf16.mxu1 %v10507_v62 }
 0x23b   : > { %8345 = vmatmul.mubr.f32.vlgmr.msra.gmra.mrb[0].mxu1 %v10534_v57 }
 0x23c   : > { %9313 = vmatpush3.bf16.msra.mxu1 %v10507_v62  ;;  %8379 = vmatprep.mubr.f32.mxu1 %v10498_v18  ;;  %v2264_v18 = vld [vmem:[%s12085_s4] sm:$0xff]  ;;  %v3546_v62 = vsel %vm2280_vm1, %v3529_v24, 0  ;;  %v10804_v24 = vsub.f32 %v3561_v41, %v10775_v29 }
 0x23d   : > { %9315 = vmatprep.subr.bf16.mxu1 %v10513_v8  ;;  %v2282_v28 = vsel %vm2280_vm1, %v2264_v18, 0  ;;  %v12112_v18 = vand.u32 4294901760, %v10773_v50  ;;  %v3537_v41 = vld [vmem:[%s12086_s5 + $0x40] sm:$0xff] }
 0x23e   : > { %v10677_v54 = vand.u32 4294901760, %v2282_v28  ;;  %12312 = vst [vmem:[#allocation13_spill] sm:$0xff] %v10804_v24  ;;  %v12121_v19 = vand.u32 4294901760, %v10804_v24  ;;  %v3570_v4 = vsel %vm2280_vm1, %v3537_v41, 0  ;;  %v2274_v41 = vld [vmem:[%s12085_s4 + $0x50] sm:$0xff] }
 0x23f   : > { %v2312_v45 = vsel %vm2280_vm1, %v2274_v41, 0 }
 0x240   : > { %9317 = vmatpush3.bf16.msra.mxu1 %v10513_v8  ;;  %v10679_v8 = vand.u32 4294901760, %v3546_v62  ;;  %v10682_v36 = vsub.f32 %v2282_v28, %v10677_v54  ;;  %v10806_v28 = vand.u32 4294901760, %v3564_v12 }
 0x241   : > { %9319 = vmatprep.subr.bf16.mxu1 %v10521_v2 }
 0x242   : > { %12301 = vst [vmem:[#allocation2_spill] sm:$0xff] %v10682_v36  ;;  %v10685_v34 = vsub.f32 %v3546_v62, %v10679_v8  ;;  %v1571_v62 = vpop.permute.xlu0 %1570  ;;  %v10844_v31 = vsub.f32 %v3564_v12, %v10806_v28  ;;  %v10878_v12 = vsub.f32 %v10792_v23, %v12118_v49  ;;  %v10893_v49 = vsub.f32 %v3567_v32, %v10853_v33 }
 0x244   : > { %9321 = vmatpush3.bf16.msra.mxu1 %v10521_v2  ;;  %12302 = vst [vmem:[#allocation3_spill] sm:$0xff] %v10685_v34  ;;  %v12119_v2 = vand.u32 4294901760, %v10682_v36  ;;  %v12122_v22 = vand.u32 4294901760, %v10685_v34  ;;  %12314 = vst [vmem:[#allocation15_spill] sm:$0xff] %v10844_v31 }
 0x245   : > { %9323 = vmatprep.subr.bf16.mxu1 %v10536_v60  ;;  %12316 = vst [vmem:[#allocation17_spill] sm:$0xff] %v10893_v49 }
 0x246   : > { %v2399_v38 = vsub.f32 %v10682_v36, %v12119_v2  ;;  %v1576_v42 = vpop.permute.xlu0 %1575 }
 0x248   : > { %9325 = vmatpush3.bf16.msra.mxu1 %v10536_v60  ;;  %v2400_v60 = vand.u32 4294901760, %v2399_v38  ;;  %v10811_v38 = vsub.f32 %v10741_v47, %v12116_v0 }
 0x249   : > { %9327 = vmatprep.subr.bf16.mxu1 %v10549_v13 }
 0x24c   : > { %9329 = vmatpush3.bf16.msra.mxu1 %v10549_v13  ;;  %v2266_v13 = vld [vmem:[%s12085_s4 + $0x10] sm:$0xff] }
 0x24d   : > { %9331 = vmatprep.subr.bf16.mxu1 %v10560_v51 }
 0x250   : > { %9333 = vmatpush3.bf16.msra.mxu1 %v10560_v51  ;;  %v2288_v51 = vsel %vm2280_vm1, %v2266_v13, 0  ;;  %v2303_v13 = vsel %vm2280_vm1, %v2271_v6, 0 }
 0x251   : > { %9335 = vmatprep.subr.bf16.mxu1 %v10571_v3  ;;  %v10724_v58 = vand.u32 4294901760, %v2288_v51  ;;  %v10851_v16 = vand.u32 4294901760, %v2303_v13 }
 0x253   : > { %v10751_v15 = vsub.f32 %v2288_v51, %v10724_v58  ;;  %v10835_v51 = vsub.f32 %v2300_v21, %v10794_v37  ;;  %v10873_v21 = vsub.f32 %v10789_v20, %v12115_v43  ;;  %v12124_v43 = vand.u32 4294901760, %v10844_v31 }
 0x254   : > { %9337 = vmatpush3.bf16.msra.mxu1 %v10571_v3  ;;  %v10726_v3 = vand.u32 4294901760, %v3552_v53 }
 0x255   : > { %9339 = vmatprep.subr.bf16.mxu1 %v10577_v55  ;;  %12305 = vst [vmem:[#allocation6_spill] sm:$0xff] %v10751_v15  ;;  %v12113_v10 = vand.u32 4294901760, %v10751_v15  ;;  %12313 = vst [vmem:[#allocation14_spill] sm:$0xff] %v10835_v51  ;;  %v12123_v6 = vand.u32 4294901760, %v10835_v51 }
 0x256   : > { %v10754_v44 = vsub.f32 %v3552_v53, %v10726_v3  ;;  %v10840_v53 = vsub.f32 %v10773_v50, %v12112_v18 }
 0x257   : > { %v10908_v32 = vsub.f32 %v10835_v51, %v12123_v6  ;;  %v3539_v6 = vld [vmem:[%s12086_s5 + $0x50] sm:$0xff] }
 0x258   : > { %9341 = vmatpush3.bf16.msra.mxu1 %v10577_v55  ;;  %12306 = vst [vmem:[#allocation7_spill] sm:$0xff] %v10754_v44  ;;  %v10760_v55 = vand.u32 4294901760, %v3555_v40  ;;  %v12117_v9 = vand.u32 4294901760, %v10754_v44 }
 0x25a   : > { %v10783_v17 = vsub.f32 %v3555_v40, %v10760_v55 }
 0x25b   : > { %8380 = vmatmul.mubr.f32.vlgmr.msra.gmra.mrb[0].mxu1 %v10534_v57  ;;  %v3663_v57 = vsub.f32 %v10685_v34, %v12122_v22 }
 0x25c   : > { %8386 = vmatprep.mubr.f32.mxu1 %v2400_v60  ;;  %12308 = vst [vmem:[#allocation9_spill] sm:$0xff] %v10783_v17  ;;  %v10821_v60 = vsub.f32 %v10751_v15, %v12113_v10  ;;  %v12114_v52 = vand.u32 4294901760, %v10783_v17  ;;  %v2275_v10 = vld [vmem:[%s12085_s4 + $0x58] sm:$0xff] }
 0x25d   : > { %v3664_v14 = vand.u32 4294901760, %v3663_v57  ;;  %v10816_v57 = vsub.f32 %v10748_v7, %v12120_v25  ;;  %v10898_v25 = vand.u32 4294901760, %v2306_v39 }
 0x25e   : > { %v10860_v26 = vsub.f32 %v10783_v17, %v12114_v52  ;;  %v10886_v52 = vsub.f32 %v10804_v24, %v12121_v19  ;;  %v2273_v19 = vld [vmem:[%s12085_s4 + $0x48] sm:$0xff]  ;;  %v2315_v24 = vsel %vm2280_vm1, %v2275_v10, 0 }
 0x25f   : > { %8554 = vmatprep.mubr.f32.mxu0 %v3664_v14  ;;  %v10826_v14 = vsub.f32 %v10754_v44, %v12117_v9  ;;  %v10890_v9 = vsub.f32 %v2303_v13, %v10851_v16  ;;  %v10920_v13 = vsub.f32 %v10844_v31, %v12124_v43  ;;  %v2309_v46 = vsel %vm2280_vm1, %v2273_v19, 0  ;;  %v3542_v10 = vld [vmem:[%s12086_s5 + $0x68] sm:$0xff] }
 0x260   : > { %v3576_v31 = vsel %vm2280_vm1, %v3539_v6, 0 }
 0x261   : > { %12315 = vst [vmem:[#allocation16_spill] sm:$0xff] %v10890_v9  ;;  %v10968_v35 = vand.u32 4294901760, %v3576_v31 }
 0x32e   : > { %v8381_v11 = vpop.f32.mrb[0].mxu1 }
 0x32f   : > { %v9440_v61 = vadd.f32 %v8381_v11, %v1576_v42  ;;  %v2252_v18 = vpop.f32.mrb[1].mxu1  ;;  %v2277_v11 = vld [vmem:[%s12085_s4 + $0x68] sm:$0xff] }
 0x330   : > { %v9441_v0 = vadd.f32 %v2252_v18, %v1571_v62  ;;  %v10922_v62 = vand.u32 4294901760, %v3570_v4 }
 0x331   : > { %v2263_v42 = vmax.f32 %v9440_v61, 0.0  ;;  %v3538_v61 = vld [vmem:[%s12086_s5 + $0x48] sm:$0xff] }
 0x332   : > { %v2262_v18 = vmax.f32 %v9441_v0, 0.0  ;;  %v10931_v0 = vsub.f32 %v2306_v39, %v10898_v25  ;;  %v3573_v43 = vsel %vm2280_vm1, %v3538_v61, 0  ;;  %v10944_v39 = vsub.f32 %v3570_v4, %v10922_v62 }
 0x333   : > { %v2333_v22 = vand.u32 4294901760, %v2263_v42  ;;  %v10946_v61 = vand.u32 4294901760, %v2309_v46  ;;  %v10958_v41 = vand.u32 4294901760, %v3573_v43  ;;  %v10960_v4 = vand.u32 4294901760, %v2312_v45 }
 0x334   : > { %v2330_v2 = vand.u32 4294901760, %v2262_v18  ;;  %12317 = vst [vmem:[#allocation18_spill] sm:$0xff] %v10931_v0  ;;  %12318 = vst [vmem:[#allocation19_spill] sm:$0xff] %v10944_v39 }
 0x335   : > { %v2565_v40 = vsub.f32 %v2263_v42, %v2333_v22  ;;  %v3541_v42 = vld [vmem:[%s12086_s5 + $0x60] sm:$0xff]  ;;  %v10977_v44 = vsub.f32 %v2309_v46, %v10946_v61  ;;  %v10991_v46 = vsub.f32 %v3573_v43, %v10958_v41 }
 0x336   : > { %v10935_v5 = vpack.c.bf16 %v2333_v22, %v2330_v2  ;;  %v2558_v51 = vsub.f32 %v2262_v18, %v2330_v2  ;;  %v3540_v2 = vld [vmem:[%s12086_s5 + $0x58] sm:$0xff]  ;;  %v2276_v22 = vld [vmem:[%s12085_s4 + $0x60] sm:$0xff]  ;;  %v3582_v36 = vsel %vm2280_vm1, %v3541_v42, 0  ;;  %v10994_v42 = vsub.f32 %v2312_v45, %v10960_v4 }
 0x337   : > { %v2566_v19 = vand.u32 4294901760, %v2565_v40  ;;  %v3579_v20 = vsel %vm2280_vm1, %v3540_v2, 0  ;;  %v2318_v15 = vsel %vm2280_vm1, %v2276_v22, 0  ;;  %v10996_v2 = vand.u32 4294901760, %v2315_v24  ;;  %v2278_v22 = vld [vmem:[%s12085_s4 + $0x70] sm:$0xff] }
 0x338   : > { %v2559_v6 = vand.u32 4294901760, %v2558_v51  ;;  %9343 = vmatprep.subr.bf16.mxu1 %v10935_v5  ;;  %9367 = vmatprep.subr.bf16.mxu0 %v10935_v5  ;;  %v10956_v18 = vpack.c.bf16 %v2565_v40, %v2558_v51  ;;  %v11011_v45 = vand.u32 4294901760, %v3579_v20  ;;  %v12338_v34 = vand.u32 4294901760, %v10994_v42 }
 0x339   : > { %v2567_v23 = vsub.f32 %v2565_v40, %v2566_v19  ;;  %9345 = vmatpush3.bf16.msra.mxu1 %v10935_v5  ;;  %9369 = vmatpush3.bf16.msra.mxu0 %v10935_v5  ;;  %v11015_v40 = vand.u32 4294901760, %v3582_v36 }
 0x33a   : > { %v2560_v50 = vsub.f32 %v2558_v51, %v2559_v6  ;;  %v10973_v17 = vpack.c.bf16 %v2566_v19, %v2559_v6  ;;  %v12320_v19 = vand.u32 4294901760, %v10811_v38  ;;  %v12323_v38 = vand.u32 4294901760, %v10826_v14 }
 0x33b   : > { %v2568_v47 = vand.u32 4294901760, %v2567_v23  ;;  %v12321_v23 = vand.u32 4294901760, %v10816_v57  ;;  %v12324_v57 = vand.u32 4294901760, %v10890_v9  ;;  %v11009_v6 = vsub.f32 %v3576_v31, %v10968_v35 }
 0x33c   : > { %12319 = vst [vmem:[#allocation20_spill] sm:$0xff] %v10973_v17  ;;  %v2561_v51 = vand.u32 4294901760, %v2560_v50  ;;  %8387 = vmatmul.mubr.f32.vlgmr.msra.gmra.mrb[2].mxu1 %v12320_v19  ;;  %v12322_v50 = vand.u32 4294901760, %v10821_v60  ;;  %v11013_v19 = vand.u32 4294901760, %v2318_v15  ;;  %v2321_v60 = vsel %vm2280_vm1, %v2277_v11, 0  ;;  %v2279_v11 = vld [vmem:[%s12085_s4 + $0x78] sm:$0xff] }
 0x33d   : > { %8555 = vmatmul.mubr.f32.vlgmr.msra.gmra.mrb[16].mxu0 %v12321_v23  ;;  %v2469_v43 = vsub.f32 %v10890_v9, %v12324_v57  ;;  %v12326_v14 = vand.u32 4294901760, %v10893_v49  ;;  %v12327_v57 = vand.u32 4294901760, %v10931_v0  ;;  %v12328_v9 = vand.u32 4294901760, %v10944_v39 }
 0x33e   : > { %8389 = vmatprep.mubr.f32.mxu1 %v12322_v50  ;;  %8557 = vmatprep.mubr.f32.mxu0 %v12323_v38  ;;  %12325 = vst [vmem:[#allocation21_spill] sm:$0xff] %v11013_v19  ;;  %v9346_v23 = vpack.c.bf16 %v2568_v47, %v2561_v51  ;;  %v3585_v50 = vsel %vm2280_vm1, %v3542_v10, 0  ;;  %v2324_v47 = vsel %vm2280_vm1, %v2278_v22, 0  ;;  %v12329_v10 = vand.u32 4294901760, %v10840_v53 }
 0x33f   : > { %v3733_v38 = vsub.f32 %v10893_v49, %v12326_v14  ;;  %v2479_v31 = vsub.f32 %v10931_v0, %v12327_v57  ;;  %v3743_v17 = vsub.f32 %v10944_v39, %v12328_v9  ;;  %v11038_v0 = vsub.f32 %v2315_v24, %v10996_v2 }
 0x340   : > { %8390 = vmatmul.mubr.f32.gmra.mrb[4].mxu1 %v12329_v10  ;;  %9347 = vmatprep.subr.bf16.mxu1 %v9346_v23  ;;  %v12330_v9 = vand.u32 4294901760, %v10860_v26  ;;  %v11044_v39 = vsub.f32 %v3579_v20, %v11011_v45  ;;  %v11046_v53 = vand.u32 4294901760, %v2321_v60  ;;  %v11048_v10 = vand.u32 4294901760, %v3585_v50 }
 0x341   : > { %9371 = vmatprep.subr.bf16.mxu0 %v9346_v23  ;;  %9349 = vmatpush3.bf16.msra.mxu1 %v9346_v23  ;;  %v11051_v57 = vsub.f32 %v2318_v15, %v11013_v19  ;;  %v11054_v24 = vsub.f32 %v3582_v36, %v11015_v40  ;;  %v11056_v26 = vand.u32 4294901760, %v2324_v47  ;;  %v2470_v20 = vand.u32 4294901760, %v2469_v43 }
 0x342   : > { %8558 = vmatmul.mubr.f32.gmra.mrb[18].mxu0 %v12330_v9  ;;  %12331 = vst [vmem:[#allocation22_spill] sm:$0xff] %v11046_v53  ;;  %12332 = vst [vmem:[#allocation23_spill] sm:$0xff] %v11048_v10  ;;  %v2327_v9 = vsel %vm2280_vm1, %v2279_v11, 0  ;;  %9351 = vmatprep.subr.bf16.mxu1 %v10956_v18  ;;  %v3734_v22 = vand.u32 4294901760, %v3733_v38  ;;  %v2480_v14 = vand.u32 4294901760, %v2479_v31  ;;  %v3744_v51 = vand.u32 4294901760, %v3743_v17 }
 0x343   : > { %9373 = vmatpush3.bf16.msra.mxu0 %v9346_v23  ;;  %12333 = vst [vmem:[#allocation24_spill] sm:$0xff] %v11056_v26  ;;  %v12334_v23 = vand.u32 4294901760, %v10865_v59  ;;  %v12335_v15 = vand.u32 4294901760, %v10873_v21  ;;  %v12336_v36 = vand.u32 4294901760, %v10977_v44  ;;  %v12337_v11 = vand.u32 4294901760, %v10991_v46 }
 0x344   : > { %9375 = vmatprep.subr.bf16.mxu0 %v10956_v18  ;;  %v2499_v43 = vsub.f32 %v10994_v42, %v12338_v34  ;;  %v12167_v17 = vand.u32 4294901760, %v11038_v0  ;;  %v12339_v59 = vand.u32 4294901760, %v10878_v12  ;;  %v12340_v21 = vand.u32 4294901760, %v10886_v52 }
 0x345   : > { %8392 = vmatprep.mubr.f32.mxu1 %v12334_v23  ;;  %8560 = vmatprep.mubr.f32.mxu0 %v12335_v15  ;;  %v2489_v49 = vsub.f32 %v10977_v44, %v12336_v36  ;;  %v3753_v7 = vsub.f32 %v10991_v46, %v12337_v11  ;;  %v11081_v31 = vsub.f32 %v2321_v60, %v11046_v53  ;;  %v11086_v15 = vand.u32 4294901760, %v2327_v9 }
 0x346   : > { %8393 = vmatmul.mubr.f32.gmra.mrb[6].mxu1 %v12339_v59  ;;  %8561 = vmatmul.mubr.f32.gmra.mrb[20].mxu0 %v12340_v21  ;;  %v11084_v23 = vsub.f32 %v3585_v50, %v11048_v10  ;;  %v12342_v34 = vand.u32 4294901760, %v10908_v32  ;;  %v12343_v36 = vand.u32 4294901760, %v10920_v13  ;;  %v12344_v12 = vand.u32 4294901760, %v11009_v6 }
 0x347   : > { %12341 = vst [vmem:[#allocation25_spill] sm:$0xff] %v11086_v15  ;;  %v12162_v11 = vand.u32 4294901760, %v11051_v57  ;;  %v12168_v60 = vand.u32 4294901760, %v11054_v24  ;;  %v11098_v59 = vsub.f32 %v2324_v47, %v11056_v26  ;;  %v2490_v50 = vand.u32 4294901760, %v2489_v49 }
 0x348   : > { %8395 = vmatprep.mubr.f32.mxu1 %v12342_v34  ;;  %8563 = vmatprep.mubr.f32.mxu0 %v12343_v36  ;;  %v3763_v52 = vsub.f32 %v11009_v6, %v12344_v12  ;;  %v3754_v21 = vand.u32 4294901760, %v3753_v7  ;;  %v2500_v38 = vand.u32 4294901760, %v2499_v43  ;;  %v2509_v32 = vsub.f32 %v11038_v0, %v12167_v17  ;;  %v12363_v17 = vld [vmem:[#allocation14_spill] sm:$0xff] }
 0x349   : > { %v12345_v13 = vand.u32 4294901760, %v11044_v39  ;;  %v12163_v36 = vand.u32 4294901760, %v11081_v31  ;;  %v12166_v12 = vand.u32 4294901760, %v11084_v23  ;;  %v11109_v47 = vsub.f32 %v2327_v9, %v11086_v15 }
 0x34a   : > { %8396 = vmatmul.mubr.f32.gmra.mrb[8].mxu1 %v2470_v20  ;;  %8564 = vmatmul.mubr.f32.gmra.mrb[22].mxu0 %v3734_v22  ;;  %v3764_v7 = vand.u32 4294901760, %v3763_v52  ;;  %v2519_v49 = vsub.f32 %v11051_v57, %v12162_v11  ;;  %v3783_v22 = vsub.f32 %v11054_v24, %v12168_v60  ;;  %v12165_v20 = vand.u32 4294901760, %v11098_v59  ;;  %v12364_v60 = vld [vmem:[#allocation19_spill] sm:$0xff] }
 0x34b   : > { %v3773_v34 = vsub.f32 %v11044_v39, %v12345_v13  ;;  %8398 = vmatprep.mubr.f32.mxu1 %v2480_v14  ;;  %8566 = vmatprep.mubr.f32.mxu0 %v3744_v51  ;;  %v2510_v43 = vand.u32 4294901760, %v2509_v32  ;;  %v2529_v14 = vsub.f32 %v11081_v31, %v12163_v36  ;;  %v3793_v51 = vsub.f32 %v11084_v23, %v12166_v12  ;;  %v12362_v12 = vld [vmem:[#allocation17_spill] sm:$0xff] }
 0x34c   : > { %v12164_v9 = vand.u32 4294901760, %v11109_v47  ;;  %v2520_v52 = vand.u32 4294901760, %v2519_v49  ;;  %v3784_v11 = vand.u32 4294901760, %v3783_v22 }
 0x34d   : > { %v3774_v13 = vand.u32 4294901760, %v3773_v34  ;;  %v3794_v32 = vand.u32 4294901760, %v3793_v51  ;;  %v12351_v51 = vld [vmem:[#allocation20_spill] sm:$0xff] }
 0x34e   : > { %8399 = vmatmul.mubr.f32.gmra.mrb[10].mxu1 %v2490_v50  ;;  %8567 = vmatmul.mubr.f32.gmra.mrb[24].mxu0 %v3754_v21  ;;  %v2539_v50 = vsub.f32 %v11098_v59, %v12165_v20  ;;  %v2530_v21 = vand.u32 4294901760, %v2529_v14  ;;  %v2549_v34 = vsub.f32 %v11109_v47, %v12164_v9  ;;  %v12350_v14 = vld [vmem:[#allocation2_spill] sm:$0xff]  ;;  %v12360_v9 = vld [vmem:[#allocation15_spill] sm:$0xff]  ;;  %v12361_v20 = vld [vmem:[#allocation12_spill] sm:$0xff] }
 0x34f   : > { %8401 = vmatprep.mubr.f32.mxu1 %v2500_v38  ;;  %8569 = vmatprep.mubr.f32.mxu0 %v3764_v7 }
 0x350   : > { %v2540_v36 = vand.u32 4294901760, %v2539_v50  ;;  %v2550_v38 = vand.u32 4294901760, %v2549_v34  ;;  %v12353_v50 = vld [vmem:[#allocation4_spill] sm:$0xff]  ;;  %v12356_v34 = vld [vmem:[#allocation11_spill] sm:$0xff] }
 0x352   : > { %8402 = vmatmul.mubr.f32.gmra.mrb[12].mxu1 %v2510_v43  ;;  %8570 = vmatmul.mubr.f32.gmra.mrb[26].mxu0 %v3774_v13  ;;  %v12348_v43 = vld [vmem:[#allocation3_spill] sm:$0xff]  ;;  %v12349_v13 = vld [vmem:[#allocation5_spill] sm:$0xff] }
 0x353   : > { %8404 = vmatprep.mubr.f32.mxu1 %v2520_v52  ;;  %8572 = vmatprep.mubr.f32.mxu0 %v3784_v11  ;;  %v12352_v52 = vld [vmem:[#allocation7_spill] sm:$0xff] }
 0x356   : > { %8405 = vmatmul.mubr.f32.gmra.mrb[14].mxu1 %v2530_v21  ;;  %8573 = vmatmul.mubr.f32.gmra.mrb[28].mxu0 %v3794_v32  ;;  %v12354_v21 = vld [vmem:[#allocation9_spill] sm:$0xff]  ;;  %v12355_v32 = vld [vmem:[#allocation6_spill] sm:$0xff] }
 0x357   : > { %8407 = vmatprep.mubr.f32.mxu1 %v2540_v36  ;;  %8582 = vmatprep.mubr.f32.mxu0 %v10679_v8  ;;  %v3544_v36 = vld [vmem:[%s12086_s5 + $0x78] sm:$0xff] }
 0x358   : > { %v3591_v49 = vsel %vm2280_vm1, %v3544_v36, 0  ;;  %v12359_v36 = vld [vmem:[#allocation10_spill] sm:$0xff] }
 0x359   : > { %v11171_v22 = vand.u32 4294901760, %v3591_v49 }
 0x35a   : > { %8408 = vmatmul.mubr.f32.gmra.mrb[16].mxu1 %v2550_v38  ;;  %8583 = vmatmul.mubr.f32.vlgmr.msra.gmra.mrb[16].mxu0 %v10722_v56  ;;  %v12357_v38 = vld [vmem:[#allocation8_spill] sm:$0xff] }
 0x35b   : > { %9377 = vmatpush3.bf16.msra.mxu0 %v10956_v18  ;;  %8414 = vmatprep.mubr.f32.mxu1 %v10677_v54  ;;  %12347 = vst [vmem:[#allocation27_spill] sm:$0xff] %v11171_v22 }
 0x35c   : > { %9379 = vmatprep.subr.bf16.mxu0 %v10935_v5  ;;  %8585 = vmatprep.mubr.f32.mxu0 %v10726_v3 }
 0x35e   : > { %8415 = vmatmul.mubr.f32.vlgmr.msra.gmra.mrb[2].mxu1 %v10714_v27  ;;  %8586 = vmatmul.mubr.f32.gmra.mrb[18].mxu0 %v10760_v55 }
 0x35f   : > { %9353 = vmatpush3.bf16.msra.mxu1 %v10956_v18  ;;  %8417 = vmatprep.mubr.f32.mxu1 %v10724_v58  ;;  %v3543_v18 = vld [vmem:[%s12086_s5 + $0x70] sm:$0xff] }
 0x360   : > { %9355 = vmatprep.subr.bf16.mxu1 %v10935_v5  ;;  %8588 = vmatprep.mubr.f32.mxu0 %v10767_v30  ;;  %v3588_v11 = vsel %vm2280_vm1, %v3543_v18, 0  ;;  %v12358_v18 = vld [vmem:[#allocation13_spill] sm:$0xff] }
 0x361   : > { %v11166_v7 = vand.u32 4294901760, %v3588_v11 }
 0x362   : > { %8418 = vmatmul.mubr.f32.gmra.mrb[4].mxu1 %v10743_v48  ;;  %8589 = vmatmul.mubr.f32.gmra.mrb[20].mxu0 %v10775_v29 }
 0x363   : > { %8420 = vmatprep.mubr.f32.mxu1 %v10762_v63  ;;  %8591 = vmatprep.mubr.f32.mxu0 %v10806_v28  ;;  %12346 = vst [vmem:[#allocation26_spill] sm:$0xff] %v11166_v7 }
 0x366   : > { %8421 = vmatmul.mubr.f32.gmra.mrb[6].mxu1 %v10769_v1  ;;  %8592 = vmatmul.mubr.f32.gmra.mrb[22].mxu0 %v10853_v33 }
 0x367   : > { %8423 = vmatprep.mubr.f32.mxu1 %v10794_v37  ;;  %8594 = vmatprep.mubr.f32.mxu0 %v10922_v62 }
 0x36a   : > { %8424 = vmatmul.mubr.f32.gmra.mrb[8].mxu1 %v10851_v16  ;;  %8595 = vmatmul.mubr.f32.gmra.mrb[24].mxu0 %v10958_v41 }
 0x36b   : > { %8426 = vmatprep.mubr.f32.mxu1 %v10898_v25  ;;  %8597 = vmatprep.mubr.f32.mxu0 %v10968_v35 }
 0x36e   : > { %8427 = vmatmul.mubr.f32.gmra.mrb[10].mxu1 %v10946_v61  ;;  %8598 = vmatmul.mubr.f32.gmra.mrb[26].mxu0 %v11011_v45 }
 0x36f   : > { %8429 = vmatprep.mubr.f32.mxu1 %v10960_v4  ;;  %8600 = vmatprep.mubr.f32.mxu0 %v11015_v40 }
 0x372   : > { %8430 = vmatmul.mubr.f32.gmra.mrb[12].mxu1 %v10996_v2  ;;  %8601 = vmatmul.mubr.f32.gmra.mrb[28].mxu0 %v11048_v10  ;;  %v12371_v10 = vand.u32 4294901760, %v12353_v50 }
 0x373   : > { %8432 = vmatprep.mubr.f32.mxu1 %v11013_v19  ;;  %8603 = vmatprep.mubr.f32.mxu0 %v11166_v7  ;;  %v11213_v19 = vsub.f32 %v3591_v49, %v11171_v22  ;;  %v12369_v49 = vand.u32 4294901760, %v12350_v14 }
 0x376   : > { %8433 = vmatmul.mubr.f32.gmra.mrb[14].mxu1 %v11046_v53  ;;  %8604 = vmatmul.mubr.f32.gmra.mrb[30].mxu0 %v11171_v22  ;;  %v11208_v53 = vsub.f32 %v3588_v11, %v11166_v7  ;;  %v12367_v11 = vand.u32 4294901760, %v12348_v43  ;;  %v12368_v7 = vand.u32 4294901760, %v12349_v13  ;;  %v12370_v22 = vand.u32 4294901760, %v12352_v52 }
 0x377   : > { %8435 = vmatprep.mubr.f32.mxu1 %v11056_v26  ;;  %8610 = vmatprep.mubr.f32.mxu0 %v12348_v43  ;;  %v12366_v26 = vld [vmem:[#allocation18_spill] sm:$0xff]  ;;  %v12372_v43 = vand.u32 4294901760, %v12354_v21 }
 0x37a   : > { %8436 = vmatmul.mubr.f32.gmra.mrb[16].mxu1 %v11086_v15  ;;  %8611 = vmatmul.mubr.f32.vlgmr.msra.gmra.mrb[16].mxu0 %v12349_v13  ;;  %v12365_v15 = vld [vmem:[#allocation16_spill] sm:$0xff]  ;;  %v12374_v13 = vand.u32 4294901760, %v12356_v34 }
 0x37b   : > { %9381 = vmatpush3.bf16.msra.mxu0 %v10935_v5  ;;  %8442 = vmatprep.mubr.f32.mxu1 %v12350_v14  ;;  %v12375_v14 = vand.u32 4294901760, %v12357_v38 }
 0x37c   : > { %9383 = vmatprep.subr.bf16.mxu0 %v12351_v51  ;;  %8613 = vmatprep.mubr.f32.mxu0 %v12352_v52  ;;  %v12378_v52 = vand.u32 4294901760, %v12360_v9 }
 0x37e   : > { %8443 = vmatmul.mubr.f32.vlgmr.msra.gmra.mrb[2].mxu1 %v12353_v50  ;;  %8614 = vmatmul.mubr.f32.gmra.mrb[18].mxu0 %v12354_v21  ;;  %v12380_v50 = vand.u32 4294901760, %v12362_v12  ;;  %v12381_v21 = vand.u32 4294901760, %v12363_v17 }
 0x37f   : > { %9357 = vmatpush3.bf16.msra.mxu1 %v10935_v5  ;;  %8445 = vmatprep.mubr.f32.mxu1 %v12355_v32 }
 0x380   : > { %9359 = vmatprep.subr.bf16.mxu1 %v12351_v51  ;;  %8616 = vmatprep.mubr.f32.mxu0 %v12356_v34  ;;  %v12383_v34 = vand.u32 4294901760, %v12365_v15 }
 0x382   : > { %8446 = vmatmul.mubr.f32.gmra.mrb[4].mxu1 %v12357_v38  ;;  %8617 = vmatmul.mubr.f32.gmra.mrb[20].mxu0 %v12358_v18  ;;  %v12384_v38 = vand.u32 4294901760, %v10991_v46 }
 0x383   : > { %8448 = vmatprep.mubr.f32.mxu1 %v12359_v36  ;;  %8619 = vmatprep.mubr.f32.mxu0 %v12360_v9  ;;  %v12385_v9 = vand.u32 4294901760, %v12366_v26 }
 0x386   : > { %8449 = vmatmul.mubr.f32.gmra.mrb[6].mxu1 %v12361_v20  ;;  %8620 = vmatmul.mubr.f32.gmra.mrb[22].mxu0 %v12362_v12  ;;  %v12387_v12 = vand.u32 4294901760, %v10977_v44 }
 0x387   : > { %8451 = vmatprep.mubr.f32.mxu1 %v12363_v17  ;;  %8622 = vmatprep.mubr.f32.mxu0 %v12364_v60  ;;  %v12388_v17 = vand.u32 4294901760, %v11044_v39 }
 0x38a   : > { %8452 = vmatmul.mubr.f32.gmra.mrb[8].mxu1 %v12365_v15  ;;  %8623 = vmatmul.mubr.f32.gmra.mrb[24].mxu0 %v10991_v46  ;;  %v12390_v15 = vand.u32 4294901760, %v11054_v24  ;;  %v3802_v46 = vand.u32 4294901760, %v11208_v53 }
 0x38b   : > { %8454 = vmatprep.mubr.f32.mxu1 %v12366_v26  ;;  %8625 = vmatprep.mubr.f32.mxu0 %v11009_v6  ;;  %v12391_v26 = vand.u32 4294901760, %v11038_v0 }
 0x38e   : > { %8455 = vmatmul.mubr.f32.gmra.mrb[10].mxu1 %v10977_v44  ;;  %8626 = vmatmul.mubr.f32.gmra.mrb[26].mxu0 %v11044_v39  ;;  %v3812_v44 = vand.u32 4294901760, %v11213_v19  ;;  %v12394_v39 = vand.u32 4294901760, %v11081_v31 }
 0x38f   : > { %8457 = vmatprep.mubr.f32.mxu1 %v10994_v42  ;;  %8628 = vmatprep.mubr.f32.mxu0 %v11054_v24  ;;  %v12398_v24 = vld [vmem:[#allocation21_spill] sm:$0xff] }
 0x392   : > { %8458 = vmatmul.mubr.f32.gmra.mrb[12].mxu1 %v11038_v0  ;;  %8629 = vmatmul.mubr.f32.gmra.mrb[28].mxu0 %v11084_v23  ;;  %v12395_v0 = vand.u32 4294901760, %v11098_v59 }
 0x393   : > { %8460 = vmatprep.mubr.f32.mxu1 %v11051_v57  ;;  %8631 = vmatprep.mubr.f32.mxu0 %v11208_v53 }
 0x396   : > { %8461 = vmatmul.mubr.f32.gmra.mrb[14].mxu1 %v11081_v31  ;;  %8632 = vmatmul.mubr.f32.gmra.mrb[30].mxu0 %v11213_v19  ;;  %v12399_v31 = vld [vmem:[#allocation26_spill] sm:$0xff] }
 0x397   : > { %8463 = vmatprep.mubr.f32.mxu1 %v11098_v59  ;;  %8638 = vmatprep.mubr.f32.mxu0 %v12367_v11  ;;  %v12401_v59 = vld [vmem:[#allocation27_spill] sm:$0xff] }
 0x39a   : > { %8464 = vmatmul.mubr.f32.gmra.mrb[16].mxu1 %v11109_v47  ;;  %8639 = vmatmul.mubr.f32.vlgmr.msra.gmra.mrb[16].mxu0 %v12368_v7  ;;  %v12373_v7 = vand.u32 4294901760, %v12355_v32  ;;  %v12382_v32 = vand.u32 4294901760, %v12364_v60  ;;  %v12389_v60 = vand.u32 4294901760, %v10994_v42  ;;  %v12396_v42 = vand.u32 4294901760, %v11109_v47  ;;  %v12402_v47 = vld [vmem:[#allocation24_spill] sm:$0xff] }
 0x39b   : > { %9385 = vmatpush3.bf16.msra.mxu0 %v12351_v51  ;;  %8470 = vmatprep.mubr.f32.mxu1 %v12369_v49 }
 0x39c   : > { %9387 = vmatprep.subr.bf16.mxu0 %v10935_v5  ;;  %8641 = vmatprep.mubr.f32.mxu0 %v12370_v22  ;;  %v12376_v22 = vand.u32 4294901760, %v12358_v18  ;;  %v12393_v18 = vand.u32 4294901760, %v11051_v57  ;;  %v12397_v57 = vld [vmem:[#allocation23_spill] sm:$0xff] }
 0x39e   : > { %8471 = vmatmul.mubr.f32.vlgmr.msra.gmra.mrb[2].mxu1 %v12371_v10  ;;  %8642 = vmatmul.mubr.f32.gmra.mrb[18].mxu0 %v12372_v43  ;;  %v12377_v10 = vand.u32 4294901760, %v12359_v36  ;;  %v12403_v36 = vld [vmem:[#allocation25_spill] sm:$0xff] }
 0x39f   : > { %9361 = vmatpush3.bf16.msra.mxu1 %v12351_v51  ;;  %8473 = vmatprep.mubr.f32.mxu1 %v12373_v7  ;;  %v12379_v51 = vand.u32 4294901760, %v12361_v20  ;;  %v12386_v20 = vand.u32 4294901760, %v11009_v6  ;;  %v12392_v6 = vand.u32 4294901760, %v11084_v23  ;;  %v12400_v23 = vld [vmem:[#allocation22_spill] sm:$0xff] }
 0x3a0   : > { %9363 = vmatprep.subr.bf16.mxu1 %v10935_v5  ;;  %8644 = vmatprep.mubr.f32.mxu0 %v12374_v13 }
 0x3a2   : > { %8474 = vmatmul.mubr.f32.gmra.mrb[4].mxu1 %v12375_v14  ;;  %8645 = vmatmul.mubr.f32.gmra.mrb[20].mxu0 %v12376_v22 }
 0x3a3   : > { %8476 = vmatprep.mubr.f32.mxu1 %v12377_v10  ;;  %8647 = vmatprep.mubr.f32.mxu0 %v12378_v52 }
 0x3a6   : > { %8477 = vmatmul.mubr.f32.gmra.mrb[6].mxu1 %v12379_v51  ;;  %8648 = vmatmul.mubr.f32.gmra.mrb[22].mxu0 %v12380_v50 }
 0x3a7   : > { %8479 = vmatprep.mubr.f32.mxu1 %v12381_v21  ;;  %8650 = vmatprep.mubr.f32.mxu0 %v12382_v32 }
 0x3aa   : > { %8480 = vmatmul.mubr.f32.gmra.mrb[8].mxu1 %v12383_v34  ;;  %8651 = vmatmul.mubr.f32.gmra.mrb[24].mxu0 %v12384_v38 }
 0x3ab   : > { %8482 = vmatprep.mubr.f32.mxu1 %v12385_v9  ;;  %8653 = vmatprep.mubr.f32.mxu0 %v12386_v20 }
 0x3ae   : > { %8483 = vmatmul.mubr.f32.gmra.mrb[10].mxu1 %v12387_v12  ;;  %8654 = vmatmul.mubr.f32.gmra.mrb[26].mxu0 %v12388_v17 }
 0x3af   : > { %8485 = vmatprep.mubr.f32.mxu1 %v12389_v60  ;;  %8656 = vmatprep.mubr.f32.mxu0 %v12390_v15 }
 0x3b2   : > { %8486 = vmatmul.mubr.f32.gmra.mrb[12].mxu1 %v12391_v26  ;;  %8657 = vmatmul.mubr.f32.gmra.mrb[28].mxu0 %v12392_v6 }
 0x3b3   : > { %8488 = vmatprep.mubr.f32.mxu1 %v12393_v18  ;;  %8659 = vmatprep.mubr.f32.mxu0 %v3802_v46 }
 0x3b6   : > { %8489 = vmatmul.mubr.f32.gmra.mrb[14].mxu1 %v12394_v39  ;;  %8660 = vmatmul.mubr.f32.gmra.mrb[30].mxu0 %v3812_v44 }
 0x3b7   : > { %8491 = vmatprep.mubr.f32.mxu1 %v12395_v0  ;;  %8666 = vmatprep.mubr.f32.mxu0 %v10679_v8 }
 0x3ba   : > { %8492 = vmatmul.mubr.f32.gmra.mrb[16].mxu1 %v12396_v42  ;;  %8667 = vmatmul.mubr.f32.vlgmr.msra.gmra.mrb[16].mxu0 %v10722_v56 }
 0x3bb   : > { %9389 = vmatpush3.bf16.msra.mxu0 %v10935_v5  ;;  %8498 = vmatprep.mubr.f32.mxu1 %v10677_v54 }
 0x3bc   : > { %8669 = vmatprep.mubr.f32.mxu0 %v10726_v3 }
 0x3be   : > { %8499 = vmatmul.mubr.f32.vlgmr.msra.gmra.mrb[2].mxu1 %v10714_v27  ;;  %8670 = vmatmul.mubr.f32.gmra.mrb[18].mxu0 %v10760_v55 }
 0x3bf   : > { %9365 = vmatpush3.bf16.msra.mxu1 %v10935_v5  ;;  %8501 = vmatprep.mubr.f32.mxu1 %v10724_v58 }
 0x3c0   : > { %9438 = vmatprep.subr.bf16.mxu1 %v10935_v5  ;;  %8672 = vmatprep.mubr.f32.mxu0 %v10767_v30 }
 0x3c2   : > { %8502 = vmatmul.mubr.f32.gmra.mrb[4].mxu1 %v10743_v48  ;;  %8673 = vmatmul.mubr.f32.gmra.mrb[20].mxu0 %v10775_v29 }
 0x3c3   : > { %8504 = vmatprep.mubr.f32.mxu1 %v10762_v63  ;;  %8675 = vmatprep.mubr.f32.mxu0 %v10806_v28 }
 0x3c6   : > { %8505 = vmatmul.mubr.f32.gmra.mrb[6].mxu1 %v10769_v1  ;;  %8676 = vmatmul.mubr.f32.gmra.mrb[22].mxu0 %v10853_v33 }
 0x3c7   : > { %8507 = vmatprep.mubr.f32.mxu1 %v10794_v37  ;;  %8678 = vmatprep.mubr.f32.mxu0 %v10922_v62 }
 0x3ca   : > { %8508 = vmatmul.mubr.f32.gmra.mrb[8].mxu1 %v10851_v16  ;;  %8679 = vmatmul.mubr.f32.gmra.mrb[24].mxu0 %v10958_v41 }
 0x3cb   : > { %8510 = vmatprep.mubr.f32.mxu1 %v10898_v25  ;;  %8681 = vmatprep.mubr.f32.mxu0 %v10968_v35 }
 0x3ce   : > { %8511 = vmatmul.mubr.f32.gmra.mrb[10].mxu1 %v10946_v61  ;;  %8682 = vmatmul.mubr.f32.gmra.mrb[26].mxu0 %v11011_v45 }
 0x3cf   : > { %8513 = vmatprep.mubr.f32.mxu1 %v10960_v4  ;;  %8684 = vmatprep.mubr.f32.mxu0 %v11015_v40 }
 0x3d2   : > { %8514 = vmatmul.mubr.f32.gmra.mrb[12].mxu1 %v10996_v2  ;;  %8685 = vmatmul.mubr.f32.gmra.mrb[28].mxu0 %v12397_v57 }
 0x3d3   : > { %8516 = vmatprep.mubr.f32.mxu1 %v12398_v24  ;;  %8687 = vmatprep.mubr.f32.mxu0 %v12399_v31 }
 0x3d6   : > { %8517 = vmatmul.mubr.f32.gmra.mrb[14].mxu1 %v12400_v23  ;;  %8688 = vmatmul.mubr.f32.gmra.mrb[30].mxu0 %v12401_v59 }
 0x3d7   : > { %8519 = vmatprep.mubr.f32.mxu1 %v12402_v47  ;;  %8694 = vmatprep.mubr.f32.mxu0 %v10679_v8  ;;  %v3813_v8 = vsub.f32 %v11213_v19, %v3812_v44 }
 0x3da   : > { %8520 = vmatmul.mubr.f32.gmra.mrb[16].mxu1 %v12403_v36  ;;  %8695 = vmatmul.mubr.f32.vlgmr.msra.gmra.mrb[16].mxu0 %v10722_v56  ;;  %v3814_v56 = vand.u32 4294901760, %v3813_v8 }
 0x3db   : > { %8526 = vmatprep.mubr.f32.mxu1 %v10677_v54  ;;  %8697 = vmatprep.mubr.f32.mxu0 %v10726_v3  ;;  %v3803_v54 = vsub.f32 %v11208_v53, %v3802_v46  ;;  %v5948_v3 = vld [vmem:[%s12088_s7 + $0x8] sm:$0xff] }
 0x3de   : > { %8527 = vmatmul.mubr.f32.vlgmr.msra.gmra.mrb[2].mxu1 %v10714_v27  ;;  %8698 = vmatmul.mubr.f32.gmra.mrb[18].mxu0 %v10760_v55  ;;  %v3804_v27 = vand.u32 4294901760, %v3803_v54  ;;  %v6001_v55 = vand.u32 4294901760, %v5948_v3 }
 0x3df   : > { %9439 = vmatpush3.bf16.msra.mxu1 %v10935_v5  ;;  %8529 = vmatprep.mubr.f32.mxu1 %v10724_v58  ;;  %v5947_v58 = vld [vmem:[%s12088_s7] sm:$0xff] }
 0x3e0   : > { %8700 = vmatprep.mubr.f32.mxu0 %v10767_v30  ;;  %v4793_v30 = vld [vmem:[%s12087_s6] sm:$0xff] }
 0x3e2   : > { %8530 = vmatmul.mubr.f32.gmra.mrb[4].mxu1 %v10743_v48  ;;  %8701 = vmatmul.mubr.f32.gmra.mrb[20].mxu0 %v10775_v29  ;;  %v5998_v48 = vand.u32 4294901760, %v5947_v58  ;;  %v4844_v29 = vand.u32 4294901760, %v4793_v30 }
 0x3e3   : > { %8532 = vmatprep.mubr.f32.mxu1 %v10762_v63  ;;  %8703 = vmatprep.mubr.f32.mxu0 %v10806_v28 }
 0x3e4   : > { %v11371_v63 = vpack.c.bf16 %v6001_v55, %v5998_v48 }
 0x3e6   : > { %8533 = vmatmul.mubr.f32.gmra.mrb[6].mxu1 %v10769_v1  ;;  %8704 = vmatmul.mubr.f32.gmra.mrb[22].mxu0 %v10853_v33  ;;  %v4794_v1 = vld [vmem:[%s12087_s6 + $0x8] sm:$0xff] }
 0x3e7   : > { %8535 = vmatprep.mubr.f32.mxu1 %v10794_v37  ;;  %8706 = vmatprep.mubr.f32.mxu0 %v10922_v62  ;;  %v11385_v37 = vsub.f32 %v4793_v30, %v4844_v29 }
 0x3e8   : > { %9415 = vmatprep.subr.bf16.mxu0 %v11371_v63 }
 0x3e9   : > { %9417 = vmatpush3.bf16.msra.mxu0 %v11371_v63  ;;  %v12200_v5 = vand.u32 4294901760, %v11385_v37 }
 0x3ea   : > { %8536 = vmatmul.mubr.f32.gmra.mrb[8].mxu1 %v10851_v16  ;;  %8707 = vmatmul.mubr.f32.gmra.mrb[24].mxu0 %v10958_v41  ;;  %v11399_v41 = vsub.f32 %v5948_v3, %v6001_v55 }
 0x3eb   : > { %8538 = vmatprep.mubr.f32.mxu1 %v10898_v25  ;;  %8709 = vmatprep.mubr.f32.mxu0 %v10968_v35  ;;  %v4847_v25 = vand.u32 4294901760, %v4794_v1  ;;  %v5074_v33 = vsub.f32 %v11385_v37, %v12200_v5 }
 0x3ed   : > { %v11381_v35 = vpack.c.bf16 %v4847_v25, %v4844_v29  ;;  %v11387_v28 = vsub.f32 %v4794_v1, %v4847_v25 }
 0x3ee   : > { %8539 = vmatmul.mubr.f32.gmra.mrb[10].mxu1 %v10946_v61  ;;  %8710 = vmatmul.mubr.f32.gmra.mrb[26].mxu0 %v11011_v45  ;;  %v11397_v61 = vsub.f32 %v5947_v58, %v5998_v48  ;;  %v12196_v45 = vand.u32 4294901760, %v11399_v41 }
 0x3ef   : > { %8541 = vmatprep.mubr.f32.mxu1 %v10960_v4  ;;  %8712 = vmatprep.mubr.f32.mxu0 %v11015_v40  ;;  %v12198_v16 = vand.u32 4294901760, %v11387_v28  ;;  %v5075_v4 = vand.u32 4294901760, %v5074_v33  ;;  %v11417_v13 = vpack.c.bf16 %v11387_v28, %v11385_v37 }
 0x3f0   : > { %9391 = vmatprep.subr.bf16.mxu1 %v11381_v35  ;;  %v6235_v11 = vsub.f32 %v11399_v41, %v12196_v45  ;;  %v11421_v14 = vpack.c.bf16 %v11399_v41, %v11397_v61 }
 0x3f1   : > { %v5081_v62 = vsub.f32 %v11387_v28, %v12198_v16 }
 0x3f2   : > { %8542 = vmatmul.mubr.f32.gmra.mrb[12].mxu1 %v10996_v2  ;;  %8713 = vmatmul.mubr.f32.gmra.mrb[28].mxu0 %v12397_v57  ;;  %v12197_v2 = vand.u32 4294901760, %v11397_v61  ;;  %v6236_v43 = vand.u32 4294901760, %v6235_v11 }
 0x3f3   : > { %8544 = vmatprep.mubr.f32.mxu1 %v12398_v24  ;;  %8715 = vmatprep.mubr.f32.mxu0 %v12399_v31  ;;  %v5082_v40 = vand.u32 4294901760, %v5081_v62 }
 0x3f4   : > { %v6228_v53 = vsub.f32 %v11397_v61, %v12197_v2 }
 0x3f5   : > { %v11403_v19 = vpack.c.bf16 %v5082_v40, %v5075_v4 }
 0x3f6   : > { %8545 = vmatmul.mubr.f32.gmra.mrb[14].mxu1 %v12400_v23  ;;  %8716 = vmatmul.mubr.f32.gmra.mrb[30].mxu0 %v12401_v59  ;;  %v6229_v49 = vand.u32 4294901760, %v6228_v53 }
 0x3f7   : > { %8547 = vmatprep.mubr.f32.mxu1 %v12402_v47 }
 0x3f8   : > { %v11412_v7 = vpack.c.bf16 %v6236_v43, %v6229_v49 }
 0x3fa   : > { %8548 = vmatmul.mubr.f32.gmra.mrb[16].mxu1 %v12403_v36  ;;  %9419 = vmatprep.subr.bf16.mxu0 %v11412_v7 }
 0x3fb   : > { %8575 = vmatprep.mubr.f32.mxu1 %v3804_v27 }
 0x3fe   : > { %8576 = vmatmul.mubr.f32.vlgmr.msra.gmra.mrb[18].mxu1 %v3814_v56 }
 0x3ff   : > { %9393 = vmatpush3.bf16.msra.mxu1 %v11381_v35 }
 0x400   : > { %9395 = vmatprep.subr.bf16.mxu1 %v11403_v19 }
 0x4ad   : > { %v8696_v22 = vpop.f32.mrb[16].mxu0 }
 0x4ae   : > { %v7231_v10 = vmul.f32 -1.442695, %v8696_v22  ;;  %v4603_v52 = vpop.f32.mrb[17].mxu0 }
 0x4af   : > { %v7230_v51 = vmul.f32 -1.442695, %v4603_v52 }
 0x4b0   : > { %9862 = vpow2.f32 %v7231_v10 }
 0x4b1   : > { %9864 = vpow2.f32 %v7230_v51  ;;  %v8528_v50 = vpop.f32.mrb[2].mxu1  ;;  %v8699_v21 = vpop.f32.mrb[18].mxu0 }
 0x4b2   : > { %v7215_v32 = vmul.f32 -1.442695, %v8528_v50  ;;  %v7233_v34 = vmul.f32 -1.442695, %v8699_v21  ;;  %v3339_v38 = vpop.f32.mrb[3].mxu1  ;;  %v4615_v9 = vpop.f32.mrb[19].mxu0 }
 0x4b3   : > { %v7214_v20 = vmul.f32 -1.442695, %v3339_v38  ;;  %v7232_v12 = vmul.f32 -1.442695, %v4615_v9 }
 0x4b4   : > { %9866 = vpow2.f32 %v7215_v32 }
 0x4b5   : > { %9868 = vpow2.f32 %v7233_v34  ;;  %v8531_v17 = vpop.f32.mrb[4].mxu1  ;;  %v8702_v60 = vpop.f32.mrb[20].mxu0 }
 0x4b6   : > { %9870 = vpow2.f32 %v7214_v20  ;;  %v7217_v15 = vmul.f32 -1.442695, %v8531_v17  ;;  %v7235_v46 = vmul.f32 -1.442695, %v8702_v60  ;;  %v3351_v26 = vpop.f32.mrb[5].mxu1  ;;  %v4627_v6 = vpop.f32.mrb[21].mxu0 }
 0x4b7   : > { %9872 = vpow2.f32 %v7232_v12  ;;  %v7216_v44 = vmul.f32 -1.442695, %v3351_v26  ;;  %v7234_v18 = vmul.f32 -1.442695, %v4627_v6 }
 0x4b8   : > { %9874 = vpow2.f32 %v7217_v15 }
 0x4b9   : > { %9876 = vpow2.f32 %v7235_v46  ;;  %v8534_v39 = vpop.f32.mrb[6].mxu1  ;;  %v8705_v0 = vpop.f32.mrb[22].mxu0 }
 0x4ba   : > { %v9863_v42 = vpop.eup %9862  ;;  %9878 = vpow2.f32 %v7216_v44  ;;  %v7219_v57 = vmul.f32 -1.442695, %v8534_v39  ;;  %v3363_v24 = vpop.f32.mrb[7].mxu1  ;;  %v7237_v47 = vmul.f32 -1.442695, %v8705_v0 }
 0x4bb   : > { %v4639_v31 = vpop.f32.mrb[23].mxu0  ;;  %v9865_v23 = vpop.eup %9864  ;;  %v4746_v59 = vadd.f32 1.0, %v9863_v42  ;;  %9880 = vpow2.f32 %v7234_v18  ;;  %v7218_v54 = vmul.f32 -1.442695, %v3363_v24 }
 0x4bc   : > { %v4745_v36 = vadd.f32 1.0, %v9865_v23  ;;  %9882 = vpow2.f32 %v7219_v57  ;;  %v7236_v43 = vmul.f32 -1.442695, %v4639_v31 }
 0x4bd   : > { %9884 = vrcp.f32 %v4746_v59  ;;  %v8537_v8 = vpop.f32.mrb[8].mxu1  ;;  %v8708_v27 = vpop.f32.mrb[24].mxu0 }
 0x4be   : > { %v9867_v56 = vpop.eup %9866  ;;  %9886 = vrcp.f32 %v4745_v36  ;;  %v3375_v58 = vpop.f32.mrb[9].mxu1  ;;  %v7221_v22 = vmul.f32 -1.442695, %v8537_v8  ;;  %v7239_v50 = vmul.f32 -1.442695, %v8708_v27 }
 0x4bf   : > { %v4651_v3 = vpop.f32.mrb[25].mxu0  ;;  %v9869_v48 = vpop.eup %9868  ;;  %v3482_v55 = vadd.f32 1.0, %v9867_v56  ;;  %9888 = vpow2.f32 %v7237_v47  ;;  %v7220_v21 = vmul.f32 -1.442695, %v3375_v58 }
 0x4c0   : > { %v9871_v30 = vpop.eup %9870  ;;  %v4748_v1 = vadd.f32 1.0, %v9869_v48  ;;  %9890 = vpow2.f32 %v7218_v54  ;;  %v7238_v38 = vmul.f32 -1.442695, %v4651_v3 }
 0x4c1   : > { %v9873_v29 = vpop.eup %9872  ;;  %9892 = vrcp.f32 %v3482_v55  ;;  %v3481_v25 = vadd.f32 1.0, %v9871_v30  ;;  %v8540_v33 = vpop.f32.mrb[10].mxu1 }
 0x4c2   : > { %v8711_v62 = vpop.f32.mrb[26].mxu0  ;;  %v9875_v4 = vpop.eup %9874  ;;  %9894 = vrcp.f32 %v4748_v1  ;;  %v4747_v40 = vadd.f32 1.0, %v9873_v29  ;;  %v7223_v60 = vmul.f32 -1.442695, %v8540_v33 }
 0x4c3   : > { %v3387_v53 = vpop.f32.mrb[11].mxu1  ;;  %v9877_v11 = vpop.eup %9876  ;;  %9896 = vrcp.f32 %v3481_v25  ;;  %v3484_v49 = vadd.f32 1.0, %v9875_v4  ;;  %v11423_v15 = vmul.f32 -1.442695, %v8711_v62 }
 0x4c4   : > { %v4663_v10 = vpop.f32.mrb[27].mxu0  ;;  %v9879_v52 = vpop.eup %9878  ;;  %9898 = vrcp.f32 %v4747_v40  ;;  %v4750_v51 = vadd.f32 1.0, %v9877_v11  ;;  %v11425_v44 = vmul.f32 -1.442695, %v3387_v53 }
 0x4c5   : > { %v9881_v32 = vpop.eup %9880  ;;  %9900 = vrcp.f32 %v3484_v49  ;;  %v3483_v34 = vadd.f32 1.0, %v9879_v52  ;;  %v8543_v9 = vpop.f32.mrb[12].mxu1  ;;  %v11427_v18 = vmul.f32 -1.442695, %v4663_v10 }
 0x4c6   : > { %v8714_v20 = vpop.f32.mrb[28].mxu0  ;;  %v9883_v12 = vpop.eup %9882  ;;  %9902 = vrcp.f32 %v4750_v51  ;;  %v4749_v17 = vadd.f32 1.0, %v9881_v32  ;;  %v11430_v57 = vmul.f32 -1.442695, %v8543_v9 }
 0x4c7   : > { %v3399_v46 = vpop.f32.mrb[13].mxu1  ;;  %v9885_v26 = vpop.eup %9884  ;;  %9904 = vrcp.f32 %v3483_v34  ;;  %v3486_v6 = vadd.f32 1.0, %v9883_v12  ;;  %v11432_v24 = vmul.f32 -1.442695, %v8714_v20 }
 0x4c8   : > { %v4675_v39 = vpop.f32.mrb[29].mxu0  ;;  %v9887_v0 = vpop.eup %9886  ;;  %v5953_v42 = vsel %vm2280_vm1, %v9885_v26, 0  ;;  %9906 = vrcp.f32 %v4749_v17  ;;  %v11436_v59 = vmul.f32 -1.442695, %v3399_v46 }
 0x4c9   : > { %v9889_v31 = vpop.eup %9888  ;;  %v11434_v23 = vand.u32 4294901760, %v5953_v42  ;;  %9908 = vrcp.f32 %v3486_v6  ;;  %v8546_v47 = vpop.f32.mrb[14].mxu1  ;;  %v5950_v54 = vsel %vm2280_vm1, %v9887_v0, 0  ;;  %v11439_v56 = vmul.f32 -1.442695, %v4675_v39 }
 0x4ca   : > { %v8717_v36 = vpop.f32.mrb[30].mxu0  ;;  %v9891_v8 = vpop.eup %9890  ;;  %v4752_v27 = vadd.f32 1.0, %v9889_v31  ;;  %9910 = vpow2.f32 %v7236_v43  ;;  %v11441_v48 = vand.u32 4294901760, %v5950_v54  ;;  %v11446_v29 = vmul.f32 -1.442695, %v8546_v47 }
 0x4cb   : > { %v3411_v58 = vpop.f32.mrb[15].mxu1  ;;  %v4687_v3 = vpop.f32.mrb[31].mxu0  ;;  %v11444_v30 = vsub.f32 %v5953_v42, %v11434_v23  ;;  %v3485_v1 = vadd.f32 1.0, %v9891_v8  ;;  %9912 = vpow2.f32 %v7221_v22 }
 0x4cc   : > { %v9893_v55 = vpop.eup %9892  ;;  %9914 = vrcp.f32 %v4752_v27  ;;  %v11448_v33 = vmul.f32 -1.442695, %v3411_v58  ;;  %v11451_v62 = vsub.f32 %v5950_v54, %v11441_v48 }
 0x4cd   : > { %v9895_v25 = vpop.eup %9894  ;;  %v4799_v4 = vsel %vm2280_vm1, %v9893_v55, 0  ;;  %9916 = vrcp.f32 %v3485_v1  ;;  %v8549_v53 = vpop.f32.mrb[16].mxu1  ;;  %v12189_v11 = vand.u32 4294901760, %v11444_v30 }
 0x4ce   : > { %v9897_v40 = vpop.eup %9896  ;;  %v11455_v49 = vand.u32 4294901760, %v4799_v4  ;;  %v5959_v43 = vsel %vm2280_vm1, %v9895_v25, 0  ;;  %9918 = vpow2.f32 %v7239_v50  ;;  %v11458_v10 = vmul.f32 -1.442695, %v8549_v53  ;;  %v3423_v52 = vpop.f32.mrb[17].mxu1 }
 0x4cf   : > { %v9899_v22 = vpop.eup %9898  ;;  %v12193_v51 = vand.u32 4294901760, %v11451_v62  ;;  %v4796_v32 = vsel %vm2280_vm1, %v9897_v40, 0  ;;  %9920 = vpow2.f32 %v7220_v21  ;;  %v11464_v9 = vmul.f32 -1.442695, %v3423_v52 }
 0x4d0   : > { %v11462_v34 = vpop.eup %9900  ;;  %v6077_v20 = vsub.f32 %v11444_v30, %v12189_v11  ;;  %v11469_v12 = vand.u32 4294901760, %v4796_v32  ;;  %9922 = vpow2.f32 %v7238_v38  ;;  %v5956_v46 = vsel %vm2280_vm1, %v9899_v22, 0 }
 0x4d1   : > { %v11471_v17 = vpop.eup %9902  ;;  %v6067_v50 = vsub.f32 %v11451_v62, %v12193_v51  ;;  %v11478_v26 = vsub.f32 %v4799_v4, %v11455_v49  ;;  %9924 = vpow2.f32 %v7223_v60  ;;  %v8577_v6 = vpop.f32.mrb[18].mxu1  ;;  %v11483_v42 = vand.u32 4294901760, %v5956_v46 }
 0x4d2   : > { %v9905_v21 = vpop.eup %9904  ;;  %v6078_v39 = vand.u32 4294901760, %v6077_v20  ;;  %v11481_v0 = vsub.f32 %v4796_v32, %v11469_v12  ;;  %9926 = vpow2.f32 %v11423_v15  ;;  %v9442_v38 = vadd.f32 %v8717_v36, %v8577_v6  ;;  %v3806_v47 = vpop.f32.mrb[19].mxu1 }
 0x4d3   : > { %v9907_v31 = vpop.eup %9906  ;;  %v6068_v54 = vand.u32 4294901760, %v6067_v50  ;;  %v12192_v8 = vand.u32 4294901760, %v11478_v26  ;;  %9928 = vpow2.f32 %v11425_v44  ;;  %v9443_v60 = vadd.f32 %v4687_v3, %v3806_v47 }
 0x4d4   : > { %v11487_v27 = vpop.eup %9908  ;;  %v12195_v58 = vand.u32 4294901760, %v11481_v0  ;;  %v11492_v55 = vsub.f32 %v5956_v46, %v11483_v42  ;;  %9930 = vpow2.f32 %v11427_v18  ;;  %v11495_v25 = vmul.f32 -1.442695, %v9442_v38 }
 0x4d5   : > { %v9911_v1 = vpop.eup %9910  ;;  %8890 = vmatprep.mubr.f32.mxu0 %v6068_v54  ;;  %v4923_v15 = vsub.f32 %v11478_v26, %v12192_v8  ;;  %v11500_v36 = vand.u32 4294901760, %v5959_v43  ;;  %9932 = vpow2.f32 %v11430_v57  ;;  %v11503_v3 = vmul.f32 -1.442695, %v9443_v60 }
 0x4d6   : > { %v9913_v4 = vpop.eup %9912  ;;  %v4751_v44 = vadd.f32 1.0, %v9911_v1  ;;  %8891 = vmatmul.mubr.f32.vlgmr.msra.gmra.mrb[32].mxu0 %v6078_v39  ;;  %v4913_v18 = vsub.f32 %v11481_v0, %v12195_v58  ;;  %9934 = vpow2.f32 %v11432_v24  ;;  %v12187_v22 = vand.u32 4294901760, %v11492_v55 }
 0x4d7   : > { %v11508_v40 = vpop.eup %9914  ;;  %v3488_v53 = vadd.f32 1.0, %v9913_v4  ;;  %v4924_v52 = vand.u32 4294901760, %v4923_v15  ;;  %9421 = vmatpush3.bf16.msra.mxu0 %v11412_v7  ;;  %v11516_v20 = vsub.f32 %v5959_v43, %v11500_v36  ;;  %v4802_v50 = vsel %vm2280_vm1, %v9905_v21, 0 }
 0x4d8   : > { %v11513_v32 = vpop.eup %9916  ;;  %9936 = vrcp.f32 %v4751_v44  ;;  %v4914_v57 = vand.u32 4294901760, %v4913_v18  ;;  %9423 = vmatprep.subr.bf16.mxu0 %v11421_v14  ;;  %v6087_v24 = vsub.f32 %v11492_v55, %v12187_v22  ;;  %v11523_v6 = vand.u32 4294901760, %v4802_v50 }
 0x4d9   : > { %12404 = vst [vmem:[#allocation3_spill] sm:$0xff] %v11516_v20  ;;  %v9919_v46 = vpop.eup %9918  ;;  %9938 = vrcp.f32 %v3488_v53  ;;  %v5962_v7 = vsel %vm2280_vm1, %v9907_v31, 0  ;;  %v12184_v43 = vand.u32 4294901760, %v11516_v20  ;;  %v4805_v53 = vsel %vm2280_vm1, %v11462_v34, 0 }
 0x4da   : > { %v9921_v39 = vpop.eup %9920  ;;  %v4754_v38 = vadd.f32 1.0, %v9919_v46  ;;  %9940 = vpow2.f32 %v11436_v59  ;;  %8722 = vmatprep.mubr.f32.mxu1 %v4914_v57  ;;  %v11528_v21 = vand.u32 4294901760, %v5962_v7  ;;  %v6088_v60 = vand.u32 4294901760, %v6087_v24 }
 0x4db   : > { %v9923_v47 = vpop.eup %9922  ;;  %v3487_v54 = vadd.f32 1.0, %v9921_v39  ;;  %9942 = vpow2.f32 %v11439_v56  ;;  %8723 = vmatmul.mubr.f32.vlgmr.msra.gmra.mrb[20].mxu1 %v4924_v52  ;;  %v11532_v1 = vsub.f32 %v4802_v50, %v11523_v6  ;;  %v6097_v59 = vsub.f32 %v11516_v20, %v12184_v43 }
 0x4dc   : > { %v9925_v15 = vpop.eup %9924  ;;  %9944 = vrcp.f32 %v4754_v38  ;;  %v4753_v31 = vadd.f32 1.0, %v9923_v47  ;;  %v11538_v4 = vsub.f32 %v5962_v7, %v11528_v21  ;;  %9397 = vmatpush3.bf16.msra.mxu1 %v11403_v19  ;;  %8893 = vmatprep.mubr.f32.mxu0 %v6088_v60  ;;  %v11549_v39 = vand.u32 4294901760, %v4805_v53 }
 0x4dd   : > { %v9927_v44 = vpop.eup %9926  ;;  %9946 = vrcp.f32 %v3487_v54  ;;  %v3490_v56 = vadd.f32 1.0, %v9925_v15  ;;  %v12191_v18 = vand.u32 4294901760, %v11532_v1  ;;  %9399 = vmatprep.subr.bf16.mxu1 %v11417_v13  ;;  %v6098_v50 = vand.u32 4294901760, %v6097_v59 }
 0x4de   : > { %12405 = vst [vmem:[#allocation5_spill] sm:$0xff] %v11538_v4  ;;  %v9929_v52 = vpop.eup %9928  ;;  %9948 = vrcp.f32 %v4753_v31  ;;  %v4756_v57 = vadd.f32 1.0, %v9927_v44  ;;  %v12183_v46 = vand.u32 4294901760, %v11538_v4  ;;  %v5965_v54 = vsel %vm2280_vm1, %v11471_v17, 0 }
 0x4df   : > { %v9931_v24 = vpop.eup %9930  ;;  %9950 = vrcp.f32 %v3490_v56  ;;  %v3489_v19 = vadd.f32 1.0, %v9929_v52  ;;  %v4933_v7 = vsub.f32 %v11532_v1, %v12191_v18  ;;  %8894 = vmatmul.mubr.f32.gmra.mrb[34].mxu0 %v6098_v50  ;;  %v11557_v59 = vsub.f32 %v4805_v53, %v11549_v39 }
 0x4e0   : > { %v9933_v38 = vpop.eup %9932  ;;  %9952 = vrcp.f32 %v4756_v57  ;;  %v4755_v34 = vadd.f32 1.0, %v9931_v24  ;;  %v6107_v47 = vsub.f32 %v11538_v4, %v12183_v46  ;;  %v11559_v57 = vand.u32 4294901760, %v5965_v54 }
 0x4e1   : > { %v9935_v60 = vpop.eup %9934  ;;  %9954 = vrcp.f32 %v3489_v19  ;;  %v3492_v15 = vadd.f32 1.0, %v9933_v38  ;;  %v4934_v31 = vand.u32 4294901760, %v4933_v7  ;;  %12406 = vst [vmem:[#allocation2_spill] sm:$0xff] %v11557_v59  ;;  %v12186_v24 = vand.u32 4294901760, %v11557_v59 }
 0x4e2   : > { %v9937_v44 = vpop.eup %9936  ;;  %9956 = vrcp.f32 %v4755_v34  ;;  %v4758_v56 = vadd.f32 1.0, %v9935_v60  ;;  %v6108_v52 = vand.u32 4294901760, %v6107_v47  ;;  %v4808_v17 = vsel %vm2280_vm1, %v11513_v32, 0 }
 0x4e3   : > { %v9939_v50 = vpop.eup %9938  ;;  %9958 = vrcp.f32 %v3492_v15  ;;  %8725 = vmatprep.mubr.f32.mxu1 %v4934_v31  ;;  %v5968_v19 = vsel %vm2280_vm1, %v9937_v44, 0  ;;  %v11566_v53 = vsub.f32 %v5965_v54, %v11559_v57  ;;  %v11568_v38 = vand.u32 4294901760, %v4808_v17 }
 0x4e4   : > { %v9941_v7 = vpop.eup %9940  ;;  %9960 = vrcp.f32 %v4758_v56  ;;  %8896 = vmatprep.mubr.f32.mxu0 %v6108_v52  ;;  %v11570_v34 = vand.u32 4294901760, %v5968_v19  ;;  %v4943_v32 = vsub.f32 %v11557_v59, %v12186_v24  ;;  %v4811_v15 = vsel %vm2280_vm1, %v11487_v27, 0 }
 0x4e5   : > { %12407 = vst [vmem:[#allocation20_spill] sm:$0xff] %v11566_v53  ;;  %v9943_v47 = vpop.eup %9942  ;;  %v3491_v60 = vadd.f32 1.0, %v9941_v7  ;;  %9962 = vpow2.f32 %v11446_v29  ;;  %v12185_v54 = vand.u32 4294901760, %v11566_v53  ;;  %v11581_v56 = vsub.f32 %v4808_v17, %v11568_v38 }
 0x4e6   : > { %v9945_v31 = vpop.eup %9944  ;;  %v4757_v44 = vadd.f32 1.0, %v9943_v47  ;;  %9964 = vpow2.f32 %v11448_v33  ;;  %v4944_v7 = vand.u32 4294901760, %v4943_v32  ;;  %v11584_v29 = vsub.f32 %v5968_v19, %v11570_v34 }
 0x4e7   : > { %12408 = vst [vmem:[#allocation7_spill] sm:$0xff] %v11581_v56  ;;  %v9947_v52 = vpop.eup %9946  ;;  %9966 = vrcp.f32 %v3491_v60  ;;  %v11586_v46 = vand.u32 4294901760, %v4811_v15  ;;  %v6117_v27 = vsub.f32 %v11566_v53, %v12185_v54  ;;  %v12188_v33 = vand.u32 4294901760, %v11581_v56 }
 0x4e8   : > { %12409 = vst [vmem:[#allocation4_spill] sm:$0xff] %v11584_v29  ;;  %v9949_v43 = vpop.eup %9948  ;;  %9968 = vrcp.f32 %v4757_v44  ;;  %v5971_v17 = vsel %vm2280_vm1, %v11508_v40, 0  ;;  %8726 = vmatmul.mubr.f32.gmra.mrb[22].mxu1 %v4944_v7  ;;  %v12190_v19 = vand.u32 4294901760, %v11584_v29  ;;  %v4814_v24 = vsel %vm2280_vm1, %v9947_v52, 0 }
 0x4e9   : > { %v11594_v47 = vpop.eup %9950  ;;  %9970 = vpow2.f32 %v11458_v10  ;;  %v11599_v60 = vsub.f32 %v4811_v15, %v11586_v46  ;;  %v11601_v32 = vand.u32 4294901760, %v5971_v17  ;;  %v6118_v54 = vand.u32 4294901760, %v6117_v27 }
 0x4ea   : > { %v11603_v44 = vpop.eup %9952  ;;  %9972 = vpow2.f32 %v11464_v9  ;;  %v4953_v40 = vsub.f32 %v11581_v56, %v12188_v33  ;;  %v6127_v15 = vsub.f32 %v11584_v29, %v12190_v19  ;;  %v11619_v33 = vand.u32 4294901760, %v4814_v24 }
 0x4eb   : > { %12410 = vst [vmem:[#allocation9_spill] sm:$0xff] %v11599_v60  ;;  %v9955_v10 = vpop.eup %9954  ;;  %9974 = vpow2.f32 %v11495_v25  ;;  %v12194_v7 = vand.u32 4294901760, %v11599_v60  ;;  %v11616_v22 = vsub.f32 %v5971_v17, %v11601_v32  ;;  %8897 = vmatmul.mubr.f32.gmra.mrb[36].mxu0 %v6118_v54  ;;  %v5974_v52 = vsel %vm2280_vm1, %v9949_v43, 0 }
 0x4ec   : > { %v9957_v9 = vpop.eup %9956  ;;  %9976 = vpow2.f32 %v11503_v3  ;;  %v4954_v27 = vand.u32 4294901760, %v4953_v40  ;;  %v6128_v25 = vand.u32 4294901760, %v6127_v15  ;;  %v11628_v17 = vand.u32 4294901760, %v5974_v52 }
 0x4ed   : > { %12411 = vst [vmem:[#allocation6_spill] sm:$0xff] %v11616_v22  ;;  %v11622_v11 = vpop.eup %9958  ;;  %v4963_v19 = vsub.f32 %v11599_v60, %v12194_v7  ;;  %v12199_v18 = vand.u32 4294901760, %v11616_v22  ;;  %v11633_v3 = vsub.f32 %v4814_v24, %v11619_v33  ;;  %v4817_v54 = vsel %vm2280_vm1, %v9939_v50, 0 }
 0x4ee   : > { %v11630_v8 = vpop.eup %9960  ;;  %8728 = vmatprep.mubr.f32.mxu1 %v4954_v27  ;;  %v5977_v43 = vsel %vm2280_vm1, %v9945_v31, 0  ;;  %v4820_v40 = vsel %vm2280_vm1, %v9955_v10, 0  ;;  %8899 = vmatprep.mubr.f32.mxu0 %v6128_v25  ;;  %v11642_v58 = vsub.f32 %v5974_v52, %v11628_v17  ;;  %v11644_v27 = vand.u32 4294901760, %v4817_v54 }
 0x4ef   : > { %12412 = vst [vmem:[#allocation11_spill] sm:$0xff] %v11633_v3  ;;  %v9963_v15 = vpop.eup %9962  ;;  %v4964_v51 = vand.u32 4294901760, %v4963_v19  ;;  %v6137_v7 = vsub.f32 %v11616_v22, %v12199_v18  ;;  %v12205_v50 = vand.u32 4294901760, %v11633_v3  ;;  %v11647_v2 = vand.u32 4294901760, %v5977_v43 }
 0x4f0   : > { %12413 = vst [vmem:[#allocation8_spill] sm:$0xff] %v11642_v58  ;;  %v9965_v24 = vpop.eup %9964  ;;  %v3494_v45 = vadd.f32 1.0, %v9963_v15  ;;  %v11649_v31 = vand.u32 4294901760, %v4820_v40  ;;  %v12212_v16 = vand.u32 4294901760, %v11642_v58  ;;  %v11653_v18 = vsub.f32 %v4817_v54, %v11644_v27 }
 0x4f1   : > { %v9967_v10 = vpop.eup %9966  ;;  %v3493_v25 = vadd.f32 1.0, %v9965_v24  ;;  %8729 = vmatmul.mubr.f32.gmra.mrb[24].mxu1 %v4964_v51  ;;  %v6138_v19 = vand.u32 4294901760, %v6137_v7  ;;  %v4973_v15 = vsub.f32 %v11633_v3, %v12205_v50  ;;  %v11659_v5 = vsub.f32 %v5977_v43, %v11647_v2 }
 0x4f2   : > { %12414 = vst [vmem:[#allocation13_spill] sm:$0xff] %v11653_v18  ;;  %v9969_v52 = vpop.eup %9968  ;;  %9978 = vrcp.f32 %v3494_v45  ;;  %v11662_v22 = vsub.f32 %v4820_v40, %v11649_v31  ;;  %v6147_v51 = vsub.f32 %v11642_v58, %v12212_v16  ;;  %v12215_v7 = vand.u32 4294901760, %v11653_v18 }
 0x4f3   : > { %12415 = vst [vmem:[#allocation10_spill] sm:$0xff] %v11659_v5  ;;  %v9971_v24 = vpop.eup %9970  ;;  %9980 = vrcp.f32 %v3493_v25  ;;  %8900 = vmatmul.mubr.f32.gmra.mrb[38].mxu0 %v6138_v19  ;;  %v5980_v45 = vsel %vm2280_vm1, %v9957_v9, 0  ;;  %v4974_v50 = vand.u32 4294901760, %v4973_v15  ;;  %v12216_v43 = vand.u32 4294901760, %v11659_v5 }
 0x4f4   : > { %12416 = vst [vmem:[#allocation15_spill] sm:$0xff] %v11662_v22  ;;  %v9973_v54 = vpop.eup %9972  ;;  %v3496_v29 = vadd.f32 1.0, %v9971_v24  ;;  %v12218_v53 = vand.u32 4294901760, %v11662_v22  ;;  %v6148_v60 = vand.u32 4294901760, %v6147_v51  ;;  %v4983_v25 = vsub.f32 %v11653_v18, %v12215_v7 }
 0x4f5   : > { %v9975_v40 = vpop.eup %9974  ;;  %v3495_v3 = vadd.f32 1.0, %v9973_v54  ;;  %v11674_v19 = vand.u32 4294901760, %v5980_v45  ;;  %8731 = vmatprep.mubr.f32.mxu1 %v4974_v50  ;;  %v6157_v9 = vsub.f32 %v11659_v5, %v12216_v43  ;;  %v4823_v50 = vsel %vm2280_vm1, %v11594_v47, 0 }
 0x4f6   : > { %v9977_v16 = vpop.eup %9976  ;;  %9982 = vrcp.f32 %v3496_v29  ;;  %v4760_v58 = vadd.f32 1.0, %v9975_v40  ;;  %v4993_v15 = vsub.f32 %v11662_v22, %v12218_v53  ;;  %8902 = vmatprep.mubr.f32.mxu0 %v6148_v60  ;;  %v4984_v51 = vand.u32 4294901760, %v4983_v25 }
 0x4f7   : > { %9984 = vrcp.f32 %v3495_v3  ;;  %v4759_v24 = vadd.f32 1.0, %v9977_v16  ;;  %v11683_v54 = vsub.f32 %v5980_v45, %v11674_v19  ;;  %v6158_v7 = vand.u32 4294901760, %v6157_v9 }
 0x4f8   : > { %9986 = vrcp.f32 %v4760_v58  ;;  %v4994_v29 = vand.u32 4294901760, %v4993_v15  ;;  %8732 = vmatmul.mubr.f32.gmra.mrb[26].mxu1 %v4984_v51  ;;  %v11688_v43 = vand.u32 4294901760, %v4823_v50  ;;  %v5983_v16 = vsel %vm2280_vm1, %v11603_v44, 0 }
 0x4f9   : > { %12417 = vst [vmem:[#allocation12_spill] sm:$0xff] %v11683_v54  ;;  %9988 = vrcp.f32 %v4759_v24  ;;  %v12217_v40 = vand.u32 4294901760, %v11683_v54  ;;  %8903 = vmatmul.mubr.f32.gmra.mrb[40].mxu0 %v6158_v7  ;;  %v11692_v60 = vand.u32 4294901760, %v5983_v16  ;;  %v4826_v58 = vsel %vm2280_vm1, %v9967_v10, 0 }
 0x4fa   : > { %8734 = vmatprep.mubr.f32.mxu1 %v4994_v29  ;;  %v5986_v3 = vsel %vm2280_vm1, %v9969_v52, 0  ;;  %v4829_v47 = vsel %vm2280_vm1, %v11622_v11, 0  ;;  %v11702_v25 = vsub.f32 %v4823_v50, %v11688_v43  ;;  %v11704_v9 = vand.u32 4294901760, %v4826_v58 }
 0x4fb   : > { %12418 = vst [vmem:[#allocation17_spill] sm:$0xff] %v11692_v60  ;;  %v6167_v45 = vsub.f32 %v11683_v54, %v12217_v40  ;;  %v11706_v44 = vand.u32 4294901760, %v5986_v3  ;;  %v11709_v15 = vsub.f32 %v5983_v16, %v11692_v60  ;;  %v11711_v10 = vand.u32 4294901760, %v4829_v47 }
 0x4fc   : > { %12419 = vst [vmem:[#allocation14_spill] sm:$0xff] %v11702_v25  ;;  %v9979_v7 = vpop.eup %9978  ;;  %v5989_v11 = vsel %vm2280_vm1, %v11630_v8, 0  ;;  %v12227_v51 = vand.u32 4294901760, %v11702_v25  ;;  %v11717_v29 = vsub.f32 %v4826_v58, %v11704_v9 }
 0x4fd   : > { %12420 = vst [vmem:[#allocation19_spill] sm:$0xff] %v11706_v44  ;;  %12421 = vst [vmem:[#allocation16_spill] sm:$0xff] %v11709_v15  ;;  %v9981_v52 = vpop.eup %9980  ;;  %v6168_v24 = vand.u32 4294901760, %v6167_v45  ;;  %v11720_v50 = vsub.f32 %v5986_v3, %v11706_v44  ;;  %v12234_v40 = vand.u32 4294901760, %v11709_v15  ;;  %v11724_v16 = vsub.f32 %v4829_v47, %v11711_v10 }
 0x4fe   : > { %12422 = vst [vmem:[#allocation18_spill] sm:$0xff] %v11717_v29  ;;  %v11726_v53 = vand.u32 4294901760, %v5989_v11  ;;  %v4832_v54 = vsel %vm2280_vm1, %v9981_v52, 0  ;;  %v5003_v8 = vsub.f32 %v11702_v25, %v12227_v51  ;;  %v12239_v58 = vand.u32 4294901760, %v11717_v29 }
 0x4ff   : > { %12423 = vst [vmem:[#allocation23_spill] sm:$0xff] %v11720_v50  ;;  %8905 = vmatprep.mubr.f32.mxu0 %v6168_v24  ;;  %v11734_v3 = vand.u32 4294901760, %v4832_v54  ;;  %v6177_v47 = vsub.f32 %v11709_v15, %v12234_v40  ;;  %v4835_v24 = vsel %vm2280_vm1, %v9979_v7, 0  ;;  %v12427_v25 = vand.u32 4294901760, %v11720_v50 }
 0x500   : > { %12424 = vst [vmem:[#allocation21_spill] sm:$0xff] %v11726_v53  ;;  %v9983_v5 = vpop.eup %9982  ;;  %v11741_v52 = vsub.f32 %v5989_v11, %v11726_v53  ;;  %v5004_v51 = vand.u32 4294901760, %v5003_v8  ;;  %v5013_v45 = vsub.f32 %v11717_v29, %v12239_v58  ;;  %v12428_v11 = vand.u32 4294901760, %v11724_v16 }
 0x501   : > { %12425 = vst [vmem:[#allocation26_spill] sm:$0xff] %v11734_v3  ;;  %v9985_v18 = vpop.eup %9984  ;;  %v6187_v4 = vsub.f32 %v11720_v50, %v12427_v25  ;;  %v11751_v20 = vsub.f32 %v4832_v54, %v11734_v3  ;;  %v6178_v22 = vand.u32 4294901760, %v6177_v47  ;;  %v11757_v8 = vand.u32 4294901760, %v4835_v24 }
 0x502   : > { %12426 = vst [vmem:[#allocation22_spill] sm:$0xff] %v11741_v52  ;;  %v9987_v40 = vpop.eup %9986  ;;  %v5023_v15 = vsub.f32 %v11724_v16, %v12428_v11  ;;  %v12246_v7 = vand.u32 4294901760, %v11741_v52  ;;  %8735 = vmatmul.mubr.f32.gmra.mrb[28].mxu1 %v5004_v51  ;;  %v5014_v58 = vand.u32 4294901760, %v5013_v45  ;;  %v4838_v25 = vsel %vm2280_vm1, %v9985_v18, 0 }
 0x503   : > { %12429 = vst [vmem:[#allocation27_spill] sm:$0xff] %v11757_v8  ;;  %v9989_v56 = vpop.eup %9988  ;;  %v6188_v29 = vand.u32 4294901760, %v6187_v4  ;;  %v12250_v59 = vand.u32 4294901760, %v11751_v20  ;;  %8906 = vmatmul.mubr.f32.gmra.mrb[42].mxu0 %v6178_v22  ;;  %v11765_v11 = vsub.f32 %v4835_v24, %v11757_v8  ;;  %v11767_v50 = vand.u32 4294901760, %v4838_v25 }
 0x504   : > { %v5024_v54 = vand.u32 4294901760, %v5023_v15  ;;  %v6197_v47 = vsub.f32 %v11741_v52, %v12246_v7  ;;  %8737 = vmatprep.mubr.f32.mxu1 %v5014_v58  ;;  %v4841_v51 = vsel %vm2280_vm1, %v9983_v5, 0  ;;  %v5992_v22 = vsel %vm2280_vm1, %v9989_v56, 0 }
 0x505   : > { %12430 = vst [vmem:[#allocation24_spill] sm:$0xff] %v11767_v50  ;;  %8908 = vmatprep.mubr.f32.mxu0 %v6188_v29  ;;  %v5033_v4 = vsub.f32 %v11751_v20, %v12250_v59  ;;  %v5995_v18 = vsel %vm2280_vm1, %v9987_v40, 0  ;;  %v12249_v45 = vand.u32 4294901760, %v11765_v11  ;;  %v11777_v24 = vsub.f32 %v4838_v25, %v11767_v50 }
 0x506   : > { %v6198_v15 = vand.u32 4294901760, %v6197_v47  ;;  %v11779_v7 = vand.u32 4294901760, %v4841_v51  ;;  %8738 = vmatmul.mubr.f32.gmra.mrb[30].mxu1 %v5024_v54  ;;  %v11781_v58 = vand.u32 4294901760, %v5992_v22  ;;  %v11783_v52 = vand.u32 4294901760, %v5995_v18 }
 0x507   : > { %12431 = vst [vmem:[#allocation25_spill] sm:$0xff] %v11777_v24  ;;  %v5034_v29 = vand.u32 4294901760, %v5033_v4  ;;  %v5043_v5 = vsub.f32 %v11765_v11, %v12249_v45  ;;  %v12251_v56 = vand.u32 4294901760, %v11777_v24 }
 0x508   : > { %12432 = vst [vmem:[#allocation28_spill] sm:$0xff] %v11779_v7  ;;  %12433 = vst [vmem:[#allocation29_spill] sm:$0xff] %v11781_v58  ;;  %8909 = vmatmul.mubr.f32.gmra.mrb[44].mxu0 %v6198_v15  ;;  %v11790_v40 = vsub.f32 %v4841_v51, %v11779_v7  ;;  %v11793_v25 = vsub.f32 %v5992_v22, %v11781_v58  ;;  %v11796_v54 = vsub.f32 %v5995_v18, %v11783_v52 }
 0x509   : > { %12434 = vst [vmem:[#allocation30_spill] sm:$0xff] %v11783_v52  ;;  %8740 = vmatprep.mubr.f32.mxu1 %v5034_v29  ;;  %v5044_v47 = vand.u32 4294901760, %v5043_v5  ;;  %v5053_v4 = vsub.f32 %v11777_v24, %v12251_v56 }
 0x50a   : > { %v12255_v15 = vand.u32 4294901760, %v11790_v40  ;;  %v12256_v45 = vand.u32 4294901760, %v11793_v25  ;;  %v12254_v59 = vand.u32 4294901760, %v11796_v54 }
 0x50b   : > { %8741 = vmatmul.mubr.f32.gmra.mrb[32].mxu1 %v5044_v47  ;;  %v5054_v51 = vand.u32 4294901760, %v5053_v4  ;;  %v12438_v47 = vand.u32 4294901760, %v11399_v41  ;;  %v12442_v41 = vld [vmem:[#allocation5_spill] sm:$0xff] }
 0x50c   : > { %v5063_v22 = vsub.f32 %v11790_v40, %v12255_v15  ;;  %v6207_v18 = vsub.f32 %v11793_v25, %v12256_v45  ;;  %v6217_v29 = vsub.f32 %v11796_v54, %v12254_v59  ;;  %v12452_v59 = vld [vmem:[#allocation18_spill] sm:$0xff]  ;;  %v12454_v45 = vld [vmem:[#allocation12_spill] sm:$0xff] }
 0x50d   : > { %8743 = vmatprep.mubr.f32.mxu1 %v5054_v51  ;;  %v12443_v51 = vld [vmem:[#allocation9_spill] sm:$0xff]  ;;  %v12453_v15 = vld [vmem:[#allocation10_spill] sm:$0xff] }
 0x50e   : > { %v5064_v5 = vand.u32 4294901760, %v5063_v22  ;;  %v6208_v56 = vand.u32 4294901760, %v6207_v18  ;;  %v6218_v24 = vand.u32 4294901760, %v6217_v29  ;;  %v12444_v22 = vld [vmem:[#allocation11_spill] sm:$0xff]  ;;  %v12445_v18 = vld [vmem:[#allocation20_spill] sm:$0xff] }
 0x50f   : > { %v12446_v29 = vld [vmem:[#allocation4_spill] sm:$0xff] }
 0x510   : > { %8744 = vmatmul.mubr.f32.gmra.mrb[34].mxu1 %v5064_v5  ;;  %8911 = vmatprep.mubr.f32.mxu0 %v6208_v56  ;;  %v12437_v56 = vand.u32 4294901760, %v11397_v61  ;;  %v12441_v61 = vld [vmem:[#allocation3_spill] sm:$0xff]  ;;  %v12447_v5 = vld [vmem:[#allocation13_spill] sm:$0xff] }
 0x511   : > { %8750 = vmatprep.mubr.f32.mxu1 %v11469_v12  ;;  %8912 = vmatmul.mubr.f32.gmra.mrb[46].mxu0 %v6218_v24 }
 0x512   : > { %8918 = vmatprep.mubr.f32.mxu0 %v11441_v48  ;;  %v9430_v4 = vpack.c.bf16 %v12438_v47, %v12437_v56  ;;  %v12450_v56 = vld [vmem:[#allocation8_spill] sm:$0xff]  ;;  %v12451_v47 = vld [vmem:[#allocation14_spill] sm:$0xff] }
 0x514   : > { %8751 = vmatmul.mubr.f32.vlgmr.msra.gmra.mrb[20].mxu1 %v11455_v49 }
 0x515   : > { %8753 = vmatprep.mubr.f32.mxu1 %v11523_v6  ;;  %9401 = vmatpush3.bf16.msra.mxu1 %v11417_v13  ;;  %v12435_v13 = vand.u32 4294901760, %v11385_v37  ;;  %v12439_v37 = vld [vmem:[#allocation2_spill] sm:$0xff] }
 0x516   : > { %8919 = vmatmul.mubr.f32.vlgmr.msra.gmra.mrb[32].mxu0 %v11434_v23  ;;  %9403 = vmatprep.subr.bf16.mxu1 %v11381_v35 }
 0x517   : > { %8921 = vmatprep.mubr.f32.mxu0 %v11483_v42  ;;  %9425 = vmatpush3.bf16.msra.mxu0 %v11421_v14  ;;  %v12436_v14 = vand.u32 4294901760, %v11387_v28  ;;  %v12440_v28 = vld [vmem:[#allocation7_spill] sm:$0xff] }
 0x518   : > { %8754 = vmatmul.mubr.f32.gmra.mrb[22].mxu1 %v11549_v39  ;;  %9427 = vmatprep.subr.bf16.mxu0 %v11371_v63 }
 0x519   : > { %8756 = vmatprep.mubr.f32.mxu1 %v11568_v38  ;;  %v9406_v24 = vpack.c.bf16 %v12436_v14, %v12435_v13  ;;  %v12448_v13 = vld [vmem:[#allocation15_spill] sm:$0xff]  ;;  %v12449_v14 = vld [vmem:[#allocation6_spill] sm:$0xff] }
 0x51a   : > { %8922 = vmatmul.mubr.f32.gmra.mrb[34].mxu0 %v11500_v36 }
 0x51b   : > { %8924 = vmatprep.mubr.f32.mxu0 %v11528_v21 }
 0x51c   : > { %8757 = vmatmul.mubr.f32.gmra.mrb[24].mxu1 %v11586_v46 }
 0x51d   : > { %8759 = vmatprep.mubr.f32.mxu1 %v11619_v33 }
 0x51e   : > { %8925 = vmatmul.mubr.f32.gmra.mrb[36].mxu0 %v11559_v57 }
 0x51f   : > { %8927 = vmatprep.mubr.f32.mxu0 %v11570_v34 }
 0x520   : > { %8760 = vmatmul.mubr.f32.gmra.mrb[26].mxu1 %v11644_v27 }
 0x521   : > { %8762 = vmatprep.mubr.f32.mxu1 %v11649_v31 }
 0x522   : > { %8928 = vmatmul.mubr.f32.gmra.mrb[38].mxu0 %v11601_v32 }
 0x523   : > { %8930 = vmatprep.mubr.f32.mxu0 %v11628_v17 }
 0x524   : > { %8763 = vmatmul.mubr.f32.gmra.mrb[28].mxu1 %v11688_v43 }
 0x525   : > { %8765 = vmatprep.mubr.f32.mxu1 %v11704_v9 }
 0x526   : > { %8931 = vmatmul.mubr.f32.gmra.mrb[40].mxu0 %v11647_v2 }
 0x527   : > { %8933 = vmatprep.mubr.f32.mxu0 %v11674_v19 }
 0x528   : > { %8766 = vmatmul.mubr.f32.gmra.mrb[30].mxu1 %v11711_v10 }
 0x529   : > { %8768 = vmatprep.mubr.f32.mxu1 %v11734_v3  ;;  %v12463_v3 = vand.u32 4294901760, %v11444_v30 }
 0x52a   : > { %8934 = vmatmul.mubr.f32.gmra.mrb[42].mxu0 %v11692_v60  ;;  %v12462_v60 = vand.u32 4294901760, %v11532_v1 }
 0x52b   : > { %8936 = vmatprep.mubr.f32.mxu0 %v11706_v44  ;;  %v12461_v44 = vand.u32 4294901760, %v11478_v26 }
 0x52c   : > { %8769 = vmatmul.mubr.f32.gmra.mrb[32].mxu1 %v11757_v8  ;;  %v12460_v8 = vand.u32 4294901760, %v11451_v62 }
 0x52d   : > { %8771 = vmatprep.mubr.f32.mxu1 %v11767_v50  ;;  %v12459_v50 = vand.u32 4294901760, %v11481_v0 }
 0x52e   : > { %8937 = vmatmul.mubr.f32.gmra.mrb[44].mxu0 %v11726_v53  ;;  %v12458_v53 = vld [vmem:[#allocation22_spill] sm:$0xff] }
 0x52f   : > { %8939 = vmatprep.mubr.f32.mxu0 %v11781_v58  ;;  %v12457_v58 = vld [vmem:[#allocation25_spill] sm:$0xff] }
 0x530   : > { %8772 = vmatmul.mubr.f32.gmra.mrb[34].mxu1 %v11779_v7  ;;  %v12456_v7 = vld [vmem:[#allocation23_spill] sm:$0xff] }
 0x531   : > { %8778 = vmatprep.mubr.f32.mxu1 %v11481_v0  ;;  %v12464_v0 = vand.u32 4294901760, %v11492_v55 }
 0x532   : > { %8940 = vmatmul.mubr.f32.gmra.mrb[46].mxu0 %v11783_v52  ;;  %v12455_v52 = vld [vmem:[#allocation16_spill] sm:$0xff] }
 0x533   : > { %8946 = vmatprep.mubr.f32.mxu0 %v11451_v62  ;;  %v12466_v62 = vand.u32 4294901760, %v12440_v28 }
 0x534   : > { %8779 = vmatmul.mubr.f32.vlgmr.msra.gmra.mrb[20].mxu1 %v11478_v26  ;;  %v12467_v26 = vand.u32 4294901760, %v12441_v61 }
 0x535   : > { %8781 = vmatprep.mubr.f32.mxu1 %v11532_v1  ;;  %9405 = vmatpush3.bf16.msra.mxu1 %v11381_v35  ;;  %v12469_v1 = vand.u32 4294901760, %v12443_v51 }
 0x536   : > { %8947 = vmatmul.mubr.f32.vlgmr.msra.gmra.mrb[32].mxu0 %v11444_v30  ;;  %9407 = vmatprep.subr.bf16.mxu1 %v9406_v24  ;;  %v12468_v30 = vand.u32 4294901760, %v12442_v41 }
 0x537   : > { %8949 = vmatprep.mubr.f32.mxu0 %v11492_v55  ;;  %9429 = vmatpush3.bf16.msra.mxu0 %v11371_v63  ;;  %v12470_v55 = vand.u32 4294901760, %v12444_v22 }
 0x538   : > { %8782 = vmatmul.mubr.f32.gmra.mrb[22].mxu1 %v12439_v37  ;;  %9431 = vmatprep.subr.bf16.mxu0 %v9430_v4 }
 0x539   : > { %8784 = vmatprep.mubr.f32.mxu1 %v12440_v28  ;;  %v12478_v28 = vand.u32 4294901760, %v12452_v59 }
 0x53a   : > { %8950 = vmatmul.mubr.f32.gmra.mrb[34].mxu0 %v12441_v61  ;;  %v12479_v61 = vand.u32 4294901760, %v12453_v15 }
 0x53b   : > { %8952 = vmatprep.mubr.f32.mxu0 %v12442_v41  ;;  %v12480_v41 = vand.u32 4294901760, %v12454_v45 }
 0x53c   : > { %8785 = vmatmul.mubr.f32.gmra.mrb[24].mxu1 %v12443_v51  ;;  %v12481_v51 = vand.u32 4294901760, %v11724_v16 }
 0x53d   : > { %8787 = vmatprep.mubr.f32.mxu1 %v12444_v22  ;;  %v12482_v22 = vand.u32 4294901760, %v11751_v20 }
 0x53e   : > { %8953 = vmatmul.mubr.f32.gmra.mrb[36].mxu0 %v12445_v18 }
 0x53f   : > { %8955 = vmatprep.mubr.f32.mxu0 %v12446_v29 }
 0x540   : > { %8788 = vmatmul.mubr.f32.gmra.mrb[26].mxu1 %v12447_v5 }
 0x541   : > { %8790 = vmatprep.mubr.f32.mxu1 %v12448_v13 }
 0x542   : > { %8956 = vmatmul.mubr.f32.gmra.mrb[38].mxu0 %v12449_v14 }
 0x543   : > { %8958 = vmatprep.mubr.f32.mxu0 %v12450_v56 }
 0x544   : > { %8791 = vmatmul.mubr.f32.gmra.mrb[28].mxu1 %v12451_v47 }
 0x545   : > { %8793 = vmatprep.mubr.f32.mxu1 %v12452_v59  ;;  %v12485_v59 = vand.u32 4294901760, %v11765_v11 }
 0x546   : > { %8959 = vmatmul.mubr.f32.gmra.mrb[40].mxu0 %v12453_v15  ;;  %v12486_v15 = vand.u32 4294901760, %v12457_v58 }
 0x547   : > { %8961 = vmatprep.mubr.f32.mxu0 %v12454_v45  ;;  %v12487_v45 = vand.u32 4294901760, %v12458_v53 }
 0x548   : > { %8794 = vmatmul.mubr.f32.gmra.mrb[30].mxu1 %v11724_v16  ;;  %v12488_v16 = vand.u32 4294901760, %v11793_v25 }
 0x549   : > { %8796 = vmatprep.mubr.f32.mxu1 %v11751_v20  ;;  %v12489_v20 = vand.u32 4294901760, %v11790_v40 }
 0x54a   : > { %8962 = vmatmul.mubr.f32.gmra.mrb[42].mxu0 %v12455_v52 }
 0x54b   : > { %8964 = vmatprep.mubr.f32.mxu0 %v12456_v7 }
 0x54c   : > { %8797 = vmatmul.mubr.f32.gmra.mrb[32].mxu1 %v11765_v11  ;;  %v12495_v11 = vld [vmem:[#allocation24_spill] sm:$0xff] }
 0x54d   : > { %8799 = vmatprep.mubr.f32.mxu1 %v12457_v58  ;;  %v12496_v58 = vld [vmem:[#allocation21_spill] sm:$0xff] }
 0x54e   : > { %8965 = vmatmul.mubr.f32.gmra.mrb[44].mxu0 %v12458_v53  ;;  %v12493_v53 = vld [vmem:[#allocation19_spill] sm:$0xff] }
 0x54f   : > { %8967 = vmatprep.mubr.f32.mxu0 %v11793_v25  ;;  %v12498_v25 = vld [vmem:[#allocation28_spill] sm:$0xff] }
 0x550   : > { %8800 = vmatmul.mubr.f32.gmra.mrb[34].mxu1 %v11790_v40  ;;  %v12497_v40 = vld [vmem:[#allocation29_spill] sm:$0xff] }
 0x551   : > { %8806 = vmatprep.mubr.f32.mxu1 %v12459_v50  ;;  %v12465_v50 = vand.u32 4294901760, %v12439_v37  ;;  %v12477_v37 = vand.u32 4294901760, %v12451_v47 }
 0x552   : > { %8968 = vmatmul.mubr.f32.gmra.mrb[46].mxu0 %v11796_v54 }
 0x553   : > { %8974 = vmatprep.mubr.f32.mxu0 %v12460_v8  ;;  %v12474_v8 = vand.u32 4294901760, %v12448_v13 }
 0x554   : > { %8807 = vmatmul.mubr.f32.vlgmr.msra.gmra.mrb[20].mxu1 %v12461_v44  ;;  %v12472_v44 = vand.u32 4294901760, %v12446_v29  ;;  %v12484_v29 = vand.u32 4294901760, %v12456_v7  ;;  %v12494_v7 = vld [vmem:[#allocation27_spill] sm:$0xff] }
 0x555   : > { %8809 = vmatprep.mubr.f32.mxu1 %v12462_v60  ;;  %9409 = vmatpush3.bf16.msra.mxu1 %v9406_v24  ;;  %v12471_v60 = vand.u32 4294901760, %v12445_v18  ;;  %v12475_v24 = vand.u32 4294901760, %v12449_v14  ;;  %v12483_v18 = vand.u32 4294901760, %v12455_v52  ;;  %v12490_v52 = vand.u32 4294901760, %v11796_v54  ;;  %v12499_v54 = vld [vmem:[#allocation30_spill] sm:$0xff] }
 0x556   : > { %8975 = vmatmul.mubr.f32.vlgmr.msra.gmra.mrb[32].mxu0 %v12463_v3  ;;  %9411 = vmatprep.subr.bf16.mxu1 %v11381_v35  ;;  %v12473_v3 = vand.u32 4294901760, %v12447_v5 }
 0x557   : > { %8977 = vmatprep.mubr.f32.mxu0 %v12464_v0  ;;  %9433 = vmatpush3.bf16.msra.mxu0 %v9430_v4  ;;  %v12476_v4 = vand.u32 4294901760, %v12450_v56  ;;  %v9994_v0 = vld [vmem:[%s10126_s28 + $0x28] sm:$0xff] }
 0x558   : > { %8810 = vmatmul.mubr.f32.gmra.mrb[22].mxu1 %v12465_v50  ;;  %9435 = vmatprep.subr.bf16.mxu0 %v11371_v63 }
 0x559   : > { %8812 = vmatprep.mubr.f32.mxu1 %v12466_v62  ;;  %v9995_v62 = vld [vmem:[%s10126_s28 + $0x20] sm:$0xff] }
 0x55a   : > { %8978 = vmatmul.mubr.f32.gmra.mrb[34].mxu0 %v12467_v26 }
 0x55b   : > { %8980 = vmatprep.mubr.f32.mxu0 %v12468_v30 }
 0x55c   : > { %8813 = vmatmul.mubr.f32.gmra.mrb[24].mxu1 %v12469_v1 }
 0x55d   : > { %8815 = vmatprep.mubr.f32.mxu1 %v12470_v55 }
 0x55e   : > { %8981 = vmatmul.mubr.f32.gmra.mrb[36].mxu0 %v12471_v60 }
 0x55f   : > { %8983 = vmatprep.mubr.f32.mxu0 %v12472_v44 }
 0x560   : > { %8816 = vmatmul.mubr.f32.gmra.mrb[26].mxu1 %v12473_v3 }
 0x561   : > { %8818 = vmatprep.mubr.f32.mxu1 %v12474_v8  ;;  %v9996_v8 = vld [vmem:[%s10126_s28 + $0x38] sm:$0xff] }
 0x562   : > { %8984 = vmatmul.mubr.f32.gmra.mrb[38].mxu0 %v12475_v24 }
 0x563   : > { %8986 = vmatprep.mubr.f32.mxu0 %v12476_v4  ;;  %v9997_v4 = vld [vmem:[%s10126_s28 + $0x30] sm:$0xff] }
 0x564   : > { %8819 = vmatmul.mubr.f32.gmra.mrb[28].mxu1 %v12477_v37 }
 0x565   : > { %8821 = vmatprep.mubr.f32.mxu1 %v12478_v28 }
 0x566   : > { %8987 = vmatmul.mubr.f32.gmra.mrb[40].mxu0 %v12479_v61 }
 0x567   : > { %8989 = vmatprep.mubr.f32.mxu0 %v12480_v41 }
 0x568   : > { %8822 = vmatmul.mubr.f32.gmra.mrb[30].mxu1 %v12481_v51 }
 0x569   : > { %8824 = vmatprep.mubr.f32.mxu1 %v12482_v22 }
 0x56a   : > { %8990 = vmatmul.mubr.f32.gmra.mrb[42].mxu0 %v12483_v18 }
 0x56b   : > { %8992 = vmatprep.mubr.f32.mxu0 %v12484_v29  ;;  %v9998_v29 = vld [vmem:[%s10126_s28 + $0x48] sm:$0xff] }
 0x56c   : > { %8825 = vmatmul.mubr.f32.gmra.mrb[32].mxu1 %v12485_v59 }
 0x56d   : > { %8827 = vmatprep.mubr.f32.mxu1 %v12486_v15  ;;  %v9999_v15 = vld [vmem:[%s10126_s28 + $0x40] sm:$0xff] }
 0x56e   : > { %8993 = vmatmul.mubr.f32.gmra.mrb[44].mxu0 %v12487_v45 }
 0x56f   : > { %8995 = vmatprep.mubr.f32.mxu0 %v12488_v16 }
 0x570   : > { %8828 = vmatmul.mubr.f32.gmra.mrb[34].mxu1 %v12489_v20 }
 0x571   : > { %8834 = vmatprep.mubr.f32.mxu1 %v11469_v12 }
 0x572   : > { %8996 = vmatmul.mubr.f32.gmra.mrb[46].mxu0 %v12490_v52 }
 0x573   : > { %9002 = vmatprep.mubr.f32.mxu0 %v11441_v48 }
 0x574   : > { %8835 = vmatmul.mubr.f32.vlgmr.msra.gmra.mrb[20].mxu1 %v11455_v49 }
 0x575   : > { %8837 = vmatprep.mubr.f32.mxu1 %v11523_v6  ;;  %9413 = vmatpush3.bf16.msra.mxu1 %v11381_v35  ;;  %v12492_v35 = vld [vmem:[#allocation17_spill] sm:$0xff] }
 0x576   : > { %9003 = vmatmul.mubr.f32.vlgmr.msra.gmra.mrb[32].mxu0 %v11434_v23 }
 0x577   : > { %9005 = vmatprep.mubr.f32.mxu0 %v11483_v42  ;;  %9437 = vmatpush3.bf16.msra.mxu0 %v11371_v63  ;;  %v12491_v63 = vld [vmem:[#allocation26_spill] sm:$0xff] }
 0x578   : > { %8838 = vmatmul.mubr.f32.gmra.mrb[22].mxu1 %v11549_v39 }
 0x579   : > { %8840 = vmatprep.mubr.f32.mxu1 %v11568_v38 }
 0x57a   : > { %9006 = vmatmul.mubr.f32.gmra.mrb[34].mxu0 %v11500_v36 }
 0x57b   : > { %9008 = vmatprep.mubr.f32.mxu0 %v11528_v21 }
 0x57c   : > { %8841 = vmatmul.mubr.f32.gmra.mrb[24].mxu1 %v11586_v46 }
 0x57d   : > { %8843 = vmatprep.mubr.f32.mxu1 %v11619_v33 }
 0x57e   : > { %9009 = vmatmul.mubr.f32.gmra.mrb[36].mxu0 %v11559_v57 }
 0x57f   : > { %9011 = vmatprep.mubr.f32.mxu0 %v11570_v34 }
 0x580   : > { %8844 = vmatmul.mubr.f32.gmra.mrb[26].mxu1 %v11644_v27 }
 0x581   : > { %8846 = vmatprep.mubr.f32.mxu1 %v11649_v31 }
 0x582   : > { %9012 = vmatmul.mubr.f32.gmra.mrb[38].mxu0 %v11601_v32 }
 0x583   : > { %9014 = vmatprep.mubr.f32.mxu0 %v11628_v17 }
 0x584   : > { %8847 = vmatmul.mubr.f32.gmra.mrb[28].mxu1 %v11688_v43 }
 0x585   : > { %8849 = vmatprep.mubr.f32.mxu1 %v11704_v9 }
 0x586   : > { %9015 = vmatmul.mubr.f32.gmra.mrb[40].mxu0 %v11647_v2 }
 0x587   : > { %9017 = vmatprep.mubr.f32.mxu0 %v11674_v19 }
 0x588   : > { %8850 = vmatmul.mubr.f32.gmra.mrb[30].mxu1 %v11711_v10 }
 0x589   : > { %8852 = vmatprep.mubr.f32.mxu1 %v12491_v63 }
 0x58a   : > { %9018 = vmatmul.mubr.f32.gmra.mrb[42].mxu0 %v12492_v35 }
 0x58b   : > { %9020 = vmatprep.mubr.f32.mxu0 %v12493_v53 }
 0x58c   : > { %8853 = vmatmul.mubr.f32.gmra.mrb[32].mxu1 %v12494_v7 }
 0x58d   : > { %8855 = vmatprep.mubr.f32.mxu1 %v12495_v11 }
 0x58e   : > { %9021 = vmatmul.mubr.f32.gmra.mrb[44].mxu0 %v12496_v58 }
 0x58f   : > { %9023 = vmatprep.mubr.f32.mxu0 %v12497_v40 }
 0x590   : > { %8856 = vmatmul.mubr.f32.gmra.mrb[34].mxu1 %v12498_v25 }
 0x591   : > { %8862 = vmatprep.mubr.f32.mxu1 %v11469_v12 }
 0x592   : > { %9024 = vmatmul.mubr.f32.gmra.mrb[46].mxu0 %v12499_v54 }
 0x593   : > { %9030 = vmatprep.mubr.f32.mxu0 %v11441_v48 }
 0x594   : > { %8863 = vmatmul.mubr.f32.vlgmr.msra.gmra.mrb[20].mxu1 %v11455_v49 }
 0x595   : > { %8865 = vmatprep.mubr.f32.mxu1 %v11523_v6 }
 0x596   : > { %9031 = vmatmul.mubr.f32.vlgmr.msra.gmra.mrb[32].mxu0 %v11434_v23 }
 0x597   : > { %9033 = vmatprep.mubr.f32.mxu0 %v11483_v42 }
 0x598   : > { %8866 = vmatmul.mubr.f32.gmra.mrb[22].mxu1 %v11549_v39  ;;  %v9991_v39 = vld [vmem:[%s10126_s28] sm:$0xff] }
 0x599   : > { %8868 = vmatprep.mubr.f32.mxu1 %v11568_v38 }
 0x59a   : > { %9034 = vmatmul.mubr.f32.gmra.mrb[34].mxu0 %v11500_v36 }
 0x59b   : > { %9036 = vmatprep.mubr.f32.mxu0 %v11528_v21  ;;  %v9990_v21 = vld [vmem:[%s10126_s28 + $0x8] sm:$0xff] }
 0x59c   : > { %8869 = vmatmul.mubr.f32.gmra.mrb[24].mxu1 %v11586_v46 }
 0x59d   : > { %8871 = vmatprep.mubr.f32.mxu1 %v11619_v33 }
 0x59e   : > { %9037 = vmatmul.mubr.f32.gmra.mrb[36].mxu0 %v11559_v57 }
 0x59f   : > { %9039 = vmatprep.mubr.f32.mxu0 %v11570_v34 }
 0x5a0   : > { %8872 = vmatmul.mubr.f32.gmra.mrb[26].mxu1 %v11644_v27 }
 0x5a1   : > { %8874 = vmatprep.mubr.f32.mxu1 %v11649_v31  ;;  %v9992_v31 = vld [vmem:[%s10126_s28 + $0x18] sm:$0xff] }
 0x5a2   : > { %9040 = vmatmul.mubr.f32.gmra.mrb[38].mxu0 %v11601_v32 }
 0x5a3   : > { %9042 = vmatprep.mubr.f32.mxu0 %v11628_v17 }
 0x5a4   : > { %8875 = vmatmul.mubr.f32.gmra.mrb[28].mxu1 %v11688_v43 }
 0x5a5   : > { %8877 = vmatprep.mubr.f32.mxu1 %v11704_v9 }
 0x5a6   : > { %9043 = vmatmul.mubr.f32.gmra.mrb[40].mxu0 %v11647_v2 }
 0x5a7   : > { %9045 = vmatprep.mubr.f32.mxu0 %v11674_v19  ;;  %v9993_v19 = vld [vmem:[%s10126_s28 + $0x10] sm:$0xff] }
 0x5a8   : > { %8878 = vmatmul.mubr.f32.gmra.mrb[30].mxu1 %v11711_v10 }
 0x5a9   : > { %8880 = vmatprep.mubr.f32.mxu1 %v12491_v63 }
 0x5aa   : > { %9046 = vmatmul.mubr.f32.gmra.mrb[42].mxu0 %v12492_v35 }
 0x5ab   : > { %9048 = vmatprep.mubr.f32.mxu0 %v12493_v53 }
 0x5ac   : > { %8881 = vmatmul.mubr.f32.gmra.mrb[32].mxu1 %v12494_v7  ;;  %v10000_v7 = vld [vmem:[%s10126_s28 + $0x58] sm:$0xff] }
 0x5ad   : > { %8883 = vmatprep.mubr.f32.mxu1 %v12495_v11 }
 0x5ae   : > { %9049 = vmatmul.mubr.f32.gmra.mrb[44].mxu0 %v12496_v58  ;;  %v10001_v58 = vld [vmem:[%s10126_s28 + $0x50] sm:$0xff] }
 0x5af   : > { %9051 = vmatprep.mubr.f32.mxu0 %v12497_v40 }
 0x5b0   : > { %8884 = vmatmul.mubr.f32.gmra.mrb[34].mxu1 %v12498_v25 }
 0x5b2   : > { %9052 = vmatmul.mubr.f32.gmra.mrb[46].mxu0 %v12499_v54 }
 0x667   : > { %v8864_v2 = vpop.f32.mrb[20].mxu1 }
 0x668   : > { %v5853_v23 = vpop.f32.mrb[21].mxu1 }
 0x669   : > { %v9032_v48 = vpop.f32.mrb[32].mxu0 }
 0x66a   : > { %v7102_v49 = vmul.f32 %v9032_v48, %v8864_v2  ;;  %v7007_v12 = vpop.f32.mrb[33].mxu0 }
 0x66b   : > { %v8867_v42 = vpop.f32.mrb[22].mxu1  ;;  %v7101_v36 = vmul.f32 %v7007_v12, %v5853_v23  ;;  %v10002_v12 = vld [vmem:[%s10126_s28 + $0x68] sm:$0xff] }
 0x66c   : > { %v5865_v6 = vpop.f32.mrb[23].mxu1  ;;  %v7118_v46 = vmul.f32 %v9990_v21, %v7102_v49 }
 0x66d   : > { %v7117_v57 = vmul.f32 %v9991_v39, %v7101_v36  ;;  %v9035_v38 = vpop.f32.mrb[34].mxu0  ;;  %v10003_v36 = vld [vmem:[%s10126_s28 + $0x60] sm:$0xff] }
 0x66e   : > { %7134 = vst.msk [vmem:[%s12028_s18 + $0x8] sm:$0xff] %vm333_vm0, %v7118_v46  ;;  %v7104_v34 = vmul.f32 %v9035_v38, %v8867_v42  ;;  %v7019_v33 = vpop.f32.mrb[35].mxu0  ;;  %v10004_v38 = vld [vmem:[%s10126_s28 + $0x78] sm:$0xff] }
 0x66f   : > { %7133 = vst.msk [vmem:[%s12028_s18] sm:$0xff] %vm333_vm0, %v7117_v57  ;;  %v8870_v32 = vpop.f32.mrb[24].mxu1  ;;  %v7103_v17 = vmul.f32 %v7019_v33, %v5865_v6  ;;  %v10005_v33 = vld [vmem:[%s10126_s28 + $0x70] sm:$0xff] }
 0x670   : > { %v5877_v27 = vpop.f32.mrb[25].mxu1  ;;  %v7120_v43 = vmul.f32 %v9992_v31, %v7104_v34 }
 0x671   : > { %v7119_v9 = vmul.f32 %v9993_v19, %v7103_v17  ;;  %v9038_v10 = vpop.f32.mrb[36].mxu0 }
 0x672   : > { %7136 = vst.msk [vmem:[%s12028_s18 + $0x18] sm:$0xff] %vm333_vm0, %v7120_v43  ;;  %v7106_v5 = vmul.f32 %v9038_v10, %v8870_v32  ;;  %v7031_v13 = vpop.f32.mrb[37].mxu0 }
 0x673   : > { %7135 = vst.msk [vmem:[%s12028_s18 + $0x10] sm:$0xff] %vm333_vm0, %v7119_v9  ;;  %v8873_v14 = vpop.f32.mrb[26].mxu1  ;;  %v7105_v56 = vmul.f32 %v7031_v13, %v5877_v27 }
 0x674   : > { %v5889_v47 = vpop.f32.mrb[27].mxu1  ;;  %v7122_v50 = vmul.f32 %v9994_v0, %v7106_v5 }
 0x675   : > { %v7121_v26 = vmul.f32 %v9995_v62, %v7105_v56  ;;  %v9041_v30 = vpop.f32.mrb[38].mxu0 }
 0x676   : > { %7138 = vst.msk [vmem:[%s12028_s18 + $0x28] sm:$0xff] %vm333_vm0, %v7122_v50  ;;  %v7108_v1 = vmul.f32 %v9041_v30, %v8873_v14  ;;  %v7043_v55 = vpop.f32.mrb[39].mxu0 }
 0x677   : > { %7137 = vst.msk [vmem:[%s12028_s18 + $0x20] sm:$0xff] %vm333_vm0, %v7121_v26  ;;  %v8876_v60 = vpop.f32.mrb[28].mxu1  ;;  %v7107_v44 = vmul.f32 %v7043_v55, %v5889_v47 }
 0x678   : > { %v5901_v3 = vpop.f32.mrb[29].mxu1  ;;  %v7124_v24 = vmul.f32 %v9996_v8, %v7108_v1 }
 0x679   : > { %v7123_v37 = vmul.f32 %v9997_v4, %v7107_v44  ;;  %v9044_v28 = vpop.f32.mrb[40].mxu0 }
 0x67a   : > { %7140 = vst.msk [vmem:[%s12028_s18 + $0x38] sm:$0xff] %vm333_vm0, %v7124_v24  ;;  %v7110_v61 = vmul.f32 %v9044_v28, %v8876_v60  ;;  %v7055_v41 = vpop.f32.mrb[41].mxu0 }
 0x67b   : > { %7139 = vst.msk [vmem:[%s12028_s18 + $0x30] sm:$0xff] %vm333_vm0, %v7123_v37  ;;  %v8879_v51 = vpop.f32.mrb[30].mxu1  ;;  %v7109_v22 = vmul.f32 %v7055_v41, %v5901_v3 }
 0x67c   : > { %v5913_v18 = vpop.f32.mrb[31].mxu1  ;;  %v7126_v59 = vmul.f32 %v9998_v29, %v7110_v61 }
 0x67d   : > { %v7125_v45 = vmul.f32 %v9999_v15, %v7109_v22  ;;  %v9047_v16 = vpop.f32.mrb[42].mxu0 }
 0x67e   : > { %7142 = vst.msk [vmem:[%s12028_s18 + $0x48] sm:$0xff] %vm333_vm0, %v7126_v59  ;;  %v7112_v20 = vmul.f32 %v9047_v16, %v8879_v51  ;;  %v7067_v52 = vpop.f32.mrb[43].mxu0 }
 0x67f   : > { %7141 = vst.msk [vmem:[%s12028_s18 + $0x40] sm:$0xff] %vm333_vm0, %v7125_v45  ;;  %v8882_v63 = vpop.f32.mrb[32].mxu1  ;;  %v7111_v35 = vmul.f32 %v7067_v52, %v5913_v18 }
 0x680   : > { %v5925_v53 = vpop.f32.mrb[33].mxu1  ;;  %v7128_v11 = vmul.f32 %v10000_v7, %v7112_v20 }
 0x681   : > { %v7127_v40 = vmul.f32 %v10001_v58, %v7111_v35  ;;  %v9050_v25 = vpop.f32.mrb[44].mxu0 }
 0x682   : > { %7144 = vst.msk [vmem:[%s12028_s18 + $0x58] sm:$0xff] %vm333_vm0, %v7128_v11  ;;  %v7114_v54 = vmul.f32 %v9050_v25, %v8882_v63  ;;  %v7079_v2 = vpop.f32.mrb[45].mxu0 }
 0x683   : > { %7143 = vst.msk [vmem:[%s12028_s18 + $0x50] sm:$0xff] %vm333_vm0, %v7127_v40  ;;  %v8885_v23 = vpop.f32.mrb[34].mxu1  ;;  %v7113_v48 = vmul.f32 %v7079_v2, %v5925_v53 }
 0x684   : > { %v5937_v49 = vpop.f32.mrb[35].mxu1  ;;  %v7130_v42 = vmul.f32 %v10002_v12, %v7114_v54 }
 0x685   : > { %v7129_v6 = vmul.f32 %v10003_v36, %v7113_v48  ;;  %v9053_v21 = vpop.f32.mrb[46].mxu0 }
 0x686   : > { %7146 = vst.msk [vmem:[%s12028_s18 + $0x68] sm:$0xff] %vm333_vm0, %v7130_v42  ;;  %v7116_v46 = vmul.f32 %v9053_v21, %v8885_v23  ;;  %v7091_v39 = vpop.f32.mrb[47].mxu0 }
 0x687   : > { %7145 = vst.msk [vmem:[%s12028_s18 + $0x60] sm:$0xff] %vm333_vm0, %v7129_v6  ;;  %v7115_v57 = vmul.f32 %v7091_v39, %v5937_v49 }
 0x688   : > { %v7132_v34 = vmul.f32 %v10004_v38, %v7116_v46 }
 0x689   : > { %v7131_v32 = vmul.f32 %v10005_v33, %v7115_v57 }
 0x68a   : > { %7148 = vst.msk [vmem:[%s12028_s18 + $0x78] sm:$0xff] %vm333_vm0, %v7132_v34 }
 0x68b   : > { %7147 = vst.msk [vmem:[%s12028_s18 + $0x70] sm:$0xff] %vm333_vm0, %v7131_v32 }
 0x68c PF: > { %s18_s27 = sadd.s32 1, %s10012_s27  }
 0x68d   : > { %p15_p4 = scmp.ge.s32.totalorder %s18_s27, 4  }
 0x68f   :  { %17 = sbr.rel (!%p15_p4) target bundleno = 1 (0x1), region = 82 }

</bundles_post_ra>
